<compile_context>
chip_gen: v6e
topology: v6e:2x2x1
jax: 0.10.0
libtpu: 0.0.40
codegen_flags: <defaults>
</compile_context>

<pallas_src>
import jax
import jax.numpy as jnp
import numpy as np
from jax.experimental import pallas as pl
from jax.experimental.pallas import tpu as pltpu

LANE = 128
MATMUL_DTYPE = jnp.float32   # set to jnp.bfloat16 on v5e (f32 accumulation kept)


def _round_up(x, m):
    return (x + m - 1) // m * m


# ----------------------------------------------------------------------------
# Fused kernel: [conv3x3 + affine(BN) + ReLU] x 2 for one batch element.
# ----------------------------------------------------------------------------
def _make_fused_upblock_kernel(H, W, Cp, Pp):
    def kernel(x_ref, w1_ref, s1_ref, b1_ref, w2_ref, s2_ref, b2_ref,
               out_ref, xpad_ref, ypad_ref):
        # x_ref:    (1, H, W, Cp)   channel-padded input tile
        # w1_ref:   (9*Cp, Pp)      conv1 weights, tap-major im2col layout
        # s1_ref:   (1, Pp)         folded BN1 scale
        # b1_ref:   (1, Pp)         folded BN1 bias (conv bias folded in)
        # w2_ref:   (9*Pp, Pp), s2_ref/b2_ref: (1, Pp)
        # out_ref:  (1, H, W, Pp)
        # xpad_ref: (H+2, W+2, Cp)  VMEM scratch with zero halo
        # ypad_ref: (H+2, W+2, Pp)  VMEM scratch with zero halo
        f32 = jnp.float32

        # Zero only the 1-pixel halo borders every step (interior is fully
        # rewritten; safe under "parallel" grid semantics / per-core scratch).
        xpad_ref[0:1, :, :] = jnp.zeros((1, W + 2, Cp), f32)
        xpad_ref[H + 1:H + 2, :, :] = jnp.zeros((1, W + 2, Cp), f32)
        xpad_ref[:, 0:1, :] = jnp.zeros((H + 2, 1, Cp), f32)
        xpad_ref[:, W + 1:W + 2, :] = jnp.zeros((H + 2, 1, Cp), f32)
        ypad_ref[0:1, :, :] = jnp.zeros((1, W + 2, Pp), f32)
        ypad_ref[H + 1:H + 2, :, :] = jnp.zeros((1, W + 2, Pp), f32)
        ypad_ref[:, 0:1, :] = jnp.zeros((H + 2, 1, Pp), f32)
        ypad_ref[:, W + 1:W + 2, :] = jnp.zeros((H + 2, 1, Pp), f32)

        xpad_ref[1:H + 1, 1:W + 1, :] = x_ref[0].astype(f32)

        def conv_affine_relu(pad_ref, C, w_ref, s_ref, b_ref):
            # im2col: nine shifted (H*W, C) patches stacked along K -> a single
            # deep-K MXU matmul; result accumulates in f32, no scratch RMW.
            taps = []
            for dh in range(3):
                for dw in range(3):
                    taps.append(
                        pad_ref[dh:dh + H, dw:dw + W, :].reshape(H * W, C))
            slab = jnp.concatenate(taps, axis=-1)              # (H*W, 9*C)
            y = jnp.dot(slab.astype(MATMUL_DTYPE),
                        w_ref[...].astype(MATMUL_DTYPE),
                        preferred_element_type=jnp.float32)    # (H*W, Pp)
            y = y * s_ref[...] + b_ref[...]                    # folded BN
            return jnp.maximum(y, 0.0)                         # ReLU

        y1 = conv_affine_relu(xpad_ref, Cp, w1_ref, s1_ref, b1_ref)
        ypad_ref[1:H + 1, 1:W + 1, :] = y1.reshape(H, W, Pp)

        y2 = conv_affine_relu(ypad_ref, Pp, w2_ref, s2_ref, b2_ref)
        out_ref[...] = y2.reshape(1, H, W, Pp).astype(out_ref.dtype)

    return kernel


def fused_conv_bn_relu_x2(x_nhwc, w1, s1, b1, w2, s2, b2):
    """x_nhwc: (N,H,W,Cp) channel-padded; w1:(9*Cp,Pp); w2:(9*Pp,Pp); s/b:(1,Pp)."""
    N, H, W, Cp = x_nhwc.shape
    Pp = w1.shape[-1]
    kernel = _make_fused_upblock_kernel(H, W, Cp, Pp)

    flops = 2 * N * H * W * 9 * (Cp * Pp + Pp * Pp)
    bytes_accessed = 4 * (x_nhwc.size + N * H * W * Pp + w1.size + w2.size + 4 * Pp)

    return pl.pallas_call(
        kernel,
        out_shape=jax.ShapeDtypeStruct((N, H, W, Pp), jnp.float32),
        grid_spec=pltpu.PrefetchScalarGridSpec(
            num_scalar_prefetch=0,
            grid=(N,),
            in_specs=[
                pl.BlockSpec((1, H, W, Cp), lambda n: (n, 0, 0, 0)),
                pl.BlockSpec((9 * Cp, Pp), lambda n: (0, 0)),
                pl.BlockSpec((1, Pp), lambda n: (0, 0)),
                pl.BlockSpec((1, Pp), lambda n: (0, 0)),
                pl.BlockSpec((9 * Pp, Pp), lambda n: (0, 0)),
                pl.BlockSpec((1, Pp), lambda n: (0, 0)),
                pl.BlockSpec((1, Pp), lambda n: (0, 0)),
            ],
            out_specs=pl.BlockSpec((1, H, W, Pp), lambda n: (n, 0, 0, 0)),
            scratch_shapes=[
                pltpu.VMEM((H + 2, W + 2, Cp), jnp.float32),
                pltpu.VMEM((H + 2, W + 2, Pp), jnp.float32),
            ],
        ),
        compiler_params=pltpu.CompilerParams(
            dimension_semantics=("parallel",),
            vmem_limit_bytes=64 * 1024 * 1024,
        ),
        cost_estimate=pl.CostEstimate(
            flops=flops, transcendentals=0, bytes_accessed=bytes_accessed),
    )(x_nhwc, w1, s1, b1, w2, s2, b2)


# ----------------------------------------------------------------------------
# Gather-free bilinear 2x upsample (align_corners=True), matmul formulation.
# ----------------------------------------------------------------------------
def _bilinear_matrix(s_in, s_out):
    """Static (s_out, s_in) interpolation matrix for align_corners=True."""
    if s_in == 1:                       # degenerate axis: pure copy
        return jnp.ones((s_out, 1), jnp.float32)
    pos = np.arange(s_out, dtype=np.float64) * (s_in - 1) / (s_out - 1)
    lo = np.clip(np.floor(pos).astype(np.int64), 0, s_in - 2)
    frac = (pos - lo).astype(np.float32)
    m = np.zeros((s_out, s_in), np.float32)
    m[np.arange(s_out), lo] = 1.0 - frac
    m[np.arange(s_out), lo + 1] += frac
    return jnp.asarray(m)


def upsample2x_bilinear_align_corners(x):  # NHWC
    _, H, W, _ = x.shape
    ah = _bilinear_matrix(H, 2 * H)
    aw = _bilinear_matrix(W, 2 * W)
    x = jnp.einsum('oh,nhwc->nowc', ah, x)
    x = jnp.einsum('pw,nowc->nopc', aw, x)
    return x


# ----------------------------------------------------------------------------
# UpBlock parameters (deterministic init) and forward pass.
# ----------------------------------------------------------------------------
def init_upblock_params(key, inplanes, planes, dtype=jnp.float32):
    eps = 1e-5
    cin_pad = _round_up(inplanes, LANE)
    cout_pad = _round_up(planes, LANE)

    def conv_bn(k, cin, cout, cinp, coutp):
        kw, kb, kg, kbeta, km, kv = jax.random.split(k, 6)
        w = jax.random.normal(kw, (3, 3, cin, cout), dtype) * 0.1       # HWIO
        b = jax.random.normal(kb, (cout,), dtype) * 0.1
        gamma = jax.random.uniform(kg, (cout,), dtype, 0.5, 1.5)
        beta = jax.random.normal(kbeta, (cout,), dtype) * 0.1
        mean = jax.random.normal(km, (cout,), dtype) * 0.1
        var = jax.random.uniform(kv, (cout,), dtype, 0.5, 1.5)
        scale = gamma / jnp.sqrt(var + eps)            # folded eval-mode BN
        bias = beta + scale * (b - mean)               # conv bias folded in
        w_pad = jnp.pad(w, ((0, 0), (0, 0), (0, cinp - cin), (0, coutp - cout)))
        return dict(
            w_hwio=w, scale=scale, bias=bias,
            w_packed=w_pad.reshape(9 * cinp, coutp),   # tap-major im2col layout
            scale_packed=jnp.pad(scale, (0, coutp - cout)).reshape(1, coutp),
            bias_packed=jnp.pad(bias, (0, coutp - cout)).reshape(1, coutp),
        )

    k1, k2 = jax.random.split(key)
    return dict(
        l1=conv_bn(k1, inplanes, planes, cin_pad, cout_pad),
        l2=conv_bn(k2, planes, planes, cout_pad, cout_pad),
        meta=dict(inplanes=inplanes, planes=planes,
                  cin_pad=cin_pad, cout_pad=cout_pad),
    )


def upblock_forward(x_nchw, params, upsample=False):
    meta = params["meta"]
    x = jnp.transpose(x_nchw, (0, 2, 3, 1)).astype(jnp.float32)  # NCHW -> NHWC
    if upsample:
        x = upsample2x_bilinear_align_corners(x)
    # Lane-pad channels (fuses with the transpose above inside XLA).
    x = jnp.pad(x, ((0, 0), (0, 0), (0, 0),
                    (0, meta["cin_pad"] - meta["inplanes"])))
    l1, l2 = params["l1"], params["l2"]
    y = fused_conv_bn_relu_x2(
        x, l1["w_packed"], l1["scale_packed"], l1["bias_packed"],
        l2["w_packed"], l2["scale_packed"], l2["bias_packed"])
    y = y[..., :meta["planes"]]
    return jnp.transpose(y, (0, 3, 1, 2))                        # NHWC -> NCHW


# ----------------------------------------------------------------------------
# Pure-JAX reference (independent gather-based upsample + lax conv).
# ----------------------------------------------------------------------------
def _upsample_ref(x):  # NHWC
    _, H, W, _ = x.shape

    def coords(s_in, s_out):
        pos = jnp.arange(s_out, dtype=jnp.float32) * (s_in - 1) / max(s_out - 1, 1)
        lo = jnp.clip(jnp.floor(pos).astype(jnp.int32), 0, max(s_in - 2, 0))
        return lo, pos - lo.astype(jnp.float32)

    hlo, hf = coords(H, 2 * H)
    wlo, wf = coords(W, 2 * W)
    top = (x[:, hlo] * (1.0 - hf)[None, :, None, None]
           + x[:, jnp.minimum(hlo + 1, H - 1)] * hf[None, :, None, None])
    return (top[:, :, wlo] * (1.0 - wf)[None, None, :, None]
            + top[:, :, jnp.minimum(wlo + 1, W - 1)] * wf[None, None, :, None])


def upblock_reference(x_nchw, params, upsample=False):
    x = jnp.transpose(x_nchw, (0, 2, 3, 1)).astype(jnp.float32)
    if upsample:
        x = _upsample_ref(x)
    for lyr in (params["l1"], params["l2"]):
        x = jax.lax.conv_general_dilated(
            x, lyr["w_hwio"], window_strides=(1, 1), padding="SAME",
            dimension_numbers=("NHWC", "HWIO", "NHWC"))
        x = x * lyr["scale"] + lyr["bias"]
        x = jnp.maximum(x, 0.0)
    return jnp.transpose(x, (0, 3, 1, 2))


if __name__ == "__main__":
    key = jax.random.PRNGKey(0)
    k_x, k_p = jax.random.split(key)

    N, inplanes, planes, H, W = 2, 4, 8, 16, 16
    x = jax.random.normal(k_x, (N, inplanes, H, W), jnp.float32)
    params = init_upblock_params(k_p, inplanes, planes)

    for upsample in (False, True):
        out = jax.block_until_ready(upblock_forward(x, params, upsample=upsample))
        ref = jax.block_until_ready(upblock_reference(x, params, upsample=upsample))
        s = 2 if upsample else 1
        assert out.shape == (N, planes, s * H, s * W), out.shape
        np.testing.assert_allclose(np.asarray(out), np.asarray(ref),
                                   atol=1e-2, rtol=1e-2)

    print("KERNEL_OK")
</pallas_src>

<mosaic_0001>
module attributes {stable_mosaic.version = 11 : i64} {
  func.func @kernel(%arg0: i32, %arg1: memref<1x16x16x128xf32, #tpu.memory_space<vmem>>, %arg2: memref<1152x128xf32, #tpu.memory_space<vmem>>, %arg3: memref<1x128xf32, #tpu.memory_space<vmem>>, %arg4: memref<1x128xf32, #tpu.memory_space<vmem>>, %arg5: memref<1152x128xf32, #tpu.memory_space<vmem>>, %arg6: memref<1x128xf32, #tpu.memory_space<vmem>>, %arg7: memref<1x128xf32, #tpu.memory_space<vmem>>, %arg8: memref<1x16x16x128xf32, #tpu.memory_space<vmem>>, %arg9: memref<18x18x128xf32, #tpu.memory_space<vmem>>, %arg10: memref<18x18x128xf32, #tpu.memory_space<vmem>>) attributes {dimension_semantics = [#tpu.dimension_semantics<parallel>], iteration_bounds = array<i64: 2>, scalar_prefetch = 0 : i64, scratch_operands = 2 : i64, tpu.core_type = #tpu.core_type<tc>, window_params = [{transform_indices = @transform_0, window_bounds = array<i64: 1, 16, 16, 128>}, {pipeline_mode = #tpu.pipeline_mode<synchronous>, transform_indices = @transform_1, window_bounds = array<i64: 1152, 128>}, {pipeline_mode = #tpu.pipeline_mode<synchronous>, transform_indices = @transform_2, window_bounds = array<i64: 1, 128>}, {pipeline_mode = #tpu.pipeline_mode<synchronous>, transform_indices = @transform_3, window_bounds = array<i64: 1, 128>}, {pipeline_mode = #tpu.pipeline_mode<synchronous>, transform_indices = @transform_4, window_bounds = array<i64: 1152, 128>}, {pipeline_mode = #tpu.pipeline_mode<synchronous>, transform_indices = @transform_5, window_bounds = array<i64: 1, 128>}, {pipeline_mode = #tpu.pipeline_mode<synchronous>, transform_indices = @transform_6, window_bounds = array<i64: 1, 128>}, {transform_indices = @transform_7, window_bounds = array<i64: 1, 16, 16, 128>}]} {
    %cst = arith.constant 0.000000e+00 : f32
    %0 = vector.broadcast %cst : f32 to vector<1x18x128xf32>
    %c0 = arith.constant 0 : index
    %c0_0 = arith.constant 0 : index
    %c0_1 = arith.constant 0 : index
    %1 = vector.load %arg9[%c0, %c0_0, %c0_1] : memref<18x18x128xf32, #tpu.memory_space<vmem>>, vector<1x18x128xf32>
    tpu.vector_store %arg9[%c0, %c0_0, %c0_1], %0 {strides = array<i32>} : memref<18x18x128xf32, #tpu.memory_space<vmem>>, vector<1x18x128xf32>,
    %cst_2 = arith.constant 0.000000e+00 : f32
    %2 = vector.broadcast %cst_2 : f32 to vector<1x18x128xf32>
    %c17 = arith.constant 17 : index
    %c0_3 = arith.constant 0 : index
    %c0_4 = arith.constant 0 : index
    %3 = vector.load %arg9[%c17, %c0_3, %c0_4] : memref<18x18x128xf32, #tpu.memory_space<vmem>>, vector<1x18x128xf32>
    tpu.vector_store %arg9[%c17, %c0_3, %c0_4], %2 {strides = array<i32>} : memref<18x18x128xf32, #tpu.memory_space<vmem>>, vector<1x18x128xf32>,
    %cst_5 = arith.constant 0.000000e+00 : f32
    %4 = vector.broadcast %cst_5 : f32 to vector<18x1x128xf32>
    %c0_6 = arith.constant 0 : index
    %c0_7 = arith.constant 0 : index
    %c0_8 = arith.constant 0 : index
    %5 = vector.load %arg9[%c0_6, %c0_7, %c0_8] : memref<18x18x128xf32, #tpu.memory_space<vmem>>, vector<18x1x128xf32>
    tpu.vector_store %arg9[%c0_6, %c0_7, %c0_8], %4 {strides = array<i32>} : memref<18x18x128xf32, #tpu.memory_space<vmem>>, vector<18x1x128xf32>,
    %cst_9 = arith.constant 0.000000e+00 : f32
    %6 = vector.broadcast %cst_9 : f32 to vector<18x1x128xf32>
    %c0_10 = arith.constant 0 : index
    %c17_11 = arith.constant 17 : index
    %c0_12 = arith.constant 0 : index
    %7 = vector.load %arg9[%c0_10, %c17_11, %c0_12] : memref<18x18x128xf32, #tpu.memory_space<vmem>>, vector<18x1x128xf32>
    tpu.vector_store %arg9[%c0_10, %c17_11, %c0_12], %6 {strides = array<i32>} : memref<18x18x128xf32, #tpu.memory_space<vmem>>, vector<18x1x128xf32>,
    %cst_13 = arith.constant 0.000000e+00 : f32
    %8 = vector.broadcast %cst_13 : f32 to vector<1x18x128xf32>
    %c0_14 = arith.constant 0 : index
    %c0_15 = arith.constant 0 : index
    %c0_16 = arith.constant 0 : index
    %9 = vector.load %arg10[%c0_14, %c0_15, %c0_16] : memref<18x18x128xf32, #tpu.memory_space<vmem>>, vector<1x18x128xf32>
    tpu.vector_store %arg10[%c0_14, %c0_15, %c0_16], %8 {strides = array<i32>} : memref<18x18x128xf32, #tpu.memory_space<vmem>>, vector<1x18x128xf32>,
    %cst_17 = arith.constant 0.000000e+00 : f32
    %10 = vector.broadcast %cst_17 : f32 to vector<1x18x128xf32>
    %c17_18 = arith.constant 17 : index
    %c0_19 = arith.constant 0 : index
    %c0_20 = arith.constant 0 : index
    %11 = vector.load %arg10[%c17_18, %c0_19, %c0_20] : memref<18x18x128xf32, #tpu.memory_space<vmem>>, vector<1x18x128xf32>
    tpu.vector_store %arg10[%c17_18, %c0_19, %c0_20], %10 {strides = array<i32>} : memref<18x18x128xf32, #tpu.memory_space<vmem>>, vector<1x18x128xf32>,
    %cst_21 = arith.constant 0.000000e+00 : f32
    %12 = vector.broadcast %cst_21 : f32 to vector<18x1x128xf32>
    %c0_22 = arith.constant 0 : index
    %c0_23 = arith.constant 0 : index
    %c0_24 = arith.constant 0 : index
    %13 = vector.load %arg10[%c0_22, %c0_23, %c0_24] : memref<18x18x128xf32, #tpu.memory_space<vmem>>, vector<18x1x128xf32>
    tpu.vector_store %arg10[%c0_22, %c0_23, %c0_24], %12 {strides = array<i32>} : memref<18x18x128xf32, #tpu.memory_space<vmem>>, vector<18x1x128xf32>,
    %cst_25 = arith.constant 0.000000e+00 : f32
    %14 = vector.broadcast %cst_25 : f32 to vector<18x1x128xf32>
    %c0_26 = arith.constant 0 : index
    %c17_27 = arith.constant 17 : index
    %c0_28 = arith.constant 0 : index
    %15 = vector.load %arg10[%c0_26, %c17_27, %c0_28] : memref<18x18x128xf32, #tpu.memory_space<vmem>>, vector<18x1x128xf32>
    tpu.vector_store %arg10[%c0_26, %c17_27, %c0_28], %14 {strides = array<i32>} : memref<18x18x128xf32, #tpu.memory_space<vmem>>, vector<18x1x128xf32>,
    %c0_29 = arith.constant 0 : index
    %c0_30 = arith.constant 0 : index
    %c0_31 = arith.constant 0 : index
    %c0_32 = arith.constant 0 : index
    %16 = vector.load %arg1[%c0_29, %c0_30, %c0_31, %c0_32] : memref<1x16x16x128xf32, #tpu.memory_space<vmem>>, vector<1x16x16x128xf32>
    %17 = vector.shape_cast %16 : vector<1x16x16x128xf32> to vector<16x16x128xf32>
    %c1 = arith.constant 1 : index
    %c1_33 = arith.constant 1 : index
    %c0_34 = arith.constant 0 : index
    %18 = vector.load %arg9[%c1, %c1_33, %c0_34] : memref<18x18x128xf32, #tpu.memory_space<vmem>>, vector<16x16x128xf32>
    tpu.vector_store %arg9[%c1, %c1_33, %c0_34], %17 {strides = array<i32>} : memref<18x18x128xf32, #tpu.memory_space<vmem>>, vector<16x16x128xf32>,
    %c0_35 = arith.constant 0 : index
    %c0_36 = arith.constant 0 : index
    %c0_37 = arith.constant 0 : index
    %19 = vector.load %arg9[%c0_35, %c0_36, %c0_37] : memref<18x18x128xf32, #tpu.memory_space<vmem>>, vector<16x16x128xf32>
    %20 = vector.shape_cast %19 : vector<16x16x128xf32> to vector<256x128xf32>
    %c0_38 = arith.constant 0 : index
    %c1_39 = arith.constant 1 : index
    %c0_40 = arith.constant 0 : index
    %21 = vector.load %arg9[%c0_38, %c1_39, %c0_40] : memref<18x18x128xf32, #tpu.memory_space<vmem>>, vector<16x16x128xf32>
    %22 = vector.shape_cast %21 : vector<16x16x128xf32> to vector<256x128xf32>
    %c0_41 = arith.constant 0 : index
    %c2 = arith.constant 2 : index
    %c0_42 = arith.constant 0 : index
    %23 = vector.load %arg9[%c0_41, %c2, %c0_42] : memref<18x18x128xf32, #tpu.memory_space<vmem>>, vector<16x16x128xf32>
    %24 = vector.shape_cast %23 : vector<16x16x128xf32> to vector<256x128xf32>
    %c1_43 = arith.constant 1 : index
    %c0_44 = arith.constant 0 : index
    %c0_45 = arith.constant 0 : index
    %25 = vector.load %arg9[%c1_43, %c0_44, %c0_45] : memref<18x18x128xf32, #tpu.memory_space<vmem>>, vector<16x16x128xf32>
    %26 = vector.shape_cast %25 : vector<16x16x128xf32> to vector<256x128xf32>
    %c1_46 = arith.constant 1 : index
    %c1_47 = arith.constant 1 : index
    %c0_48 = arith.constant 0 : index
    %27 = vector.load %arg9[%c1_46, %c1_47, %c0_48] : memref<18x18x128xf32, #tpu.memory_space<vmem>>, vector<16x16x128xf32>
    %28 = vector.shape_cast %27 : vector<16x16x128xf32> to vector<256x128xf32>
    %c1_49 = arith.constant 1 : index
    %c2_50 = arith.constant 2 : index
    %c0_51 = arith.constant 0 : index
    %29 = vector.load %arg9[%c1_49, %c2_50, %c0_51] : memref<18x18x128xf32, #tpu.memory_space<vmem>>, vector<16x16x128xf32>
    %30 = vector.shape_cast %29 : vector<16x16x128xf32> to vector<256x128xf32>
    %c2_52 = arith.constant 2 : index
    %c0_53 = arith.constant 0 : index
    %c0_54 = arith.constant 0 : index
    %31 = vector.load %arg9[%c2_52, %c0_53, %c0_54] : memref<18x18x128xf32, #tpu.memory_space<vmem>>, vector<16x16x128xf32>
    %32 = vector.shape_cast %31 : vector<16x16x128xf32> to vector<256x128xf32>
    %c2_55 = arith.constant 2 : index
    %c1_56 = arith.constant 1 : index
    %c0_57 = arith.constant 0 : index
    %33 = vector.load %arg9[%c2_55, %c1_56, %c0_57] : memref<18x18x128xf32, #tpu.memory_space<vmem>>, vector<16x16x128xf32>
    %34 = vector.shape_cast %33 : vector<16x16x128xf32> to vector<256x128xf32>
    %c2_58 = arith.constant 2 : index
    %c2_59 = arith.constant 2 : index
    %c0_60 = arith.constant 0 : index
    %35 = vector.load %arg9[%c2_58, %c2_59, %c0_60] : memref<18x18x128xf32, #tpu.memory_space<vmem>>, vector<16x16x128xf32>
    %36 = vector.shape_cast %35 : vector<16x16x128xf32> to vector<256x128xf32>
    %37 = tpu.concatenate %20, %22, %24, %26, %28, %30, %32, %34, %36 in 1 : vector<256x128xf32>, vector<256x128xf32>, vector<256x128xf32>, vector<256x128xf32>, vector<256x128xf32>, vector<256x128xf32>, vector<256x128xf32>, vector<256x128xf32>, vector<256x128xf32> -> vector<256x1152xf32>
    %c0_61 = arith.constant 0 : index
    %c0_62 = arith.constant 0 : index
    %38 = vector.load %arg2[%c0_61, %c0_62] : memref<1152x128xf32, #tpu.memory_space<vmem>>, vector<1152x128xf32>
    %cst_63 = arith.constant dense<0.000000e+00> : vector<256x128xf32>
    %39 = tpu.matmul %37, %38, %cst_63 {dimension_numbers = #tpu.dot_dimension_numbers<[1], [0], [0], [1], [0, 0, 1, 1], [], []>} : vector<256x1152xf32>, vector<1152x128xf32>, vector<256x128xf32> -> vector<256x128xf32>
    %c0_64 = arith.constant 0 : index
    %c0_65 = arith.constant 0 : index
    %40 = vector.load %arg3[%c0_64, %c0_65] : memref<1x128xf32, #tpu.memory_space<vmem>>, vector<1x128xf32>
    %41 = vector.broadcast %40 : vector<1x128xf32> to vector<256x128xf32>
    %42 = arith.mulf %39, %41 : vector<256x128xf32>
    %c0_66 = arith.constant 0 : index
    %c0_67 = arith.constant 0 : index
    %43 = vector.load %arg4[%c0_66, %c0_67] : memref<1x128xf32, #tpu.memory_space<vmem>>, vector<1x128xf32>
    %44 = vector.broadcast %43 : vector<1x128xf32> to vector<256x128xf32>
    %45 = arith.addf %42, %44 : vector<256x128xf32>
    %cst_68 = arith.constant 0.000000e+00 : f32
    %46 = vector.broadcast %cst_68 : f32 to vector<256x128xf32>
    %47 = arith.maximumf %45, %46 : vector<256x128xf32>
    %48 = vector.shape_cast %47 : vector<256x128xf32> to vector<16x16x128xf32>
    %c1_69 = arith.constant 1 : index
    %c1_70 = arith.constant 1 : index
    %c0_71 = arith.constant 0 : index
    %49 = vector.load %arg10[%c1_69, %c1_70, %c0_71] : memref<18x18x128xf32, #tpu.memory_space<vmem>>, vector<16x16x128xf32>
    tpu.vector_store %arg10[%c1_69, %c1_70, %c0_71], %48 {strides = array<i32>} : memref<18x18x128xf32, #tpu.memory_space<vmem>>, vector<16x16x128xf32>,
    %c0_72 = arith.constant 0 : index
    %c0_73 = arith.constant 0 : index
    %c0_74 = arith.constant 0 : index
    %50 = vector.load %arg10[%c0_72, %c0_73, %c0_74] : memref<18x18x128xf32, #tpu.memory_space<vmem>>, vector<16x16x128xf32>
    %51 = vector.shape_cast %50 : vector<16x16x128xf32> to vector<256x128xf32>
    %c0_75 = arith.constant 0 : index
    %c1_76 = arith.constant 1 : index
    %c0_77 = arith.constant 0 : index
    %52 = vector.load %arg10[%c0_75, %c1_76, %c0_77] : memref<18x18x128xf32, #tpu.memory_space<vmem>>, vector<16x16x128xf32>
    %53 = vector.shape_cast %52 : vector<16x16x128xf32> to vector<256x128xf32>
    %c0_78 = arith.constant 0 : index
    %c2_79 = arith.constant 2 : index
    %c0_80 = arith.constant 0 : index
    %54 = vector.load %arg10[%c0_78, %c2_79, %c0_80] : memref<18x18x128xf32, #tpu.memory_space<vmem>>, vector<16x16x128xf32>
    %55 = vector.shape_cast %54 : vector<16x16x128xf32> to vector<256x128xf32>
    %c1_81 = arith.constant 1 : index
    %c0_82 = arith.constant 0 : index
    %c0_83 = arith.constant 0 : index
    %56 = vector.load %arg10[%c1_81, %c0_82, %c0_83] : memref<18x18x128xf32, #tpu.memory_space<vmem>>, vector<16x16x128xf32>
    %57 = vector.shape_cast %56 : vector<16x16x128xf32> to vector<256x128xf32>
    %c1_84 = arith.constant 1 : index
    %c1_85 = arith.constant 1 : index
    %c0_86 = arith.constant 0 : index
    %58 = vector.load %arg10[%c1_84, %c1_85, %c0_86] : memref<18x18x128xf32, #tpu.memory_space<vmem>>, vector<16x16x128xf32>
    %59 = vector.shape_cast %58 : vector<16x16x128xf32> to vector<256x128xf32>
    %c1_87 = arith.constant 1 : index
    %c2_88 = arith.constant 2 : index
    %c0_89 = arith.constant 0 : index
    %60 = vector.load %arg10[%c1_87, %c2_88, %c0_89] : memref<18x18x128xf32, #tpu.memory_space<vmem>>, vector<16x16x128xf32>
    %61 = vector.shape_cast %60 : vector<16x16x128xf32> to vector<256x128xf32>
    %c2_90 = arith.constant 2 : index
    %c0_91 = arith.constant 0 : index
    %c0_92 = arith.constant 0 : index
    %62 = vector.load %arg10[%c2_90, %c0_91, %c0_92] : memref<18x18x128xf32, #tpu.memory_space<vmem>>, vector<16x16x128xf32>
    %63 = vector.shape_cast %62 : vector<16x16x128xf32> to vector<256x128xf32>
    %c2_93 = arith.constant 2 : index
    %c1_94 = arith.constant 1 : index
    %c0_95 = arith.constant 0 : index
    %64 = vector.load %arg10[%c2_93, %c1_94, %c0_95] : memref<18x18x128xf32, #tpu.memory_space<vmem>>, vector<16x16x128xf32>
    %65 = vector.shape_cast %64 : vector<16x16x128xf32> to vector<256x128xf32>
    %c2_96 = arith.constant 2 : index
    %c2_97 = arith.constant 2 : index
    %c0_98 = arith.constant 0 : index
    %66 = vector.load %arg10[%c2_96, %c2_97, %c0_98] : memref<18x18x128xf32, #tpu.memory_space<vmem>>, vector<16x16x128xf32>
    %67 = vector.shape_cast %66 : vector<16x16x128xf32> to vector<256x128xf32>
    %68 = tpu.concatenate %51, %53, %55, %57, %59, %61, %63, %65, %67 in 1 : vector<256x128xf32>, vector<256x128xf32>, vector<256x128xf32>, vector<256x128xf32>, vector<256x128xf32>, vector<256x128xf32>, vector<256x128xf32>, vector<256x128xf32>, vector<256x128xf32> -> vector<256x1152xf32>
    %c0_99 = arith.constant 0 : index
    %c0_100 = arith.constant 0 : index
    %69 = vector.load %arg5[%c0_99, %c0_100] : memref<1152x128xf32, #tpu.memory_space<vmem>>, vector<1152x128xf32>
    %cst_101 = arith.constant dense<0.000000e+00> : vector<256x128xf32>
    %70 = tpu.matmul %68, %69, %cst_101 {dimension_numbers = #tpu.dot_dimension_numbers<[1], [0], [0], [1], [0, 0, 1, 1], [], []>} : vector<256x1152xf32>, vector<1152x128xf32>, vector<256x128xf32> -> vector<256x128xf32>
    %c0_102 = arith.constant 0 : index
    %c0_103 = arith.constant 0 : index
    %71 = vector.load %arg6[%c0_102, %c0_103] : memref<1x128xf32, #tpu.memory_space<vmem>>, vector<1x128xf32>
    %72 = vector.broadcast %71 : vector<1x128xf32> to vector<256x128xf32>
    %73 = arith.mulf %70, %72 : vector<256x128xf32>
    %c0_104 = arith.constant 0 : index
    %c0_105 = arith.constant 0 : index
    %74 = vector.load %arg7[%c0_104, %c0_105] : memref<1x128xf32, #tpu.memory_space<vmem>>, vector<1x128xf32>
    %75 = vector.broadcast %74 : vector<1x128xf32> to vector<256x128xf32>
    %76 = arith.addf %73, %75 : vector<256x128xf32>
    %cst_106 = arith.constant 0.000000e+00 : f32
    %77 = vector.broadcast %cst_106 : f32 to vector<256x128xf32>
    %78 = arith.maximumf %76, %77 : vector<256x128xf32>
    %79 = vector.shape_cast %78 : vector<256x128xf32> to vector<1x16x16x128xf32>
    %c0_107 = arith.constant 0 : index
    %c0_108 = arith.constant 0 : index
    %c0_109 = arith.constant 0 : index
    %c0_110 = arith.constant 0 : index
    %80 = vector.load %arg8[%c0_107, %c0_108, %c0_109, %c0_110] : memref<1x16x16x128xf32, #tpu.memory_space<vmem>>, vector<1x16x16x128xf32>
    tpu.vector_store %arg8[%c0_107, %c0_108, %c0_109, %c0_110], %79 {strides = array<i32>} : memref<1x16x16x128xf32, #tpu.memory_space<vmem>>, vector<1x16x16x128xf32>,
    return
  }
  func.func @transform_0(%arg0: i32) -> (i32, i32, i32, i32) {
    %c0_i32 = arith.constant 0 : i32
    %c0_i32_0 = arith.constant 0 : i32
    %c0_i32_1 = arith.constant 0 : i32
    %c0_i32_2 = arith.constant 0 : i32
    return %arg0, %c0_i32, %c0_i32_0, %c0_i32_1 : i32, i32, i32, i32
  }
  func.func @transform_1(%arg0: i32) -> (i32, i32) {
    %c0_i32 = arith.constant 0 : i32
    %c0_i32_0 = arith.constant 0 : i32
    %c0_i32_1 = arith.constant 0 : i32
    return %c0_i32, %c0_i32_0 : i32, i32
  }
  func.func @transform_2(%arg0: i32) -> (i32, i32) {
    %c0_i32 = arith.constant 0 : i32
    %c0_i32_0 = arith.constant 0 : i32
    %c0_i32_1 = arith.constant 0 : i32
    return %c0_i32, %c0_i32_0 : i32, i32
  }
  func.func @transform_3(%arg0: i32) -> (i32, i32) {
    %c0_i32 = arith.constant 0 : i32
    %c0_i32_0 = arith.constant 0 : i32
    %c0_i32_1 = arith.constant 0 : i32
    return %c0_i32, %c0_i32_0 : i32, i32
  }
  func.func @transform_4(%arg0: i32) -> (i32, i32) {
    %c0_i32 = arith.constant 0 : i32
    %c0_i32_0 = arith.constant 0 : i32
    %c0_i32_1 = arith.constant 0 : i32
    return %c0_i32, %c0_i32_0 : i32, i32
  }
  func.func @transform_5(%arg0: i32) -> (i32, i32) {
    %c0_i32 = arith.constant 0 : i32
    %c0_i32_0 = arith.constant 0 : i32
    %c0_i32_1 = arith.constant 0 : i32
    return %c0_i32, %c0_i32_0 : i32, i32
  }
  func.func @transform_6(%arg0: i32) -> (i32, i32) {
    %c0_i32 = arith.constant 0 : i32
    %c0_i32_0 = arith.constant 0 : i32
    %c0_i32_1 = arith.constant 0 : i32
    return %c0_i32, %c0_i32_0 : i32, i32
  }
  func.func @transform_7(%arg0: i32) -> (i32, i32, i32, i32) {
    %c0_i32 = arith.constant 0 : i32
    %c0_i32_0 = arith.constant 0 : i32
    %c0_i32_1 = arith.constant 0 : i32
    %c0_i32_2 = arith.constant 0 : i32
    return %arg0, %c0_i32, %c0_i32_0, %c0_i32_1 : i32, i32, i32, i32
  }
}

</mosaic_0001>

<bundles_post_ra>
// kernel: tpu_custom_call.1
= control target key start
LH: loop header
LB: loop body
LE: loop exit
PB: predicated region body
PF: predicated region fallthrough
CT: control target
= control target key end

     0   :  { %s6598_s0 = inlined_call_operand.hbm [shape: f32[2,16,16,128], index: 0, kind: input, shape index: {}]   ;;  %s6599_s1 = inlined_call_operand.hbm [shape: f32[1152,128], index: 1, kind: input, shape index: {}]   ;;  %s6600_s2 = inlined_call_operand.vmem [shape: f32[1,128], index: 2, kind: input, shape index: {}]   ;;  %s6601_s3 = inlined_call_operand.vmem [shape: f32[1,128], index: 3, kind: input, shape index: {}]   ;;  %s6602_s4 = inlined_call_operand.hbm [shape: f32[1152,128], index: 4, kind: input, shape index: {}]   ;;  %s6603_s5 = inlined_call_operand.vmem [shape: f32[1,128], index: 5, kind: input, shape index: {}]   ;;  %s6604_s6 = inlined_call_operand.vmem [shape: f32[1,128], index: 6, kind: input, shape index: {}]   ;;  %s6605_s7 = inlined_call_operand.hbm [shape: f32[2,16,16,128], index: 7, kind: output, shape index: {}]  }
   0x1   :  { %6619 = sst [smem:[#allocation19_spill]] %s6599_s1 }
   0x2   :  { %12 = vsyncpa [#allocation5], 0 }
   0x3   :  { %14 = vsyncpa [#allocation5 + $0x1], 0 }
   0x4   :  { %15 = vsyncpa [#allocation8], 0 }
   0x5   :  { %16 = vsyncpa [#allocation6], 0 }
   0x6   :  { %18 = vsyncpa [#allocation6 + $0x1], 0  ;;  %s4571_s24 = smov 0   ;;  %s4573_s25 = smov 0  }
   0x7   :  { %s4575_s26 = smov 0   ;;  %s4577_s27 = smov 0  }
   0x8 LB: > { %s4592_s28 = sadd.s32 4294967295, %s4520_s27   ;;  %s3984_s29 = sadd.s32 4294967294, %s4520_s27   ;;  %s4520_s27 = sphi %s4577_s27, %s6653_s27   ;;  %s4516_s26 = sphi %s4575_s26, %s6652_s26   ;;  %s4512_s25 = sphi %s4573_s25, %s6651_s25   ;;  %s4508_s24 = sphi %s4571_s24, %s6650_s24  }
   0x9   : > { %p44_p0 = scmp.ne.s32.totalorder %s4512_s25, %s4508_s24  ;;  %p6607_p1 = scmp.eq.s32.totalorder %s4592_s28, 0 }
   0xa   : > { %p194_p2 = scmp.eq.s32.totalorder %s4592_s28, 1  ;;  %p200_p3 = scmp.eq.s32.totalorder %s3984_s29, 1 }
   0xb   : > { %p4601_p4 = por %p6607_p1, %p44_p0  ;;  %p3985_p5 = scmp.ge.s32.totalorder %s4520_s27, 1 }
   0xc   : > { %p4606_p6 = por %p200_p3, %p44_p0  ;;  %p207_p7 = scmp.lt.s32.totalorder %s4520_s27, 3 }
   0xd   : > { %s6620_s30 = scalar_select %p4601_p4, 1, 0 }
   0xe   : > { %s6621_s8 = scalar_select %p4606_p6, 1, 0 }
   0xf   : > { %p4611_p8 = pnand %p3985_p5, %p207_p7  ;;  %s4522_s10 = smov [#allocation7]  }
  0x10   : > { %s219_s11 = sshll.u32 %s4522_s10, 4  ;;  %s4523_s13 = smov [#allocation9]   ;;  %s220_s11 = int_to_ptr.vmem [resolvable:$true] %s219_s11 }
  0x11   : > { %s6622_s9 = scalar_select %p4611_p8, 1, 0 }
  0x12   : > { %p4276_p9 = pneg %p4611_p8  ;;  %s238_s14 = sshll.u32 %s4523_s13, 4  ;;  %s239_s14 = int_to_ptr.vmem [resolvable:$true] %s238_s14 }
  0x13   : > { %s4383_s15 = scalar_lea.vmem %s220_s11, 18432  ;;  %p4391_p5 = scmp.lt.s32.totalorder %s220_s11, %s220_s11 }
  0x14   : > { %p4620_p11 = pnand %p4276_p9, %p6607_p1  ;;  %p4384_p13 = scmp.ne.s32.totalorder %s220_s11, %s4383_s15 }
  0x15   : > { %p4392_p7 = scmp.lt.s32.totalorder %s4383_s15, %s4383_s15 }
  0x16   : > { %p4374_p12 = pneg %p4620_p11 }
  0x17   : > { %p4393_p10 = por %p4392_p7, %p4391_p5 }
  0x18   : > { %p4386_p0 = pnand %p4384_p13, %p4374_p12 }
  0x1a   : > { %p4387_p3 = pneg %p4386_p0 }
  0x1c   : > { %p4394_p9 = pnand %p4393_p10, %p4387_p3 }
  0x1e   : > { %4397 = shalt.err (!%p4394_p9)
}
  0x1f   : > { %s6606_s16 = smov 128   ;;  %s6608_s17 = smov 8  }
  0x20   : > { %s6624_s1 = sld [smem:[#allocation19_spill]]  ;;  %s4409_s20 = scalar_lea.vmem %s239_s14, 18432 }
  0x21   : > { %p4410_p13 = scmp.ne.s32.totalorder %s239_s14, %s4409_s20  ;;  %p4417_p10 = scmp.lt.s32.totalorder %s239_s14, %s239_s14 }
  0x22   : > { %p4418_p3 = scmp.lt.s32.totalorder %s4409_s20, %s4409_s20 }
  0x23   : > { %p4412_p0 = pnand %p4410_p13, %p4374_p12 }
  0x24   : > { %p4419_p7 = por %p4418_p3, %p4417_p10 }
  0x25   : > { %p4413_p5 = pneg %p4412_p0 }
  0x26   : > { %4279 = dma.hbm_to_vmem [thread:$0]  (!%p4620_p11), %s6624_s1, 18432, %s220_s11, [#allocation8], %s6606_s16, %s6606_s16, %s6608_s17  }
  0x27   : > { %p4420_p9 = pnand %p4419_p7, %p4413_p5 }
  0x29   : > { %4423 = shalt.err (!%p4420_p9)
}
  0x2a   : > { %4282 = dma.hbm_to_vmem [thread:$0]  (!%p4620_p11), %s6602_s4, 18432, %s239_s14, [#allocation8], %s6606_s16, %s6606_s16, %s6608_s17  }
  0x2b   : > { %s4649_s23 = sadd.s32 1, %s4520_s27   ;;  %s31_s29 = sadd.s32 1, %s4516_s26 }
  0x2c   : > { %s28_s10 = ssub.s32 %s4520_s27, %s4649_s23  ;;  %p38_p12 = scmp.ne.s32.totalorder %s4516_s26, %s4512_s25 }
  0x2d   : > { %p29_p13 = scmp.eq.s32.totalorder %s28_s10, 0  ;;  %p39_p0 = scmp.eq.s32.totalorder %s4520_s27, 0 }
  0x2e   : > { %p4659_p5 = por %p194_p2, %p38_p12  ;;  %p4293_p10 = scmp.lt.s32.totalorder %s4520_s27, 2 }
  0x2f   : > { %s4665_s12 = scalar_select %p29_p13, %s4516_s26, %s31_s29  }
  0x30   : > { %s6625_s11 = scalar_select %p4659_p5, 1, 0 }
  0x31   : > { %p40_p3 = por %p39_p0, %p38_p12  ;;  %s258_s13 = sand.u32 1, %s4516_s26  }
  0x32   : > { %s3989_s15 = sshll.u32 %s258_s13, 8  ;;  %s4006_s14 = sshll.u32 %s4520_s27, 12 }
  0x33   : > { %s4672_s20 = scalar_lea.hbm %s6598_s0, %s4006_s14  ;;  %s262_s21 = scalar_lea.vmem [#allocation4], %s3989_s15 }
  0x34   : > { %s269_s22 = sshll.u32 %s262_s21, 4  ;;  %p4676_p2 = pnand %p4293_p10, %p40_p3  ;;  %s4674_s22 = int_to_ptr.vmem [resolvable:$true] %s269_s22 }
  0x35   : > { %s4680_s29 = scalar_lea.sflag [#allocation5], %s258_s13  ;;  %s4424_s16 = scalar_lea.hbm %s4672_s20, 4096 }
  0x36   : > { %p4425_p11 = scmp.ne.s32.totalorder %s4672_s20, %s4424_s16  ;;  %p4426_p7 = pneg %p4676_p2 }
  0x37   : > { %s4429_s15 = scalar_lea.hbm %s6598_s0, 8192  ;;  %p4430_p13 = scmp.lt.s32.totalorder %s4672_s20, %s6598_s0 }
  0x38   : > { %p4427_p9 = pnand %p4426_p7, %p4425_p11  ;;  %p4431_p0 = scmp.lt.s32.totalorder %s4429_s15, %s4424_s16 }
  0x3a   : > { %p4428_p12 = pneg %p4427_p9  ;;  %p4432_p10 = por %p4431_p0, %p4430_p13 }
  0x3c   : > { %p4433_p3 = pnand %p4432_p10, %p4428_p12 }
  0x3e   : > { %4436 = shalt.err (!%p4433_p3)
}
  0x3f   : > { %s4437_s13 = scalar_lea.vmem %s4674_s22, 4096  ;;  %s4526_s17 = smov [#allocation4]  }
  0x40   : > { %p4438_p1 = scmp.ne.s32.totalorder %s4674_s22, %s4437_s13  ;;  %s4442_s1 = sshll.u32 %s4526_s17, 4  ;;  %s4443_s1 = int_to_ptr.vmem [resolvable:$false] %s4442_s1 }
  0x41   : > { %s4444_s14 = scalar_lea.vmem %s4443_s1, 8192  ;;  %p4445_p9 = scmp.lt.s32.totalorder %s4674_s22, %s4443_s1 }
  0x42   : > { %p4440_p6 = pnand %p4438_p1, %p4426_p7  ;;  %p4446_p5 = scmp.lt.s32.totalorder %s4444_s14, %s4437_s13 }
  0x44   : > { %p4441_p11 = pneg %p4440_p6  ;;  %p4447_p4 = por %p4446_p5, %p4445_p9 }
  0x46   : > { %p4448_p8 = pnand %p4447_p4, %p4441_p11 }
  0x48   : > { %4451 = shalt.err (!%p4448_p8)
}
  0x49   : > { %s6627_s16 = smov 8   ;;  %s6628_s18 = smov 128  }
  0x4a   : > { %4286 = dma.hbm_to_vmem [thread:$0]  (!%p4676_p2), %s4672_s20, 4096, %s4674_s22, %s4680_s29, %s6628_s18, %s6628_s18, %s6627_s16  }
  0x4b   : > { %p6629_p1 = scmp.ne.s32.totalorder %s6622_s9, 0 }
  0x4d   : > { %281 = sbr.rel (%p6629_p1) target bundleno = 1147 (0x47b), region = 48 }
  0x52   : > { %s4707_s17 = sand.u32 1, %s4512_s25   ;;  %p6630_p4 = scmp.ne.s32.totalorder %s6620_s30, 0 }
  0x53   : > { %s3993_s1 = sshll.u32 %s4707_s17, 8  ;;  %s284_s15 = scalar_lea.sflag [#allocation5], %s4707_s17 }
  0x54   : > { %s4713_s10 = scalar_lea.vmem [#allocation4], %s3993_s1 }
  0x55   : > { %4495 = dma.done.wait (%p6630_p4), %s284_s15, 4096  }
  0x56   : > { %4497 = vsyncadd (%p6630_p4), %s284_s15, 4294963200  ;;  %p6631_p6 = scmp.eq.s32.totalorder %s4592_s28, 0 }
  0x58   : > { %4499 = dma.done.wait (%p6631_p6), [#allocation8], 36864   ;;  %p6632_p8 = pmov %p6631_p6 }
  0x59   : > { %v4527_v0 = vmov 0.0   ;;  %v781_v1 = vld [vmem:[#allocation7 + $0x78] sm:$0xff]  ;;  %v780_v3 = vld [vmem:[#allocation7 + $0x70] sm:$0xff]  ;;  %v779_v5 = vld [vmem:[#allocation7 + $0x68] sm:$0xff]  ;;  %s6421_s14 = scalar_lea.vmem [#allocation10], %s3993_s1  ;;  %s4007_s16 = sshll.u32 %s4592_s28, 12 }
  0x5a   : > { %4501 = vsyncadd (%p6632_p8), [#allocation8], 4294930432  ;;  %910 = vmatprep.subr.mxu0 %v4527_v0  ;;  %326 = vst [vmem:[#allocation2] sm:$0xff] %v4527_v0  ;;  %1135 = vmatprep.subr.mxu1 %v4527_v0  ;;  %v813_v2 = vld [vmem:[#allocation7 + $0x178] sm:$0xff]  ;;  %v812_v4 = vld [vmem:[#allocation7 + $0x170] sm:$0xff]  ;;  %s3892_s18 = sshll.u32 %s6421_s14, 4  ;;  %s6553_s18 = int_to_ptr.vmem [resolvable:$true] %s3892_s18 }
  0x5b   : > { %327 = vst [vmem:[#allocation2 + $0x8] sm:$0xff] %v4527_v0  ;;  %328 = vst [vmem:[#allocation2 + $0x10] sm:$0x3] %v4527_v0  ;;  %911 = vmatpush1.msra.mxu0 %v781_v1  ;;  %1136 = vmatpush1.msra.mxu1 %v813_v2  ;;  %v811_v6 = vld [vmem:[#allocation7 + $0x168] sm:$0xff]  ;;  %v778_v7 = vld [vmem:[#allocation7 + $0x60] sm:$0xff]  ;;  %s3879_s30 = scalar_lea.sflag [#allocation6], %s4707_s17 }
  0x5c   : > { %330 = vst [vmem:[#allocation2 + $0x198] sm:$0xff] %v4527_v0  ;;  %331 = vst [vmem:[#allocation2 + $0x1a0] sm:$0xff] %v4527_v0  ;;  %912 = vmatprep.subr.mxu0 %v4527_v0  ;;  %1137 = vmatprep.subr.mxu1 %v4527_v0  ;;  %v810_v8 = vld [vmem:[#allocation7 + $0x160] sm:$0xff]  ;;  %v777_v9 = vld [vmem:[#allocation7 + $0x58] sm:$0xff]  ;;  %s4452_s28 = scalar_lea.vmem %s6553_s18, 4096  ;;  %p6647_p2 = scmp.ne.s32.totalorder %s6625_s11, 0 }
  0x5d   : > { %332 = vst [vmem:[#allocation2 + $0x1a8] sm:$0x3] %v4527_v0  ;;  %334 = vst [vmem:[#allocation2 + $0x18] sm:$0x1] %v4527_v0  ;;  %913 = vmatpush1.msra.mxu0 %v780_v3  ;;  %1138 = vmatpush1.msra.mxu1 %v812_v4  ;;  %v809_v10 = vld [vmem:[#allocation7 + $0x158] sm:$0xff]  ;;  %v776_v11 = vld [vmem:[#allocation7 + $0x50] sm:$0xff]  ;;  %p4453_p5 = scmp.ne.s32.totalorder %s6553_s18, %s4452_s28 }
  0x5e   : > { %335 = vst [vmem:[#allocation2 + $0x30] sm:$0x1] %v4527_v0  ;;  %336 = vst [vmem:[#allocation2 + $0x48] sm:$0x1] %v4527_v0  ;;  %914 = vmatprep.subr.mxu0 %v4527_v0  ;;  %1139 = vmatprep.subr.mxu1 %v4527_v0  ;;  %v808_v12 = vld [vmem:[#allocation7 + $0x150] sm:$0xff]  ;;  %v775_v13 = vld [vmem:[#allocation7 + $0x48] sm:$0xff] }
  0x5f   : > { %337 = vst [vmem:[#allocation2 + $0x60] sm:$0x1] %v4527_v0  ;;  %338 = vst [vmem:[#allocation2 + $0x78] sm:$0x1] %v4527_v0  ;;  %915 = vmatpush1.msra.mxu0 %v779_v5  ;;  %1140 = vmatpush1.msra.mxu1 %v811_v6  ;;  %v807_v14 = vld [vmem:[#allocation7 + $0x148] sm:$0xff]  ;;  %v774_v15 = vld [vmem:[#allocation7 + $0x40] sm:$0xff]  ;;  %p4454_p7 = pnand %p4453_p5, %p6647_p2 }
  0x60   : > { %339 = vst [vmem:[#allocation2 + $0x90] sm:$0x1] %v4527_v0  ;;  %340 = vst [vmem:[#allocation2 + $0xa8] sm:$0x1] %v4527_v0  ;;  %916 = vmatprep.subr.mxu0 %v4527_v0  ;;  %1141 = vmatprep.subr.mxu1 %v4527_v0  ;;  %v806_v16 = vld [vmem:[#allocation7 + $0x140] sm:$0xff]  ;;  %v773_v17 = vld [vmem:[#allocation7 + $0x38] sm:$0xff] }
  0x61   : > { %341 = vst [vmem:[#allocation2 + $0xc0] sm:$0x1] %v4527_v0  ;;  %342 = vst [vmem:[#allocation2 + $0xd8] sm:$0x1] %v4527_v0  ;;  %917 = vmatpush1.msra.mxu0 %v778_v7  ;;  %1142 = vmatpush1.msra.mxu1 %v810_v8  ;;  %v805_v18 = vld [vmem:[#allocation7 + $0x138] sm:$0xff]  ;;  %v772_v19 = vld [vmem:[#allocation7 + $0x30] sm:$0xff]  ;;  %p4455_p12 = pneg %p4454_p7 }
  0x62   : > { %343 = vst [vmem:[#allocation2 + $0xf0] sm:$0x1] %v4527_v0  ;;  %344 = vst [vmem:[#allocation2 + $0x108] sm:$0x1] %v4527_v0  ;;  %918 = vmatprep.subr.mxu0 %v4527_v0  ;;  %1143 = vmatprep.subr.mxu1 %v4527_v0  ;;  %v804_v20 = vld [vmem:[#allocation7 + $0x130] sm:$0xff]  ;;  %v771_v21 = vld [vmem:[#allocation7 + $0x28] sm:$0xff] }
  0x63   : > { %345 = vst [vmem:[#allocation2 + $0x120] sm:$0x1] %v4527_v0  ;;  %346 = vst [vmem:[#allocation2 + $0x138] sm:$0x1] %v4527_v0  ;;  %919 = vmatpush1.msra.mxu0 %v777_v9  ;;  %1144 = vmatpush1.msra.mxu1 %v809_v10  ;;  %v803_v22 = vld [vmem:[#allocation7 + $0x128] sm:$0xff]  ;;  %v770_v23 = vld [vmem:[#allocation7 + $0x20] sm:$0xff] }
  0x64   : > { %347 = vst [vmem:[#allocation2 + $0x150] sm:$0x1] %v4527_v0  ;;  %348 = vst [vmem:[#allocation2 + $0x168] sm:$0x1] %v4527_v0  ;;  %920 = vmatprep.subr.mxu0 %v4527_v0  ;;  %1145 = vmatprep.subr.mxu1 %v4527_v0  ;;  %v802_v24 = vld [vmem:[#allocation7 + $0x120] sm:$0xff]  ;;  %v769_v25 = vld [vmem:[#allocation7 + $0x18] sm:$0xff] }
  0x65   : > { %349 = vst [vmem:[#allocation2 + $0x180] sm:$0x1] %v4527_v0  ;;  %352 = vst [vmem:[#allocation2 + $0x29] sm:$0x1] %v4527_v0  ;;  %921 = vmatpush1.msra.mxu0 %v776_v11  ;;  %1146 = vmatpush1.msra.mxu1 %v808_v12  ;;  %v801_v26 = vld [vmem:[#allocation7 + $0x118] sm:$0xff]  ;;  %v4832_v27 = vld [vmem:[%s4713_s10] sm:$0xff] }
  0x66   : > { %353 = vst [vmem:[#allocation2 + $0x41] sm:$0x1] %v4527_v0  ;;  %354 = vst [vmem:[#allocation2 + $0x59] sm:$0x1] %v4527_v0  ;;  %922 = vmatprep.subr.mxu0 %v4527_v0  ;;  %1147 = vmatprep.subr.mxu1 %v4527_v0  ;;  %v4836_v28 = vld [vmem:[%s4713_s10 + $0x8] sm:$0xff]  ;;  %v768_v29 = vld [vmem:[#allocation7 + $0x10] sm:$0xff] }
  0x67   : > { %355 = vst [vmem:[#allocation2 + $0x71] sm:$0x1] %v4527_v0  ;;  %356 = vst [vmem:[#allocation2 + $0x89] sm:$0x1] %v4527_v0  ;;  %923 = vmatpush1.msra.mxu0 %v775_v13  ;;  %1148 = vmatpush1.msra.mxu1 %v807_v14  ;;  %v800_v30 = vld [vmem:[#allocation7 + $0x110] sm:$0xff]  ;;  %v4846_v32 = vld [vmem:[%s4713_s10 + $0x18] sm:$0xff] }
  0x68   : > { %357 = vst [vmem:[#allocation2 + $0xa1] sm:$0x1] %v4527_v0  ;;  %358 = vst [vmem:[#allocation2 + $0xb9] sm:$0x1] %v4527_v0  ;;  %924 = vmatprep.subr.mxu0 %v4527_v0  ;;  %1149 = vmatprep.subr.mxu1 %v4527_v0  ;;  %v4842_v31 = vld [vmem:[%s4713_s10 + $0x10] sm:$0xff]  ;;  %v4849_v33 = vld [vmem:[%s4713_s10 + $0x20] sm:$0xff] }
  0x69   : > { %359 = vst [vmem:[#allocation2 + $0xd1] sm:$0x1] %v4527_v0  ;;  %360 = vst [vmem:[#allocation2 + $0xe9] sm:$0x1] %v4527_v0  ;;  %925 = vmatpush1.msra.mxu0 %v774_v15  ;;  %1150 = vmatpush1.msra.mxu1 %v806_v16  ;;  %v767_v34 = vld [vmem:[#allocation7 + $0x8] sm:$0xff]  ;;  %v4860_v37 = vld [vmem:[%s4713_s10 + $0x30] sm:$0xff] }
  0x6a   : > { %361 = vst [vmem:[#allocation2 + $0x101] sm:$0x1] %v4527_v0  ;;  %362 = vst [vmem:[#allocation2 + $0x119] sm:$0x1] %v4527_v0  ;;  %926 = vmatprep.subr.mxu0 %v4527_v0  ;;  %1151 = vmatprep.subr.mxu1 %v4527_v0  ;;  %v799_v35 = vld [vmem:[#allocation7 + $0x108] sm:$0xff]  ;;  %v4863_v38 = vld [vmem:[%s4713_s10 + $0x38] sm:$0xff] }
  0x6b   : > { %363 = vst [vmem:[#allocation2 + $0x131] sm:$0x1] %v4527_v0  ;;  %364 = vst [vmem:[#allocation2 + $0x149] sm:$0x1] %v4527_v0  ;;  %927 = vmatpush1.msra.mxu0 %v773_v17  ;;  %1152 = vmatpush1.msra.mxu1 %v805_v18  ;;  %v4856_v36 = vld [vmem:[%s4713_s10 + $0x28] sm:$0xff]  ;;  %v766_v39 = vld [vmem:[#allocation7] sm:$0xff] }
  0x6c   : > { %365 = vst [vmem:[#allocation2 + $0x161] sm:$0x1] %v4527_v0  ;;  %366 = vst [vmem:[#allocation2 + $0x179] sm:$0x1] %v4527_v0  ;;  %928 = vmatprep.subr.mxu0 %v4527_v0  ;;  %1153 = vmatprep.subr.mxu1 %v4527_v0  ;;  %v798_v40 = vld [vmem:[#allocation7 + $0x100] sm:$0xff]  ;;  %v4874_v42 = vld [vmem:[%s4713_s10 + $0x48] sm:$0xff] }
  0x6d   : > { %367 = vst [vmem:[#allocation2 + $0x191] sm:$0x1] %v4527_v0  ;;  %369 = vst [vmem:[#allocation3] sm:$0xff] %v4527_v0  ;;  %929 = vmatpush1.msra.mxu0 %v772_v19  ;;  %1154 = vmatpush1.msra.mxu1 %v804_v20  ;;  %v4870_v41 = vld [vmem:[%s4713_s10 + $0x40] sm:$0xff]  ;;  %v4877_v43 = vld [vmem:[%s4713_s10 + $0x50] sm:$0xff]  ;;  %s4528_s9 = smov [#allocation10]  }
  0x6e   : > { %370 = vst [vmem:[#allocation3 + $0x8] sm:$0xff] %v4527_v0  ;;  %371 = vst [vmem:[#allocation3 + $0x10] sm:$0x3] %v4527_v0  ;;  %930 = vmatprep.subr.mxu0 %v4527_v0  ;;  %1155 = vmatprep.subr.mxu1 %v4527_v0  ;;  %v797_v44 = vld [vmem:[#allocation7 + $0xf8] sm:$0xff]  ;;  %v796_v47 = vld [vmem:[#allocation7 + $0xf0] sm:$0xff]  ;;  %s4456_s20 = sshll.u32 %s4528_s9, 4  ;;  %s4457_s20 = int_to_ptr.vmem [resolvable:$false] %s4456_s20 }
  0x6f   : > { %373 = vst [vmem:[#allocation3 + $0x198] sm:$0xff] %v4527_v0  ;;  %374 = vst [vmem:[#allocation3 + $0x1a0] sm:$0xff] %v4527_v0  ;;  %931 = vmatpush1.msra.mxu0 %v771_v21  ;;  %1156 = vmatpush1.msra.mxu1 %v803_v22  ;;  %v829_v45 = vld [vmem:[#allocation7 + $0x1f8] sm:$0xff]  ;;  %v828_v48 = vld [vmem:[#allocation7 + $0x1f0] sm:$0xff]  ;;  %s4458_s22 = scalar_lea.vmem %s4457_s20, 8192  ;;  %p4459_p13 = scmp.lt.s32.totalorder %s6553_s18, %s4457_s20 }
  0x70   : > { %375 = vst [vmem:[#allocation3 + $0x1a8] sm:$0x3] %v4527_v0  ;;  %377 = vst [vmem:[#allocation3 + $0x18] sm:$0x1] %v4527_v0  ;;  %932 = vmatprep.subr.mxu0 %v4527_v0  ;;  %1157 = vmatprep.subr.mxu1 %v4527_v0  ;;  %v4884_v46 = vld [vmem:[%s4713_s10 + $0x58] sm:$0xff]  ;;  %v4890_v49 = vld [vmem:[%s4713_s10 + $0x60] sm:$0xff]  ;;  %p4460_p0 = scmp.lt.s32.totalorder %s4458_s22, %s4452_s28 }
  0x71   : > { %378 = vst [vmem:[#allocation3 + $0x30] sm:$0x1] %v4527_v0  ;;  %379 = vst [vmem:[#allocation3 + $0x48] sm:$0x1] %v4527_v0  ;;  %933 = vmatpush1.msra.mxu0 %v770_v23  ;;  %1158 = vmatpush1.msra.mxu1 %v802_v24  ;;  %v795_v50 = vld [vmem:[#allocation7 + $0xe8] sm:$0xff]  ;;  %v794_v52 = vld [vmem:[#allocation7 + $0xe0] sm:$0xff] }
  0x72   : > { %380 = vst [vmem:[#allocation3 + $0x60] sm:$0x1] %v4527_v0  ;;  %381 = vst [vmem:[#allocation3 + $0x78] sm:$0x1] %v4527_v0  ;;  %934 = vmatprep.subr.mxu0 %v4527_v0  ;;  %1159 = vmatprep.subr.mxu1 %v4527_v0  ;;  %v827_v51 = vld [vmem:[#allocation7 + $0x1e8] sm:$0xff]  ;;  %v826_v53 = vld [vmem:[#allocation7 + $0x1e0] sm:$0xff]  ;;  %p4461_p10 = por %p4460_p0, %p4459_p13 }
  0x73   : > { %382 = vst [vmem:[#allocation3 + $0x90] sm:$0x1] %v4527_v0  ;;  %383 = vst [vmem:[#allocation3 + $0xa8] sm:$0x1] %v4527_v0  ;;  %935 = vmatpush1.msra.mxu0 %v769_v25  ;;  %1160 = vmatpush1.msra.mxu1 %v801_v26  ;;  %v793_v54 = vld [vmem:[#allocation7 + $0xd8] sm:$0xff]  ;;  %v4900_v56 = vld [vmem:[%s4713_s10 + $0x68] sm:$0xff] }
  0x74   : > { %384 = vst [vmem:[#allocation3 + $0xc0] sm:$0x1] %v4527_v0  ;;  %385 = vst [vmem:[#allocation3 + $0xd8] sm:$0x1] %v4527_v0  ;;  %936 = vmatprep.subr.mxu0 %v4527_v0  ;;  %1161 = vmatprep.subr.mxu1 %v4527_v0  ;;  %v825_v55 = vld [vmem:[#allocation7 + $0x1d8] sm:$0xff]  ;;  %v792_v57 = vld [vmem:[#allocation7 + $0xd0] sm:$0xff]  ;;  %p4462_p3 = pnand %p4461_p10, %p4455_p12 }
  0x75   : > { %386 = vst [vmem:[#allocation3 + $0xf0] sm:$0x1] %v4527_v0  ;;  %387 = vst [vmem:[#allocation3 + $0x108] sm:$0x1] %v4527_v0  ;;  %937 = vmatpush1.msra.mxu0 %v768_v29  ;;  %1162 = vmatpush1.msra.mxu1 %v800_v30  ;;  %v824_v58 = vld [vmem:[#allocation7 + $0x1d0] sm:$0xff]  ;;  %v4910_v60 = vld [vmem:[%s4713_s10 + $0x78] sm:$0xff] }
  0x76   : > { %388 = vst [vmem:[#allocation3 + $0x120] sm:$0x1] %v4527_v0  ;;  %389 = vst [vmem:[#allocation3 + $0x138] sm:$0x1] %v4527_v0  ;;  %938 = vmatprep.subr.mxu0 %v4527_v0  ;;  %1163 = vmatprep.subr.mxu1 %v4527_v0  ;;  %v4906_v59 = vld [vmem:[%s4713_s10 + $0x70] sm:$0xff]  ;;  %v791_v61 = vld [vmem:[#allocation7 + $0xc8] sm:$0xff] }
  0x77   : > { %390 = vst [vmem:[#allocation3 + $0x150] sm:$0x1] %v4527_v0  ;;  %391 = vst [vmem:[#allocation3 + $0x168] sm:$0x1] %v4527_v0  ;;  %939 = vmatpush1.msra.mxu0 %v767_v34  ;;  %1164 = vmatpush1.msra.mxu1 %v799_v35  ;;  %v823_v62 = vld [vmem:[#allocation7 + $0x1c8] sm:$0xff]  ;;  %v4916_v63 = vld [vmem:[%s4713_s10 + $0x80] sm:$0xff] }
  0x78   : > { %392 = vst [vmem:[#allocation3 + $0x180] sm:$0x1] %v4527_v0  ;;  %395 = vst [vmem:[#allocation3 + $0x29] sm:$0x1] %v4527_v0  ;;  %940 = vmatprep.subr.mxu0 %v4527_v0  ;;  %1165 = vmatprep.subr.mxu1 %v4527_v0  ;;  %v4920_v1 = vld [vmem:[%s4713_s10 + $0x88] sm:$0xff]  ;;  %v790_v2 = vld [vmem:[#allocation7 + $0xc0] sm:$0xff] }
  0x79   : > { %396 = vst [vmem:[#allocation3 + $0x41] sm:$0x1] %v4527_v0  ;;  %397 = vst [vmem:[#allocation3 + $0x59] sm:$0x1] %v4527_v0  ;;  %941 = vmatpush1.msra.mxu0 %v766_v39  ;;  %1166 = vmatpush1.msra.mxu1 %v798_v40  ;;  %v822_v3 = vld [vmem:[#allocation7 + $0x1c0] sm:$0xff]  ;;  %v4926_v4 = vld [vmem:[%s4713_s10 + $0x90] sm:$0xff] }
  0x7a   : > { %398 = vst [vmem:[#allocation3 + $0x71] sm:$0x1] %v4527_v0  ;;  %399 = vst [vmem:[#allocation3 + $0x89] sm:$0x1] %v4527_v0  ;;  %942 = vmatprep.subr.mxu0 %v4527_v0  ;;  %1167 = vmatprep.subr.mxu1 %v4527_v0  ;;  %v4930_v5 = vld [vmem:[%s4713_s10 + $0x98] sm:$0xff]  ;;  %v788_v8 = vld [vmem:[#allocation7 + $0xb0] sm:$0xff] }
  0x7b   : > { %400 = vst [vmem:[#allocation3 + $0xa1] sm:$0x1] %v4527_v0  ;;  %401 = vst [vmem:[#allocation3 + $0xb9] sm:$0x1] %v4527_v0  ;;  %943 = vmatpush2.msra.mxu0 %v797_v44  ;;  %1168 = vmatpush2.msra.mxu1 %v829_v45  ;;  %v789_v6 = vld [vmem:[#allocation7 + $0xb8] sm:$0xff]  ;;  %v820_v9 = vld [vmem:[#allocation7 + $0x1b0] sm:$0xff] }
  0x7c   : > { %402 = vst [vmem:[#allocation3 + $0xd1] sm:$0x1] %v4527_v0  ;;  %403 = vst [vmem:[#allocation3 + $0xe9] sm:$0x1] %v4527_v0  ;;  %944 = vmatprep.subr.mxu0 %v4527_v0  ;;  %1169 = vmatprep.subr.mxu1 %v4527_v0  ;;  %v821_v7 = vld [vmem:[#allocation7 + $0x1b8] sm:$0xff]  ;;  %v4938_v10 = vld [vmem:[%s4713_s10 + $0xa0] sm:$0xff] }
  0x7d   : > { %404 = vst [vmem:[#allocation3 + $0x101] sm:$0x1] %v4527_v0  ;;  %405 = vst [vmem:[#allocation3 + $0x119] sm:$0x1] %v4527_v0  ;;  %945 = vmatpush2.msra.mxu0 %v796_v47  ;;  %1170 = vmatpush2.msra.mxu1 %v828_v48  ;;  %v787_v11 = vld [vmem:[#allocation7 + $0xa8] sm:$0xff]  ;;  %v786_v13 = vld [vmem:[#allocation7 + $0xa0] sm:$0xff] }
  0x7e   : > { %406 = vst [vmem:[#allocation3 + $0x131] sm:$0x1] %v4527_v0  ;;  %407 = vst [vmem:[#allocation3 + $0x149] sm:$0x1] %v4527_v0  ;;  %946 = vmatprep.subr.mxu0 %v4527_v0  ;;  %1171 = vmatprep.subr.mxu1 %v4527_v0  ;;  %v819_v12 = vld [vmem:[#allocation7 + $0x1a8] sm:$0xff]  ;;  %v818_v14 = vld [vmem:[#allocation7 + $0x1a0] sm:$0xff] }
  0x7f   : > { %408 = vst [vmem:[#allocation3 + $0x161] sm:$0x1] %v4527_v0  ;;  %409 = vst [vmem:[#allocation3 + $0x179] sm:$0x1] %v4527_v0  ;;  %947 = vmatpush2.msra.mxu0 %v795_v50  ;;  %1172 = vmatpush2.msra.mxu1 %v827_v51  ;;  %v4946_v15 = vld [vmem:[%s4713_s10 + $0xa8] sm:$0xff]  ;;  %v785_v16 = vld [vmem:[#allocation7 + $0x98] sm:$0xff] }
  0x80   : > { %410 = vst [vmem:[#allocation3 + $0x191] sm:$0x1] %v4527_v0  ;;  %333 = vst [vmem:[#allocation2] sm:$0x1] %v4527_v0  ;;  %948 = vmatprep.subr.mxu0 %v4527_v0  ;;  %1173 = vmatprep.subr.mxu1 %v4527_v0  ;;  %v817_v17 = vld [vmem:[#allocation7 + $0x198] sm:$0xff]  ;;  %v4952_v18 = vld [vmem:[%s4713_s10 + $0xb0] sm:$0xff] }
  0x81   : > { %350 = vst [vmem:[#allocation2 + $0x198] sm:$0x1] %v4527_v0  ;;  %351 = vst [vmem:[#allocation2 + $0x11] sm:$0x1] %v4527_v0  ;;  %949 = vmatpush2.msra.mxu0 %v794_v52  ;;  %1174 = vmatpush2.msra.mxu1 %v826_v53  ;;  %v784_v19 = vld [vmem:[#allocation7 + $0x90] sm:$0xff]  ;;  %v4958_v21 = vld [vmem:[%s4713_s10 + $0xb8] sm:$0xff] }
  0x82   : > { %368 = vst [vmem:[#allocation2 + $0x1a9] sm:$0x1] %v4527_v0  ;;  %376 = vst [vmem:[#allocation3] sm:$0x1] %v4527_v0  ;;  %950 = vmatprep.subr.mxu0 %v4527_v0  ;;  %1175 = vmatprep.subr.mxu1 %v4527_v0  ;;  %v816_v20 = vld [vmem:[#allocation7 + $0x190] sm:$0xff]  ;;  %v4962_v22 = vld [vmem:[%s4713_s10 + $0xc0] sm:$0xff] }
  0x83   : > { %393 = vst [vmem:[#allocation3 + $0x198] sm:$0x1] %v4527_v0  ;;  %394 = vst [vmem:[#allocation3 + $0x11] sm:$0x1] %v4527_v0  ;;  %951 = vmatpush2.msra.mxu0 %v793_v54  ;;  %1176 = vmatpush2.msra.mxu1 %v825_v55  ;;  %v783_v23 = vld [vmem:[#allocation7 + $0x88] sm:$0xff]  ;;  %v782_v29 = vld [vmem:[#allocation7 + $0x80] sm:$0xff] }
  0x84   : > { %411 = vst [vmem:[#allocation3 + $0x1a9] sm:$0x1] %v4527_v0  ;;  %445 = vst [vmem:[#allocation2 + $0x19] sm:$0xff] %v4832_v27  ;;  %952 = vmatprep.subr.mxu0 %v4527_v0  ;;  %1177 = vmatprep.subr.mxu1 %v4527_v0  ;;  %v815_v24 = vld [vmem:[#allocation7 + $0x188] sm:$0xff]  ;;  %v814_v34 = vld [vmem:[#allocation7 + $0x180] sm:$0xff] }
  0x85   : > { %446 = vst [vmem:[#allocation2 + $0x21] sm:$0xff] %v4836_v28  ;;  %447 = vst [vmem:[#allocation2 + $0x31] sm:$0xff] %v4842_v31  ;;  %953 = vmatpush2.msra.mxu0 %v792_v57  ;;  %1178 = vmatpush2.msra.mxu1 %v824_v58  ;;  %v509_v25 = vld [vmem:[#allocation2 + $0x1] sm:$0xff]  ;;  %v4974_v35 = vld [vmem:[%s4713_s10 + $0xd0] sm:$0xff] }
  0x86   : > { %448 = vst [vmem:[#allocation2 + $0x39] sm:$0xff] %v4846_v32  ;;  %449 = vst [vmem:[#allocation2 + $0x49] sm:$0xff] %v4849_v33  ;;  %954 = vmatprep.subr.mxu0 %v4527_v0  ;;  %1179 = vmatprep.subr.mxu1 %v4527_v0  ;;  %v4968_v26 = vld [vmem:[%s4713_s10 + $0xc8] sm:$0xff]  ;;  %v845_v44 = vld [vmem:[#allocation7 + $0x278] sm:$0xff] }
  0x87   : > { %450 = vst [vmem:[#allocation2 + $0x51] sm:$0xff] %v4856_v36  ;;  %451 = vst [vmem:[#allocation2 + $0x61] sm:$0xff] %v4860_v37  ;;  %955 = vmatpush2.msra.mxu0 %v791_v61  ;;  %1180 = vmatpush2.msra.mxu1 %v823_v62  ;;  %v477_v30 = vld [vmem:[#allocation2] sm:$0xff]  ;;  %v4980_v45 = vld [vmem:[%s4713_s10 + $0xd8] sm:$0xff] }
  0x88   : > { %452 = vst [vmem:[#allocation2 + $0x69] sm:$0xff] %v4863_v38  ;;  %453 = vst [vmem:[#allocation2 + $0x79] sm:$0xff] %v4870_v41  ;;  %956 = vmatprep.subr.mxu0 %v4527_v0  ;;  %1181 = vmatprep.subr.mxu1 %v4527_v0  ;;  %v541_v40 = vld [vmem:[#allocation2 + $0x2] sm:$0xff]  ;;  %v844_v51 = vld [vmem:[#allocation7 + $0x270] sm:$0xff] }
  0x89   : > { %454 = vst [vmem:[#allocation2 + $0x81] sm:$0xff] %v4874_v42  ;;  %455 = vst [vmem:[#allocation2 + $0x91] sm:$0xff] %v4877_v43  ;;  %957 = vmatpush2.msra.mxu0 %v790_v2  ;;  %1182 = vmatpush2.msra.mxu1 %v822_v3  ;;  %v510_v47 = vld [vmem:[#allocation2 + $0x9] sm:$0xff]  ;;  %v4985_v50 = vld [vmem:[%s4713_s10 + $0xe0] sm:$0xff] }
  0x8a   : > { %456 = vst [vmem:[#allocation2 + $0x99] sm:$0xff] %v4884_v46  ;;  %457 = vst [vmem:[#allocation2 + $0xa9] sm:$0xff] %v4890_v49  ;;  %958 = vmatprep.subr.mxu0 %v4527_v0  ;;  %1183 = vmatprep.subr.mxu1 %v4527_v0  ;;  %v542_v52 = vld [vmem:[#allocation2 + $0xa] sm:$0xff]  ;;  %v842_v58 = vld [vmem:[#allocation7 + $0x260] sm:$0xff] }
  0x8b   : > { %458 = vst [vmem:[#allocation2 + $0xb1] sm:$0xff] %v4900_v56  ;;  %459 = vst [vmem:[#allocation2 + $0xc1] sm:$0xff] %v4906_v59  ;;  %959 = vmatpush2.msra.mxu0 %v789_v6  ;;  %1184 = vmatpush2.msra.mxu1 %v821_v7  ;;  %v573_v39 = vld [vmem:[#allocation2 + $0x18] sm:$0xff]  ;;  %v843_v54 = vld [vmem:[#allocation7 + $0x268] sm:$0xff] }
  0x8c   : > { %460 = vst [vmem:[#allocation2 + $0xc9] sm:$0xff] %v4910_v60  ;;  %461 = vst [vmem:[#allocation2 + $0xd9] sm:$0xff] %v4916_v63  ;;  %960 = vmatprep.subr.mxu0 %v4527_v0  ;;  %1185 = vmatprep.subr.mxu1 %v4527_v0  ;;  %v574_v48 = vld [vmem:[#allocation2 + $0x20] sm:$0xff]  ;;  %v4990_v53 = vld [vmem:[#allocation2 + $0x30] sm:$0xff] }
  0x8d   : > { %462 = vst [vmem:[#allocation2 + $0xe1] sm:$0xff] %v4920_v1  ;;  %463 = vst [vmem:[#allocation2 + $0xf1] sm:$0xff] %v4926_v4  ;;  %961 = vmatpush2.msra.mxu0 %v788_v8  ;;  %1186 = vmatpush2.msra.mxu1 %v820_v9  ;;  %v4993_v55 = vld [vmem:[%s4713_s10 + $0xe8] sm:$0xff]  ;;  %v442_v57 = vld [vmem:[%s4713_s10 + $0xf0] sm:$0xff] }
  0x8e   : > { %464 = vst [vmem:[#allocation2 + $0xf9] sm:$0xff] %v4930_v5  ;;  %465 = vst [vmem:[#allocation2 + $0x109] sm:$0xff] %v4938_v10  ;;  %962 = vmatprep.subr.mxu0 %v4527_v0  ;;  %1187 = vmatprep.subr.mxu1 %v4527_v0  ;;  %v5000_v61 = vld [vmem:[#allocation2 + $0x1a] sm:$0xff]  ;;  %v840_v3 = vld [vmem:[#allocation7 + $0x250] sm:$0xff] }
  0x8f   : > { %963 = vmatpush2.msra.mxu0 %v787_v11  ;;  %1188 = vmatpush2.msra.mxu1 %v819_v12  ;;  %466 = vst [vmem:[#allocation2 + $0x111] sm:$0xff] %v4946_v15  ;;  %467 = vst [vmem:[#allocation2 + $0x121] sm:$0xff] %v4952_v18  ;;  %v5002_v62 = vld [vmem:[#allocation2 + $0x38] sm:$0xff]  ;;  %v5010_v6 = vld [vmem:[#allocation2 + $0x22] sm:$0xff] }
  0x90   : > { %964 = vmatprep.subr.mxu0 %v4527_v0  ;;  %1189 = vmatprep.subr.mxu1 %v4527_v0  ;;  %468 = vst [vmem:[#allocation2 + $0x129] sm:$0xff] %v4958_v21  ;;  %469 = vst [vmem:[#allocation2 + $0x139] sm:$0xff] %v4962_v22  ;;  %v841_v2 = vld [vmem:[#allocation7 + $0x258] sm:$0xff]  ;;  %v5012_v7 = vld [vmem:[#allocation2 + $0x48] sm:$0xff] }
  0x91   : > { %965 = vmatpush2.msra.mxu0 %v786_v13  ;;  %1190 = vmatpush2.msra.mxu1 %v818_v14  ;;  %470 = vst [vmem:[#allocation2 + $0x141] sm:$0xff] %v4968_v26  ;;  %471 = vst [vmem:[#allocation2 + $0x151] sm:$0xff] %v4974_v35  ;;  %v839_v8 = vld [vmem:[#allocation7 + $0x248] sm:$0xff]  ;;  %v5019_v9 = vld [vmem:[#allocation2 + $0x32] sm:$0xff] }
  0x92   : > { %966 = vmatprep.subr.mxu0 %v4527_v0  ;;  %1191 = vmatprep.subr.mxu1 %v4527_v0  ;;  %472 = vst [vmem:[#allocation2 + $0x159] sm:$0xff] %v4980_v45  ;;  %473 = vst [vmem:[#allocation2 + $0x169] sm:$0xff] %v4985_v50  ;;  %v5022_v11 = vld [vmem:[#allocation2 + $0x50] sm:$0xff]  ;;  %v837_v12 = vld [vmem:[#allocation7 + $0x238] sm:$0xff] }
  0x93   : > { %967 = vmatpush2.msra.mxu0 %v785_v16  ;;  %1192 = vmatpush2.msra.mxu1 %v817_v17  ;;  %474 = vst [vmem:[#allocation2 + $0x171] sm:$0xff] %v4993_v55  ;;  %475 = vst [vmem:[#allocation2 + $0x181] sm:$0xff] %v442_v57  ;;  %v5029_v13 = vld [vmem:[#allocation2 + $0x3a] sm:$0xff]  ;;  %v835_v16 = vld [vmem:[#allocation7 + $0x228] sm:$0xff] }
  0x94   : > { %968 = vmatprep.subr.mxu0 %v4527_v0  ;;  %1193 = vmatprep.subr.mxu1 %v4527_v0  ;;  %v5032_v14 = vld [vmem:[#allocation2 + $0x60] sm:$0xff]  ;;  %v5039_v17 = vld [vmem:[#allocation2 + $0x4a] sm:$0xff] }
  0x95   : > { %969 = vmatpush2.msra.mxu0 %v784_v19  ;;  %1194 = vmatpush2.msra.mxu1 %v816_v20  ;;  %v5042_v19 = vld [vmem:[#allocation2 + $0x68] sm:$0xff]  ;;  %v833_v20 = vld [vmem:[#allocation7 + $0x218] sm:$0xff]  ;;  %v874_v57 = vld [vmem:[#allocation7 + $0x360] sm:$0xff] }
  0x96   : > { %970 = vmatprep.subr.mxu0 %v4527_v0  ;;  %1195 = vmatprep.subr.mxu1 %v4527_v0 }
  0x97   : > { %971 = vmatpush2.msra.mxu0 %v783_v23  ;;  %1196 = vmatpush2.msra.mxu1 %v815_v24  ;;  %v5049_v23 = vld [vmem:[#allocation2 + $0x52] sm:$0xff] }
  0x98   : > { %972 = vmatprep.subr.mxu0 %v4527_v0  ;;  %974 = vmatprep.mubr.f32.mxu0 %v509_v25  ;;  %v5052_v24 = vld [vmem:[#allocation2 + $0x78] sm:$0xff]  ;;  %v831_v25 = vld [vmem:[#allocation7 + $0x208] sm:$0xff] }
  0x99   : > { %973 = vmatpush2.msra.mxu0 %v782_v29  ;;  %1197 = vmatprep.subr.mxu1 %v4527_v0  ;;  %v5059_v29 = vld [vmem:[#allocation2 + $0x62] sm:$0xff] }
  0x9a   : > { %975 = vmatmul.mubr.f32.vlgmr.msra.gmra.mxu0 %v477_v30  ;;  %1198 = vmatpush2.msra.mxu1 %v814_v34  ;;  %v5062_v30 = vld [vmem:[#allocation2 + $0x80] sm:$0xff]  ;;  %v861_v34 = vld [vmem:[#allocation7 + $0x2f8] sm:$0xff] }
  0x9b   : > { %1199 = vmatprep.mubr.f32.mxu1 %v573_v39  ;;  %1360 = vmatprep.subr.mxu0 %v4527_v0 }
  0x9c   : > { %1200 = vmatmul.mubr.f32.vlgmr.msra.gmra.mxu1 %v541_v40  ;;  %1361 = vmatpush1.msra.mxu0 %v845_v44  ;;  %v5072_v40 = vld [vmem:[#allocation2 + $0x90] sm:$0xff] }
  0x9d   : > { %979 = vmatprep.mubr.f32.mxu0 %v510_v47  ;;  %1204 = vmatprep.mubr.f32.mxu1 %v574_v48  ;;  %v860_v44 = vld [vmem:[#allocation7 + $0x2f0] sm:$0xff]  ;;  %v5079_v47 = vld [vmem:[#allocation2 + $0x7a] sm:$0xff] }
  0x9e   : > { %980 = vmatmul.mubr.f32.gmra.mxu0 %v4527_v0  ;;  %1362 = vmatprep.subr.mxu0 %v4527_v0 }
  0x9f   : > { %1363 = vmatpush1.msra.mxu0 %v844_v51  ;;  %984 = vmatprep.mubr.f32.mxu0 %v4832_v27  ;;  %v443_v27 = vld [vmem:[%s4713_s10 + $0xf8] sm:$0xff]  ;;  %v875_v51 = vld [vmem:[#allocation7 + $0x368] sm:$0xff]  ;;  %s6551_s10 = scalar_lea.hbm %s6605_s7, %s4007_s16 }
  0xa0   : > { %1205 = vmatmul.mubr.f32.gmra.mxu1 %v542_v52  ;;  %1364 = vmatprep.subr.mxu0 %v4527_v0  ;;  %476 = vst [vmem:[#allocation2 + $0x189] sm:$0xff] %v443_v27  ;;  %v859_v52 = vld [vmem:[#allocation7 + $0x2e8] sm:$0xff]  ;;  %v858_v27 = vld [vmem:[#allocation7 + $0x2e0] sm:$0xff] }
  0xa1   : > { %1209 = vmatprep.mubr.f32.mxu1 %v4990_v53  ;;  %1365 = vmatpush1.msra.mxu0 %v843_v54  ;;  %v5092_v54 = vld [vmem:[#allocation2 + $0xa8] sm:$0xff] }
  0xa2   : > { %985 = vmatmul.mubr.f32.gmra.mxu0 %v573_v39  ;;  %1366 = vmatprep.subr.mxu0 %v4527_v0  ;;  %v5069_v39 = vld [vmem:[#allocation2 + $0x6a] sm:$0xff] }
  0xa3   : > { %989 = vmatprep.mubr.f32.mxu0 %v4836_v28  ;;  %1367 = vmatpush1.msra.mxu0 %v842_v58  ;;  %v838_v28 = vld [vmem:[#allocation7 + $0x240] sm:$0xff]  ;;  %v5099_v58 = vld [vmem:[#allocation2 + $0x92] sm:$0xff] }
  0xa4   : > { %1210 = vmatmul.mubr.f32.gmra.mxu1 %v5000_v61  ;;  %1368 = vmatprep.subr.mxu0 %v4527_v0 }
  0xa5   : > { %1214 = vmatprep.mubr.f32.mxu1 %v5002_v62  ;;  %1369 = vmatpush1.msra.mxu0 %v841_v2  ;;  %v5102_v2 = vld [vmem:[#allocation2 + $0xb0] sm:$0xff] }
  0xa6   : > { %990 = vmatmul.mubr.f32.gmra.mxu0 %v574_v48  ;;  %1370 = vmatprep.subr.mxu0 %v4527_v0  ;;  %v5083_v48 = vld [vmem:[#allocation2 + $0x98] sm:$0xff] }
  0xa7   : > { %994 = vmatprep.mubr.f32.mxu0 %v4842_v31  ;;  %1371 = vmatpush1.msra.mxu0 %v840_v3  ;;  %v836_v31 = vld [vmem:[#allocation7 + $0x230] sm:$0xff]  ;;  %v5109_v3 = vld [vmem:[#allocation2 + $0x9a] sm:$0xff] }
  0xa8   : > { %1215 = vmatmul.mubr.f32.gmra.mxu1 %v5010_v6  ;;  %1372 = vmatprep.subr.mxu0 %v4527_v0 }
  0xa9   : > { %1219 = vmatprep.mubr.f32.mxu1 %v5012_v7  ;;  %1373 = vmatpush1.msra.mxu0 %v839_v8  ;;  %v5113_v8 = vld [vmem:[#allocation2 + $0xc0] sm:$0xff] }
  0xaa   : > { %995 = vmatmul.mubr.f32.gmra.mxu0 %v4990_v53  ;;  %1374 = vmatprep.subr.mxu0 %v4527_v0 }
  0xab   : > { %999 = vmatprep.mubr.f32.mxu0 %v4846_v32  ;;  %1375 = vmatpush1.msra.mxu0 %v838_v28  ;;  %v834_v32 = vld [vmem:[#allocation7 + $0x220] sm:$0xff]  ;;  %v871_v28 = vld [vmem:[#allocation7 + $0x348] sm:$0xff] }
  0xac   : > { %1220 = vmatmul.mubr.f32.gmra.mxu1 %v5019_v9  ;;  %1376 = vmatprep.subr.mxu0 %v4527_v0 }
  0xad   : > { %1224 = vmatprep.mubr.f32.mxu1 %v5022_v11  ;;  %1377 = vmatpush1.msra.mxu0 %v837_v12  ;;  %v857_v12 = vld [vmem:[#allocation7 + $0x2d8] sm:$0xff] }
  0xae   : > { %1000 = vmatmul.mubr.f32.gmra.mxu0 %v5002_v62  ;;  %1378 = vmatprep.subr.mxu0 %v4527_v0 }
  0xaf   : > { %1004 = vmatprep.mubr.f32.mxu0 %v4849_v33  ;;  %1379 = vmatpush1.msra.mxu0 %v836_v31  ;;  %v832_v33 = vld [vmem:[#allocation7 + $0x210] sm:$0xff]  ;;  %v5122_v31 = vld [vmem:[#allocation2 + $0xc8] sm:$0xff] }
  0xb0   : > { %1225 = vmatmul.mubr.f32.gmra.mxu1 %v5029_v13  ;;  %1380 = vmatprep.subr.mxu0 %v4527_v0 }
  0xb1   : > { %1229 = vmatprep.mubr.f32.mxu1 %v5032_v14  ;;  %1381 = vmatpush1.msra.mxu0 %v835_v16  ;;  %v5124_v16 = vld [vmem:[#allocation2 + $0x8] sm:$0xff] }
  0xb2   : > { %1005 = vmatmul.mubr.f32.gmra.mxu0 %v5012_v7  ;;  %1382 = vmatprep.subr.mxu0 %v4527_v0 }
  0xb3   : > { %1009 = vmatprep.mubr.f32.mxu0 %v4856_v36  ;;  %1383 = vmatpush1.msra.mxu0 %v834_v32  ;;  %v830_v36 = vld [vmem:[#allocation7 + $0x200] sm:$0xff]  ;;  %v5131_v32 = vld [vmem:[#allocation2 + $0xb2] sm:$0xff] }
  0xb4   : > { %1230 = vmatmul.mubr.f32.gmra.mxu1 %v5039_v17  ;;  %1384 = vmatprep.subr.mxu0 %v4527_v0 }
  0xb5   : > { %1234 = vmatprep.mubr.f32.mxu1 %v5042_v19  ;;  %1385 = vmatpush1.msra.mxu0 %v833_v20  ;;  %v5134_v20 = vld [vmem:[#allocation2 + $0xd8] sm:$0xff] }
  0xb6   : > { %1010 = vmatmul.mubr.f32.gmra.mxu0 %v5022_v11  ;;  %1386 = vmatprep.subr.mxu0 %v4527_v0 }
  0xb7   : > { %1014 = vmatprep.mubr.f32.mxu0 %v4860_v37  ;;  %1387 = vmatpush1.msra.mxu0 %v832_v33  ;;  %v877_v37 = vld [vmem:[#allocation7 + $0x378] sm:$0xff]  ;;  %v856_v33 = vld [vmem:[#allocation7 + $0x2d0] sm:$0xff] }
  0xb8   : > { %1235 = vmatmul.mubr.f32.gmra.mxu1 %v5049_v23  ;;  %1388 = vmatprep.subr.mxu0 %v4527_v0 }
  0xb9   : > { %1239 = vmatprep.mubr.f32.mxu1 %v5052_v24  ;;  %1389 = vmatpush1.msra.mxu0 %v831_v25  ;;  %v5141_v25 = vld [vmem:[#allocation2 + $0xc2] sm:$0xff] }
  0xba   : > { %1015 = vmatmul.mubr.f32.gmra.mxu0 %v5032_v14  ;;  %1390 = vmatprep.subr.mxu0 %v4527_v0 }
  0xbb   : > { %1019 = vmatprep.mubr.f32.mxu0 %v4863_v38  ;;  %1391 = vmatpush1.msra.mxu0 %v830_v36  ;;  %v876_v38 = vld [vmem:[#allocation7 + $0x370] sm:$0xff]  ;;  %v5145_v36 = vld [vmem:[#allocation2 + $0xe0] sm:$0xff] }
  0xbc   : > { %1240 = vmatmul.mubr.f32.gmra.mxu1 %v5059_v29  ;;  %1392 = vmatprep.subr.mxu0 %v4527_v0 }
  0xbd   : > { %1244 = vmatprep.mubr.f32.mxu1 %v5062_v30  ;;  %1393 = vmatpush2.msra.mxu0 %v861_v34  ;;  %v867_v34 = vld [vmem:[#allocation7 + $0x328] sm:$0xff] }
  0xbe   : > { %1020 = vmatmul.mubr.f32.gmra.mxu0 %v5042_v19  ;;  %1585 = vmatprep.subr.mxu1 %v4527_v0 }
  0xbf   : > { %1024 = vmatprep.mubr.f32.mxu0 %v4870_v41  ;;  %1586 = vmatpush1.msra.mxu1 %v877_v37  ;;  %v5089_v41 = vld [vmem:[#allocation2 + $0x82] sm:$0xff] }
  0xc0   : > { %1245 = vmatmul.mubr.f32.gmra.mxu1 %v5069_v39  ;;  %1394 = vmatprep.subr.mxu0 %v4527_v0  ;;  %v855_v37 = vld [vmem:[#allocation7 + $0x2c8] sm:$0xff] }
  0xc1   : > { %1249 = vmatprep.mubr.f32.mxu1 %v5072_v40  ;;  %1587 = vmatprep.subr.mxu1 %v4527_v0 }
  0xc2   : > { %1025 = vmatmul.mubr.f32.gmra.mxu0 %v5052_v24  ;;  %1588 = vmatpush1.msra.mxu1 %v876_v38  ;;  %v5154_v38 = vld [vmem:[#allocation2 + $0xf0] sm:$0xff] }
  0xc3   : > { %1029 = vmatprep.mubr.f32.mxu0 %v4874_v42  ;;  %1395 = vmatpush2.msra.mxu0 %v860_v44  ;;  %v873_v42 = vld [vmem:[#allocation7 + $0x358] sm:$0xff]  ;;  %v866_v44 = vld [vmem:[#allocation7 + $0x320] sm:$0xff] }
  0xc4   : > { %1250 = vmatmul.mubr.f32.gmra.mxu1 %v5079_v47  ;;  %1589 = vmatprep.subr.mxu1 %v4527_v0 }
  0xc5   : > { %1254 = vmatprep.mubr.f32.mxu1 %v5083_v48  ;;  %1590 = vmatpush1.msra.mxu1 %v875_v51  ;;  %v5161_v51 = vld [vmem:[#allocation2 + $0xda] sm:$0xff] }
  0xc6   : > { %1030 = vmatmul.mubr.f32.gmra.mxu0 %v5062_v30  ;;  %1396 = vmatprep.subr.mxu0 %v4527_v0 }
  0xc7   : > { %1034 = vmatprep.mubr.f32.mxu0 %v4877_v43  ;;  %1591 = vmatprep.subr.mxu1 %v4527_v0  ;;  %v872_v43 = vld [vmem:[#allocation7 + $0x350] sm:$0xff] }
  0xc8   : > { %1255 = vmatmul.mubr.f32.gmra.mxu1 %v5089_v41  ;;  %1397 = vmatpush2.msra.mxu0 %v859_v52  ;;  %v5164_v52 = vld [vmem:[#allocation2 + $0xf8] sm:$0xff] }
  0xc9   : > { %1259 = vmatprep.mubr.f32.mxu1 %v5092_v54  ;;  %1592 = vmatpush1.msra.mxu1 %v874_v57  ;;  %v854_v57 = vld [vmem:[#allocation7 + $0x2c0] sm:$0xff] }
  0xca   : > { %1035 = vmatmul.mubr.f32.gmra.mxu0 %v5072_v40  ;;  %1593 = vmatprep.subr.mxu1 %v4527_v0 }
  0xcb   : > { %1039 = vmatprep.mubr.f32.mxu0 %v4884_v46  ;;  %1594 = vmatpush1.msra.mxu1 %v873_v42  ;;  %v5119_v46 = vld [vmem:[#allocation2 + $0xaa] sm:$0xff]  ;;  %v5171_v42 = vld [vmem:[#allocation2 + $0xe2] sm:$0xff] }
  0xcc   : > { %1260 = vmatmul.mubr.f32.gmra.mxu1 %v5099_v58  ;;  %1398 = vmatprep.subr.mxu0 %v4527_v0 }
  0xcd   : > { %1264 = vmatprep.mubr.f32.mxu1 %v5102_v2  ;;  %1595 = vmatprep.subr.mxu1 %v4527_v0 }
  0xce   : > { %1040 = vmatmul.mubr.f32.gmra.mxu0 %v5083_v48  ;;  %1596 = vmatpush1.msra.mxu1 %v872_v43  ;;  %v5175_v43 = vld [vmem:[#allocation2 + $0x108] sm:$0xff] }
  0xcf   : > { %1044 = vmatprep.mubr.f32.mxu0 %v4890_v49  ;;  %1399 = vmatpush2.msra.mxu0 %v858_v27  ;;  %v870_v49 = vld [vmem:[#allocation7 + $0x340] sm:$0xff]  ;;  %v863_v27 = vld [vmem:[#allocation7 + $0x308] sm:$0xff] }
  0xd0   : > { %1265 = vmatmul.mubr.f32.gmra.mxu1 %v5109_v3  ;;  %1597 = vmatprep.subr.mxu1 %v4527_v0  ;;  %v869_v0 = vld [vmem:[#allocation7 + $0x338] sm:$0xff] }
  0xd1   : > { %1269 = vmatprep.mubr.f32.mxu1 %v5113_v8  ;;  %1598 = vmatpush1.msra.mxu1 %v871_v28  ;;  %v853_v28 = vld [vmem:[#allocation7 + $0x2b8] sm:$0xff] }
  0xd2   : > { %1045 = vmatmul.mubr.f32.gmra.mxu0 %v5092_v54  ;;  %1400 = vmatprep.subr.mxu0 %v5124_v16 }
  0xd3   : > { %1049 = vmatprep.mubr.f32.mxu0 %v4900_v56  ;;  %1599 = vmatprep.subr.mxu1 %v5124_v16  ;;  %v868_v56 = vld [vmem:[#allocation7 + $0x330] sm:$0xff] }
  0xd4   : > { %1270 = vmatmul.mubr.f32.gmra.mxu1 %v5119_v46  ;;  %1401 = vmatpush2.msra.mxu0 %v857_v12  ;;  %v5184_v12 = vld [vmem:[#allocation2 + $0x110] sm:$0xff] }
  0xd5   : > { %1274 = vmatprep.mubr.f32.mxu1 %v5122_v31  ;;  %1600 = vmatpush1.msra.mxu1 %v870_v49  ;;  %v862_v49 = vld [vmem:[#allocation7 + $0x300] sm:$0xff] }
  0xd6   : > { %1050 = vmatmul.mubr.f32.gmra.mxu0 %v5102_v2  ;;  %1601 = vmatprep.subr.mxu1 %v5124_v16 }
  0xd7   : > { %1054 = vmatprep.mubr.f32.mxu0 %v4906_v59  ;;  %1602 = vmatpush1.msra.mxu1 %v869_v0  ;;  %v5151_v59 = vld [vmem:[#allocation2 + $0xca] sm:$0xff]  ;;  %v5191_v0 = vld [vmem:[#allocation2 + $0xfa] sm:$0xff] }
  0xd8   : > { %1275 = vmatmul.mubr.f32.gmra.mxu1 %v5131_v32  ;;  %1402 = vmatprep.subr.mxu0 %v5124_v16 }
  0xd9   : > { %1279 = vmatprep.mubr.f32.mxu1 %v5134_v20  ;;  %1603 = vmatprep.subr.mxu1 %v5124_v16 }
  0xda   : > { %1055 = vmatmul.mubr.f32.gmra.mxu0 %v5113_v8  ;;  %1604 = vmatpush1.msra.mxu1 %v868_v56  ;;  %v5194_v56 = vld [vmem:[#allocation2 + $0x120] sm:$0xff] }
  0xdb   : > { %1059 = vmatprep.mubr.f32.mxu0 %v4910_v60  ;;  %1403 = vmatpush2.msra.mxu0 %v856_v33  ;;  %v865_v60 = vld [vmem:[#allocation7 + $0x318] sm:$0xff]  ;;  %v852_v33 = vld [vmem:[#allocation7 + $0x2b0] sm:$0xff] }
  0xdc   : > { %1280 = vmatmul.mubr.f32.gmra.mxu1 %v5141_v25  ;;  %1605 = vmatprep.subr.mxu1 %v5124_v16 }
  0xdd   : > { %1284 = vmatprep.mubr.f32.mxu1 %v5145_v36  ;;  %1606 = vmatpush1.msra.mxu1 %v867_v34  ;;  %v5201_v34 = vld [vmem:[#allocation2 + $0x10a] sm:$0xff] }
  0xde   : > { %1060 = vmatmul.mubr.f32.gmra.mxu0 %v5122_v31  ;;  %1404 = vmatprep.subr.mxu0 %v5124_v16 }
  0xdf   : > { %1064 = vmatprep.mubr.f32.mxu0 %v4916_v63  ;;  %1607 = vmatprep.subr.mxu1 %v5124_v16  ;;  %v864_v63 = vld [vmem:[#allocation7 + $0x310] sm:$0xff] }
  0xe0   : > { %1285 = vmatmul.mubr.f32.gmra.mxu1 %v5151_v59  ;;  %1405 = vmatpush2.msra.mxu0 %v855_v37  ;;  %v5205_v37 = vld [vmem:[#allocation2 + $0x128] sm:$0xff] }
  0xe1   : > { %1289 = vmatprep.mubr.f32.mxu1 %v5154_v38  ;;  %1608 = vmatpush1.msra.mxu1 %v866_v44  ;;  %v891_v44 = vld [vmem:[#allocation7 + $0x3e8] sm:$0xff] }
  0xe2   : > { %1065 = vmatmul.mubr.f32.gmra.mxu0 %v5134_v20  ;;  %1609 = vmatprep.subr.mxu1 %v5124_v16 }
  0xe3   : > { %1069 = vmatprep.mubr.f32.mxu0 %v4920_v1  ;;  %1610 = vmatpush1.msra.mxu1 %v865_v60  ;;  %v5181_v1 = vld [vmem:[#allocation2 + $0xf2] sm:$0xff]  ;;  %v851_v60 = vld [vmem:[#allocation7 + $0x2a8] sm:$0xff] }
  0xe4   : > { %1290 = vmatmul.mubr.f32.gmra.mxu1 %v5161_v51  ;;  %1406 = vmatprep.subr.mxu0 %v5124_v16 }
  0xe5   : > { %1294 = vmatprep.mubr.f32.mxu1 %v5164_v52  ;;  %1611 = vmatprep.subr.mxu1 %v5124_v16 }
  0xe6   : > { %1070 = vmatmul.mubr.f32.gmra.mxu0 %v5145_v36  ;;  %1612 = vmatpush1.msra.mxu1 %v864_v63  ;;  %v5214_v63 = vld [vmem:[#allocation2 + $0x138] sm:$0xff] }
  0xe7   : > { %1074 = vmatprep.mubr.f32.mxu0 %v4926_v4  ;;  %1407 = vmatpush2.msra.mxu0 %v854_v57  ;;  %v893_v4 = vld [vmem:[#allocation7 + $0x3f8] sm:$0xff]  ;;  %v890_v57 = vld [vmem:[#allocation7 + $0x3e0] sm:$0xff] }
  0xe8   : > { %1295 = vmatmul.mubr.f32.gmra.mxu1 %v5171_v42  ;;  %1613 = vmatprep.subr.mxu1 %v5124_v16 }
  0xe9   : > { %1299 = vmatprep.mubr.f32.mxu1 %v5175_v43  ;;  %1614 = vmatpush1.msra.mxu1 %v863_v27  ;;  %v5221_v27 = vld [vmem:[#allocation2 + $0x122] sm:$0xff] }
  0xea   : > { %1075 = vmatmul.mubr.f32.gmra.mxu0 %v5154_v38  ;;  %1408 = vmatprep.subr.mxu0 %v5124_v16 }
  0xeb   : > { %1079 = vmatprep.mubr.f32.mxu0 %v4930_v5  ;;  %1615 = vmatprep.subr.mxu1 %v5124_v16  ;;  %v892_v5 = vld [vmem:[#allocation7 + $0x3f0] sm:$0xff] }
  0xec   : > { %1300 = vmatmul.mubr.f32.gmra.mxu1 %v5181_v1  ;;  %1409 = vmatpush2.msra.mxu0 %v853_v28  ;;  %v5224_v28 = vld [vmem:[#allocation2 + $0x140] sm:$0xff] }
  0xed   : > { %1304 = vmatprep.mubr.f32.mxu1 %v5184_v12  ;;  %1616 = vmatpush1.msra.mxu1 %v862_v49  ;;  %v850_v49 = vld [vmem:[#allocation7 + $0x2a0] sm:$0xff] }
  0xee   : > { %1080 = vmatmul.mubr.f32.gmra.mxu0 %v5164_v52  ;;  %1617 = vmatprep.subr.mxu1 %v5124_v16 }
  0xef   : > { %1084 = vmatprep.mubr.f32.mxu0 %v4938_v10  ;;  %1618 = vmatpush2.msra.mxu1 %v893_v4  ;;  %v5211_v10 = vld [vmem:[#allocation2 + $0x112] sm:$0xff]  ;;  %v5231_v4 = vld [vmem:[#allocation2 + $0x12a] sm:$0xff] }
  0xf0   : > { %1305 = vmatmul.mubr.f32.gmra.mxu1 %v5191_v0  ;;  %1410 = vmatprep.subr.mxu0 %v5124_v16 }
  0xf1   : > { %1309 = vmatprep.mubr.f32.mxu1 %v5194_v56  ;;  %1619 = vmatprep.subr.mxu1 %v5124_v16 }
  0xf2   : > { %1085 = vmatmul.mubr.f32.gmra.mxu0 %v5175_v43  ;;  %1620 = vmatpush2.msra.mxu1 %v892_v5  ;;  %v5235_v5 = vld [vmem:[#allocation2 + $0x150] sm:$0xff] }
  0xf3   : > { %1089 = vmatprep.mubr.f32.mxu0 %v4946_v15  ;;  %1411 = vmatpush2.msra.mxu0 %v852_v33  ;;  %v889_v15 = vld [vmem:[#allocation7 + $0x3d8] sm:$0xff]  ;;  %6633 = vst [vmem:[#allocation14_spill] sm:$0xff] %v5235_v5  ;;  %v887_v33 = vld [vmem:[#allocation7 + $0x3c8] sm:$0xff] }
  0xf4   : > { %1310 = vmatmul.mubr.f32.gmra.mxu1 %v5201_v34  ;;  %1621 = vmatprep.subr.mxu1 %v5124_v16 }
  0xf5   : > { %1314 = vmatprep.mubr.f32.mxu1 %v5205_v37  ;;  %1622 = vmatpush2.msra.mxu1 %v891_v44  ;;  %v849_v44 = vld [vmem:[#allocation7 + $0x298] sm:$0xff] }
  0xf6   : > { %1090 = vmatmul.mubr.f32.gmra.mxu0 %v5184_v12  ;;  %1412 = vmatprep.subr.mxu0 %v5124_v16 }
  0xf7   : > { %1094 = vmatprep.mubr.f32.mxu0 %v4952_v18  ;;  %1623 = vmatprep.subr.mxu1 %v5124_v16  ;;  %v888_v18 = vld [vmem:[#allocation7 + $0x3d0] sm:$0xff] }
  0xf8   : > { %1315 = vmatmul.mubr.f32.gmra.mxu1 %v5211_v10  ;;  %1413 = vmatpush2.msra.mxu0 %v851_v60  ;;  %v5244_v60 = vld [vmem:[#allocation2 + $0x158] sm:$0xff] }
  0xf9   : > { %1319 = vmatprep.mubr.f32.mxu1 %v5214_v63  ;;  %1624 = vmatpush2.msra.mxu1 %v890_v57  ;;  %v886_v57 = vld [vmem:[#allocation7 + $0x3c0] sm:$0xff] }
  0xfa   : > { %1095 = vmatmul.mubr.f32.gmra.mxu0 %v5194_v56  ;;  %1625 = vmatprep.subr.mxu1 %v5124_v16 }
  0xfb   : > { %1099 = vmatprep.mubr.f32.mxu0 %v4958_v21  ;;  %1626 = vmatpush2.msra.mxu1 %v889_v15  ;;  %v5241_v21 = vld [vmem:[#allocation2 + $0x13a] sm:$0xff]  ;;  %v5251_v15 = vld [vmem:[#allocation2 + $0x142] sm:$0xff] }
  0xfc   : > { %1320 = vmatmul.mubr.f32.gmra.mxu1 %v5221_v27  ;;  %1414 = vmatprep.subr.mxu0 %v5124_v16 }
  0xfd   : > { %1324 = vmatprep.mubr.f32.mxu1 %v5224_v28  ;;  %1627 = vmatprep.subr.mxu1 %v5124_v16 }
  0xfe   : > { %1100 = vmatmul.mubr.f32.gmra.mxu0 %v5205_v37  ;;  %1628 = vmatpush2.msra.mxu1 %v888_v18  ;;  %v5254_v18 = vld [vmem:[#allocation2 + $0x168] sm:$0xff] }
  0xff   : > { %1104 = vmatprep.mubr.f32.mxu0 %v4962_v22  ;;  %1415 = vmatpush2.msra.mxu0 %v850_v49  ;;  %v885_v22 = vld [vmem:[#allocation7 + $0x3b8] sm:$0xff]  ;;  %6634 = vst [vmem:[#allocation15_spill] sm:$0xff] %v5254_v18  ;;  %v848_v49 = vld [vmem:[#allocation7 + $0x290] sm:$0xff] }
 0x100   : > { %1325 = vmatmul.mubr.f32.gmra.mxu1 %v5231_v4  ;;  %1629 = vmatprep.subr.mxu1 %v5124_v16 }
 0x101   : > { %1329 = vmatprep.mubr.f32.mxu1 %v5235_v5  ;;  %1630 = vmatpush2.msra.mxu1 %v887_v33  ;;  %v5261_v33 = vld [vmem:[#allocation2 + $0x152] sm:$0xff] }
 0x102   : > { %1105 = vmatmul.mubr.f32.gmra.mxu0 %v5214_v63  ;;  %1416 = vmatprep.subr.mxu0 %v5124_v16 }
 0x103   : > { %1109 = vmatprep.mubr.f32.mxu0 %v4968_v26  ;;  %1631 = vmatprep.subr.mxu1 %v5124_v16  ;;  %v884_v26 = vld [vmem:[#allocation7 + $0x3b0] sm:$0xff] }
 0x104   : > { %1330 = vmatmul.mubr.f32.gmra.mxu1 %v5241_v21  ;;  %1417 = vmatpush2.msra.mxu0 %v849_v44  ;;  %v5265_v44 = vld [vmem:[#allocation2 + $0x170] sm:$0xff] }
 0x105   : > { %1334 = vmatprep.mubr.f32.mxu1 %v5244_v60  ;;  %1632 = vmatpush2.msra.mxu1 %v886_v57  ;;  %v883_v57 = vld [vmem:[#allocation7 + $0x3a8] sm:$0xff] }
 0x106   : > { %1110 = vmatmul.mubr.f32.gmra.mxu0 %v5224_v28  ;;  %1633 = vmatprep.subr.mxu1 %v5124_v16 }
 0x107   : > { %1114 = vmatprep.mubr.f32.mxu0 %v4974_v35  ;;  %1634 = vmatpush2.msra.mxu1 %v885_v22  ;;  %v5271_v35 = vld [vmem:[#allocation2 + $0x15a] sm:$0xff]  ;;  %v847_v22 = vld [vmem:[#allocation7 + $0x288] sm:$0xff] }
 0x108   : > { %1335 = vmatmul.mubr.f32.gmra.mxu1 %v5251_v15  ;;  %1418 = vmatprep.subr.mxu0 %v5124_v16 }
 0x109   : > { %1339 = vmatprep.mubr.f32.mxu1 %v5254_v18  ;;  %1635 = vmatprep.subr.mxu1 %v5124_v16 }
 0x10a   : > { %1115 = vmatmul.mubr.f32.gmra.mxu0 %v5235_v5  ;;  %1636 = vmatpush2.msra.mxu1 %v884_v26  ;;  %v5274_v5 = vld [vmem:[#allocation2 + $0x180] sm:$0xff] }
 0x10b   : > { %1119 = vmatprep.mubr.f32.mxu0 %v4980_v45  ;;  %1419 = vmatpush2.msra.mxu0 %v848_v49  ;;  %6635 = vst [vmem:[#allocation16_spill] sm:$0xff] %v5274_v5  ;;  %v882_v26 = vld [vmem:[#allocation7 + $0x3a0] sm:$0xff]  ;;  %v881_v45 = vld [vmem:[#allocation7 + $0x398] sm:$0xff]  ;;  %v5281_v49 = vld [vmem:[#allocation2 + $0x16a] sm:$0xff] }
 0x10c   : > { %1340 = vmatmul.mubr.f32.gmra.mxu1 %v5261_v33  ;;  %1637 = vmatprep.subr.mxu1 %v5124_v16 }
 0x10d   : > { %1344 = vmatprep.mubr.f32.mxu1 %v5265_v44  ;;  %1638 = vmatpush2.msra.mxu1 %v883_v57  ;;  %v5285_v57 = vld [vmem:[#allocation2 + $0x188] sm:$0xff] }
 0x10e   : > { %1120 = vmatmul.mubr.f32.gmra.mxu0 %v5244_v60  ;;  %1420 = vmatprep.subr.mxu0 %v5124_v16  ;;  %6636 = vst [vmem:[#allocation17_spill] sm:$0xff] %v5285_v57 }
 0x10f   : > { %1124 = vmatprep.mubr.f32.mxu0 %v4985_v50  ;;  %1639 = vmatprep.subr.mxu1 %v5124_v16  ;;  %v880_v50 = vld [vmem:[#allocation7 + $0x390] sm:$0xff] }
 0x110   : > { %1345 = vmatmul.mubr.f32.gmra.mxu1 %v5271_v35  ;;  %1421 = vmatpush2.msra.mxu0 %v847_v22  ;;  %v846_v22 = vld [vmem:[#allocation7 + $0x280] sm:$0xff] }
 0x111   : > { %1349 = vmatprep.mubr.f32.mxu1 %v5274_v5  ;;  %1640 = vmatpush2.msra.mxu1 %v882_v26  ;;  %v5292_v26 = vld [vmem:[#allocation2 + $0x172] sm:$0xff]  ;;  %v879_v5 = vld [vmem:[#allocation7 + $0x388] sm:$0xff] }
 0x112   : > { %1125 = vmatmul.mubr.f32.gmra.mxu0 %v5254_v18  ;;  %1641 = vmatprep.subr.mxu1 %v5124_v16  ;;  %6637 = vst [vmem:[#allocation18_spill] sm:$0xff] %v5292_v26  ;;  %v909_v18 = vld [vmem:[#allocation7 + $0x478] sm:$0xff] }
 0x113   : > { %1129 = vmatprep.mubr.f32.mxu0 %v4993_v55  ;;  %1642 = vmatpush2.msra.mxu1 %v881_v45  ;;  %v878_v55 = vld [vmem:[#allocation7 + $0x380] sm:$0xff] }
 0x114   : > { %1350 = vmatmul.mubr.f32.gmra.mxu1 %v5281_v49  ;;  %1422 = vmatprep.subr.mxu0 %v5124_v16  ;;  %v4337_v45 = vld [vmem:[#allocation2 + $0x19] sm:$0xff] }
 0x115   : > { %1354 = vmatprep.mubr.f32.mxu1 %v5285_v57  ;;  %1643 = vmatprep.subr.mxu1 %v5124_v16  ;;  %v4338_v57 = vld [vmem:[#allocation2 + $0x31] sm:$0xff] }
 0x116   : > { %1130 = vmatmul.mubr.f32.gmra.mxu0 %v5265_v44  ;;  %1644 = vmatpush2.msra.mxu1 %v880_v50  ;;  %v908_v50 = vld [vmem:[#allocation7 + $0x470] sm:$0xff] }
 0x117   : > { %1423 = vmatpush2.msra.mxu0 %v846_v22  ;;  %1645 = vmatprep.subr.mxu1 %v5124_v16  ;;  %v4339_v22 = vld [vmem:[#allocation2 + $0x39] sm:$0xff] }
 0x118   : > { %1355 = vmatmul.mubr.f32.gmra.mxu1 %v5292_v26  ;;  %1424 = vmatprep.mubr.f32.mxu0 %v5000_v61  ;;  %v907_v26 = vld [vmem:[#allocation7 + $0x468] sm:$0xff] }
 0x119   : > { %1646 = vmatpush2.msra.mxu1 %v879_v5  ;;  %4104 = vmatprep.subr.mxu0 %v909_v18  ;;  %v4340_v61 = vld [vmem:[#allocation2 + $0x21] sm:$0xff] }
 0x11a   : > { %1425 = vmatmul.mubr.f32.vlgmr.msra.gmra.mxu0 %v4337_v45  ;;  %1647 = vmatprep.subr.mxu1 %v5124_v16  ;;  %v906_v5 = vld [vmem:[#allocation7 + $0x460] sm:$0xff] }
 0x11b   : > { %1648 = vmatpush2.msra.mxu1 %v878_v55  ;;  %1649 = vmatprep.mubr.f32.mxu1 %v4338_v57  ;;  %v4341_v55 = vld [vmem:[#allocation2 + $0x49] sm:$0xff]  ;;  %v4345_v45 = vld [vmem:[#allocation2 + $0x79] sm:$0xff] }
 0x11c   : > { %4105 = vmatpush3.msra.mxu0 %v909_v18  ;;  %1650 = vmatmul.mubr.f32.vlgmr.msra.gmra.mxu1 %v4990_v53  ;;  %v905_v18 = vld [vmem:[#allocation7 + $0x458] sm:$0xff]  ;;  %v904_v53 = vld [vmem:[#allocation7 + $0x450] sm:$0xff] }
 0x11d   : > { %1429 = vmatprep.mubr.f32.mxu0 %v5010_v6  ;;  %1654 = vmatprep.mubr.f32.mxu1 %v4339_v22  ;;  %v4342_v6 = vld [vmem:[#allocation2 + $0x51] sm:$0xff] }
 0x11e   : > { %1430 = vmatmul.mubr.f32.gmra.mxu0 %v4340_v61  ;;  %4106 = vmatprep.subr.mxu0 %v908_v50 }
 0x11f   : > { %1434 = vmatprep.mubr.f32.mxu0 %v5019_v9  ;;  %4107 = vmatpush3.msra.mxu0 %v908_v50  ;;  %v903_v9 = vld [vmem:[#allocation7 + $0x448] sm:$0xff] }
 0x120   : > { %1655 = vmatmul.mubr.f32.gmra.mxu1 %v5002_v62  ;;  %4108 = vmatprep.subr.mxu0 %v907_v26  ;;  %v902_v62 = vld [vmem:[#allocation7 + $0x440] sm:$0xff] }
 0x121   : > { %1659 = vmatprep.mubr.f32.mxu1 %v4341_v55  ;;  %4109 = vmatpush3.msra.mxu0 %v907_v26  ;;  %v4344_v26 = vld [vmem:[#allocation2 + $0x69] sm:$0xff]  ;;  %v4346_v50 = vld [vmem:[#allocation2 + $0x81] sm:$0xff] }
 0x122   : > { %1435 = vmatmul.mubr.f32.gmra.mxu0 %v4338_v57  ;;  %4110 = vmatprep.subr.mxu0 %v906_v5  ;;  %v4343_v57 = vld [vmem:[#allocation2 + $0x61] sm:$0xff] }
 0x123   : > { %1439 = vmatprep.mubr.f32.mxu0 %v5029_v13  ;;  %4111 = vmatpush3.msra.mxu0 %v906_v5  ;;  %v901_v13 = vld [vmem:[#allocation7 + $0x438] sm:$0xff] }
 0x124   : > { %1660 = vmatmul.mubr.f32.gmra.mxu1 %v5012_v7  ;;  %4112 = vmatprep.subr.mxu0 %v905_v18  ;;  %v900_v7 = vld [vmem:[#allocation7 + $0x430] sm:$0xff] }
 0x125   : > { %1664 = vmatprep.mubr.f32.mxu1 %v4342_v6  ;;  %4113 = vmatpush3.msra.mxu0 %v905_v18 }
 0x126   : > { %1440 = vmatmul.mubr.f32.gmra.mxu0 %v4339_v22  ;;  %4114 = vmatprep.subr.mxu0 %v904_v53  ;;  %v4347_v22 = vld [vmem:[#allocation2 + $0x91] sm:$0xff] }
 0x127   : > { %1444 = vmatprep.mubr.f32.mxu0 %v5039_v17  ;;  %4115 = vmatpush3.msra.mxu0 %v904_v53  ;;  %v899_v17 = vld [vmem:[#allocation7 + $0x428] sm:$0xff] }
 0x128   : > { %1665 = vmatmul.mubr.f32.gmra.mxu1 %v5022_v11  ;;  %4116 = vmatprep.subr.mxu0 %v903_v9  ;;  %v898_v11 = vld [vmem:[#allocation7 + $0x420] sm:$0xff] }
 0x129   : > { %1669 = vmatprep.mubr.f32.mxu1 %v4343_v57  ;;  %4117 = vmatpush3.msra.mxu0 %v903_v9 }
 0x12a   : > { %1445 = vmatmul.mubr.f32.gmra.mxu0 %v4341_v55  ;;  %4118 = vmatprep.subr.mxu0 %v902_v62 }
 0x12b   : > { %1449 = vmatprep.mubr.f32.mxu0 %v5049_v23  ;;  %4119 = vmatpush3.msra.mxu0 %v902_v62  ;;  %v897_v23 = vld [vmem:[#allocation7 + $0x418] sm:$0xff] }
 0x12c   : > { %1670 = vmatmul.mubr.f32.gmra.mxu1 %v5032_v14  ;;  %4120 = vmatprep.subr.mxu0 %v901_v13  ;;  %v896_v14 = vld [vmem:[#allocation7 + $0x410] sm:$0xff] }
 0x12d   : > { %1674 = vmatprep.mubr.f32.mxu1 %v4344_v26  ;;  %4121 = vmatpush3.msra.mxu0 %v901_v13 }
 0x12e   : > { %1450 = vmatmul.mubr.f32.gmra.mxu0 %v4342_v6  ;;  %4122 = vmatprep.subr.mxu0 %v900_v7 }
 0x12f   : > { %1454 = vmatprep.mubr.f32.mxu0 %v5059_v29  ;;  %4123 = vmatpush3.msra.mxu0 %v900_v7  ;;  %v895_v29 = vld [vmem:[#allocation7 + $0x408] sm:$0xff] }
 0x130   : > { %1675 = vmatmul.mubr.f32.gmra.mxu1 %v5042_v19  ;;  %4124 = vmatprep.subr.mxu0 %v899_v17  ;;  %v894_v19 = vld [vmem:[#allocation7 + $0x400] sm:$0xff] }
 0x131   : > { %1679 = vmatprep.mubr.f32.mxu1 %v4345_v45  ;;  %4125 = vmatpush3.msra.mxu0 %v899_v17 }
 0x132   : > { %1455 = vmatmul.mubr.f32.gmra.mxu0 %v4343_v57  ;;  %4126 = vmatprep.subr.mxu0 %v898_v11  ;;  %v2481_v57 = vld [vmem:[#allocation9 + $0x70] sm:$0xff] }
 0x133   : > { %1459 = vmatprep.mubr.f32.mxu0 %v5069_v39  ;;  %4127 = vmatpush3.msra.mxu0 %v898_v11  ;;  %v4350_v39 = vld [vmem:[#allocation2 + $0xb1] sm:$0xff]  ;;  %v2480_v11 = vld [vmem:[#allocation9 + $0x68] sm:$0xff] }
 0x134   : > { %1680 = vmatmul.mubr.f32.gmra.mxu1 %v5052_v24  ;;  %4128 = vmatprep.subr.mxu0 %v897_v23  ;;  %v4348_v24 = vld [vmem:[#allocation2 + $0x99] sm:$0xff] }
 0x135   : > { %1684 = vmatprep.mubr.f32.mxu1 %v4346_v50  ;;  %4129 = vmatpush3.msra.mxu0 %v897_v23 }
 0x136   : > { %1460 = vmatmul.mubr.f32.gmra.mxu0 %v4344_v26  ;;  %4130 = vmatprep.subr.mxu0 %v896_v14 }
 0x137   : > { %1464 = vmatprep.mubr.f32.mxu0 %v5079_v47  ;;  %4131 = vmatpush3.msra.mxu0 %v896_v14  ;;  %v4352_v47 = vld [vmem:[#allocation2 + $0xc9] sm:$0xff] }
 0x138   : > { %1685 = vmatmul.mubr.f32.gmra.mxu1 %v5062_v30  ;;  %4132 = vmatprep.subr.mxu0 %v895_v29  ;;  %v4349_v30 = vld [vmem:[#allocation2 + $0xa9] sm:$0xff] }
 0x139   : > { %1689 = vmatprep.mubr.f32.mxu1 %v4347_v22  ;;  %4133 = vmatpush3.msra.mxu0 %v895_v29  ;;  %v2479_v29 = vld [vmem:[#allocation9 + $0x60] sm:$0xff] }
 0x13a   : > { %1465 = vmatmul.mubr.f32.gmra.mxu0 %v4345_v45  ;;  %4134 = vmatprep.subr.mxu0 %v894_v19 }
 0x13b   : > { %1469 = vmatprep.mubr.f32.mxu0 %v5089_v41  ;;  %4135 = vmatpush3.msra.mxu0 %v894_v19  ;;  %v4354_v41 = vld [vmem:[#allocation2 + $0xe1] sm:$0xff] }
 0x13c   : > { %1690 = vmatmul.mubr.f32.gmra.mxu1 %v5072_v40  ;;  %2611 = vmatprep.subr.mxu1 %v5124_v16  ;;  %v4351_v40 = vld [vmem:[#allocation2 + $0xc1] sm:$0xff] }
 0x13d   : > { %1694 = vmatprep.mubr.f32.mxu1 %v4348_v24  ;;  %2836 = vmatprep.subr.mxu0 %v5124_v16 }
 0x13e   : > { %1470 = vmatmul.mubr.f32.gmra.mxu0 %v4346_v50 }
 0x13f   : > { %1474 = vmatprep.mubr.f32.mxu0 %v5099_v58 }
 0x140   : > { %1695 = vmatmul.mubr.f32.gmra.mxu1 %v5083_v48  ;;  %v4353_v48 = vld [vmem:[#allocation2 + $0xd9] sm:$0xff] }
 0x141   : > { %1699 = vmatprep.mubr.f32.mxu1 %v4349_v30 }
 0x142   : > { %1475 = vmatmul.mubr.f32.gmra.mxu0 %v4347_v22 }
 0x143   : > { %1479 = vmatprep.mubr.f32.mxu0 %v5109_v3 }
 0x144   : > { %1700 = vmatmul.mubr.f32.gmra.mxu1 %v5092_v54  ;;  %v4355_v54 = vld [vmem:[#allocation2 + $0xf1] sm:$0xff] }
 0x145   : > { %1704 = vmatprep.mubr.f32.mxu1 %v4350_v39 }
 0x146   : > { %1480 = vmatmul.mubr.f32.gmra.mxu0 %v4348_v24 }
 0x147   : > { %1484 = vmatprep.mubr.f32.mxu0 %v5119_v46  ;;  %v4356_v46 = vld [vmem:[#allocation2 + $0xf9] sm:$0xff] }
 0x148   : > { %1705 = vmatmul.mubr.f32.gmra.mxu1 %v5102_v2 }
 0x149   : > { %1709 = vmatprep.mubr.f32.mxu1 %v4351_v40 }
 0x14a   : > { %1485 = vmatmul.mubr.f32.gmra.mxu0 %v4349_v30 }
 0x14b   : > { %1489 = vmatprep.mubr.f32.mxu0 %v5131_v32 }
 0x14c   : > { %1710 = vmatmul.mubr.f32.gmra.mxu1 %v5113_v8 }
 0x14d   : > { %1714 = vmatprep.mubr.f32.mxu1 %v4352_v47 }
 0x14e   : > { %1490 = vmatmul.mubr.f32.gmra.mxu0 %v4350_v39  ;;  %v2478_v39 = vld [vmem:[#allocation9 + $0x58] sm:$0xff] }
 0x14f   : > { %1494 = vmatprep.mubr.f32.mxu0 %v5141_v25 }
 0x150   : > { %1715 = vmatmul.mubr.f32.gmra.mxu1 %v5122_v31 }
 0x151   : > { %1719 = vmatprep.mubr.f32.mxu1 %v4353_v48 }
 0x152   : > { %1495 = vmatmul.mubr.f32.gmra.mxu0 %v4351_v40 }
 0x153   : > { %1499 = vmatprep.mubr.f32.mxu0 %v5151_v59  ;;  %v4357_v59 = vld [vmem:[#allocation2 + $0x109] sm:$0xff] }
 0x154   : > { %1720 = vmatmul.mubr.f32.gmra.mxu1 %v5134_v20 }
 0x155   : > { %1724 = vmatprep.mubr.f32.mxu1 %v4354_v41 }
 0x156   : > { %1500 = vmatmul.mubr.f32.gmra.mxu0 %v4352_v47 }
 0x157   : > { %1504 = vmatprep.mubr.f32.mxu0 %v5161_v51 }
 0x158   : > { %1725 = vmatmul.mubr.f32.gmra.mxu1 %v5145_v36 }
 0x159   : > { %1729 = vmatprep.mubr.f32.mxu1 %v4355_v54 }
 0x15a   : > { %v976_v58 = vpop.f32.mrf.mxu0  ;;  %1505 = vmatmul.mubr.f32.gmra.mxu0 %v4353_v48 }
 0x15b   : > { %1509 = vmatprep.mubr.f32.mxu0 %v5171_v42 }
 0x15c   : > { %v1201_v2 = vpop.f32.mrf.mxu1  ;;  %v978_v3 = vpop.f32.mrf.mxu0  ;;  %1730 = vmatmul.mubr.f32.gmra.mxu1 %v5154_v38 }
 0x15d   : > { %v5335_v8 = vadd.f32 %v1201_v2, %v976_v58  ;;  %1734 = vmatprep.mubr.f32.mxu1 %v4356_v46  ;;  %v6638_v2 = vld [vmem:[#allocation14_spill] sm:$0xff] }
 0x15e   : > { %v1203_v31 = vpop.f32.mrf.mxu1  ;;  %v981_v32 = vpop.f32.mrf.mxu0  ;;  %1510 = vmatmul.mubr.f32.gmra.mxu0 %v4354_v41 }
 0x15f   : > { %1514 = vmatprep.mubr.f32.mxu0 %v5181_v1  ;;  %v4358_v1 = vld [vmem:[#allocation2 + $0x111] sm:$0xff] }
 0x160   : > { %v1206_v20 = vpop.f32.mrf.mxu1  ;;  %v983_v25 = vpop.f32.mrf.mxu0  ;;  %1735 = vmatmul.mubr.f32.gmra.mxu1 %v5164_v52  ;;  %v2482_v52 = vld [vmem:[#allocation9 + $0x78] sm:$0xff] }
 0x161   : > { %v5339_v36 = vadd.f32 %v1206_v20, %v981_v32  ;;  %1739 = vmatprep.mubr.f32.mxu1 %v4357_v59  ;;  %2612 = vmatpush1.msra.mxu1 %v2482_v52  ;;  %v2476_v32 = vld [vmem:[#allocation9 + $0x48] sm:$0xff] }
 0x162   : > { %v1208_v51 = vpop.f32.mrf.mxu1  ;;  %v986_v42 = vpop.f32.mrf.mxu0  ;;  %1515 = vmatmul.mubr.f32.gmra.mxu0 %v4355_v54  ;;  %2613 = vmatprep.subr.mxu1 %v5124_v16  ;;  %v2477_v54 = vld [vmem:[#allocation9 + $0x50] sm:$0xff] }
 0x163   : > { %1519 = vmatprep.mubr.f32.mxu0 %v5191_v0  ;;  %v4359_v0 = vld [vmem:[#allocation2 + $0x121] sm:$0xff]  ;;  %2614 = vmatpush1.msra.mxu1 %v2481_v57 }
 0x164   : > { %v1211_v38 = vpop.f32.mrf.mxu1  ;;  %v988_v61 = vpop.f32.mrf.mxu0  ;;  %1740 = vmatmul.mubr.f32.gmra.mxu1 %v5175_v43  ;;  %2615 = vmatprep.subr.mxu1 %v5124_v16 }
 0x165   : > { %v5343_v5 = vadd.f32 %v1211_v38, %v986_v42  ;;  %1744 = vmatprep.mubr.f32.mxu1 %v4358_v1  ;;  %2616 = vmatpush1.msra.mxu1 %v2480_v11  ;;  %v2475_v38 = vld [vmem:[#allocation9 + $0x40] sm:$0xff]  ;;  %v4368_v11 = vld [vmem:[#allocation2 + $0x189] sm:$0xff] }
 0x166   : > { %v1213_v55 = vpop.f32.mrf.mxu1  ;;  %v991_v18 = vpop.f32.mrf.mxu0  ;;  %1520 = vmatmul.mubr.f32.gmra.mxu0 %v4356_v46  ;;  %2617 = vmatprep.subr.mxu1 %v5124_v16 }
 0x167   : > { %1524 = vmatprep.mubr.f32.mxu0 %v5201_v34  ;;  %2618 = vmatpush1.msra.mxu1 %v2479_v29 }
 0x168   : > { %v1216_v53 = vpop.f32.mrf.mxu1  ;;  %v993_v6 = vpop.f32.mrf.mxu0  ;;  %1745 = vmatmul.mubr.f32.gmra.mxu1 %v5184_v12  ;;  %v4360_v12 = vld [vmem:[#allocation2 + $0x129] sm:$0xff]  ;;  %2619 = vmatprep.subr.mxu1 %v5124_v16 }
 0x169   : > { %v5347_v9 = vadd.f32 %v1216_v53, %v991_v18  ;;  %1749 = vmatprep.mubr.f32.mxu1 %v4359_v0  ;;  %2620 = vmatpush1.msra.mxu1 %v2478_v39  ;;  %v2474_v53 = vld [vmem:[#allocation9 + $0x38] sm:$0xff] }
 0x16a   : > { %v1218_v43 = vpop.f32.mrf.mxu1  ;;  %v996_v62 = vpop.f32.mrf.mxu0  ;;  %1525 = vmatmul.mubr.f32.gmra.mxu0 %v4357_v59  ;;  %2621 = vmatprep.subr.mxu1 %v5124_v16  ;;  %v4365_v59 = vld [vmem:[#allocation2 + $0x169] sm:$0xff] }
 0x16b   : > { %1529 = vmatprep.mubr.f32.mxu0 %v5211_v10  ;;  %2622 = vmatpush1.msra.mxu1 %v2477_v54  ;;  %v4367_v43 = vld [vmem:[#allocation2 + $0x181] sm:$0xff] }
 0x16c   : > { %v1221_v13 = vpop.f32.mrf.mxu1  ;;  %v998_v34 = vpop.f32.mrf.mxu0  ;;  %1750 = vmatmul.mubr.f32.gmra.mxu1 %v5194_v56  ;;  %v4361_v56 = vld [vmem:[#allocation2 + $0x139] sm:$0xff]  ;;  %2623 = vmatprep.subr.mxu1 %v5124_v16 }
 0x16d   : > { %v5352_v7 = vadd.f32 %v1221_v13, %v996_v62  ;;  %1754 = vmatprep.mubr.f32.mxu1 %v4360_v12  ;;  %2624 = vmatpush1.msra.mxu1 %v2476_v32  ;;  %v6640_v13 = vld [vmem:[#allocation18_spill] sm:$0xff]  ;;  %v2473_v34 = vld [vmem:[#allocation9 + $0x30] sm:$0xff]  ;;  %v5408_v32 = vld [vmem:[#allocation2 + $0x8] sm:$0xff] }
 0x16e   : > { %v1223_v26 = vpop.f32.mrf.mxu1  ;;  %v1001_v17 = vpop.f32.mrf.mxu0  ;;  %1530 = vmatmul.mubr.f32.gmra.mxu0 %v4358_v1  ;;  %2625 = vmatprep.subr.mxu1 %v5124_v16  ;;  %v6639_v1 = vld [vmem:[#allocation15_spill] sm:$0xff] }
 0x16f   : > { %1534 = vmatprep.mubr.f32.mxu0 %v5221_v27  ;;  %2626 = vmatpush1.msra.mxu1 %v2475_v38  ;;  %v6641_v26 = vld [vmem:[#allocation16_spill] sm:$0xff] }
 0x170   : > { %v1226_v45 = vpop.f32.mrf.mxu1  ;;  %v1003_v10 = vpop.f32.mrf.mxu0  ;;  %1755 = vmatmul.mubr.f32.gmra.mxu1 %v5205_v37  ;;  %v4362_v37 = vld [vmem:[#allocation2 + $0x141] sm:$0xff]  ;;  %2627 = vmatprep.subr.mxu1 %v5124_v16 }
 0x171   : > { %v5357_v23 = vadd.f32 %v1226_v45, %v1001_v17  ;;  %1759 = vmatprep.mubr.f32.mxu1 %v4361_v56  ;;  %2628 = vmatpush1.msra.mxu1 %v2474_v53  ;;  %v5392_v17 = vld [vmem:[#allocation2 + $0x182] sm:$0xff] }
 0x172   : > { %v1228_v14 = vpop.f32.mrf.mxu1  ;;  %v1006_v50 = vpop.f32.mrf.mxu0  ;;  %1535 = vmatmul.mubr.f32.gmra.mxu0 %v4359_v0  ;;  %2629 = vmatprep.subr.mxu1 %v5124_v16  ;;  %v2468_v53 = vld [vmem:[#allocation9 + $0x8] sm:$0xff] }
 0x173   : > { %1539 = vmatprep.mubr.f32.mxu0 %v5231_v4  ;;  %2630 = vmatpush1.msra.mxu1 %v2473_v34  ;;  %v2472_v14 = vld [vmem:[#allocation9 + $0x28] sm:$0xff] }
 0x174   : > { %v1231_v19 = vpop.f32.mrf.mxu1  ;;  %v1008_v27 = vpop.f32.mrf.mxu0  ;;  %1760 = vmatmul.mubr.f32.gmra.mxu1 %v5214_v63  ;;  %v4363_v63 = vld [vmem:[#allocation2 + $0x151] sm:$0xff]  ;;  %2631 = vmatprep.subr.mxu1 %v5124_v16  ;;  %v741_v34 = vld [vmem:[#allocation2 + $0x82] sm:$0xff] }
 0x175   : > { %v5362_v22 = vadd.f32 %v1231_v19, %v1006_v50  ;;  %1764 = vmatprep.mubr.f32.mxu1 %v4362_v37  ;;  %v6642_v19 = vld [vmem:[#allocation17_spill] sm:$0xff]  ;;  %v5399_v27 = vld [vmem:[#allocation2 + $0x18a] sm:$0xff]  ;;  %2632 = vmatpush1.msra.mxu1 %v2472_v14 }
 0x176   : > { %v1233_v24 = vpop.f32.mrf.mxu1  ;;  %v1011_v30 = vpop.f32.mrf.mxu0  ;;  %1540 = vmatmul.mubr.f32.gmra.mxu0 %v4360_v12  ;;  %2633 = vmatprep.subr.mxu1 %v5124_v16  ;;  %v743_v14 = vld [vmem:[#allocation2 + $0x9a] sm:$0xff] }
 0x177   : > { %1544 = vmatprep.mubr.f32.mxu0 %v5241_v21  ;;  %v700_v24 = vld [vmem:[#allocation2 + $0x198] sm:$0xff] }
 0x178   : > { %v1236_v40 = vpop.f32.mrf.mxu1  ;;  %v1013_v4 = vpop.f32.mrf.mxu0  ;;  %1765 = vmatmul.mubr.f32.gmra.mxu1 %v5224_v28  ;;  %v4364_v28 = vld [vmem:[#allocation2 + $0x159] sm:$0xff] }
 0x179   : > { %v5367_v47 = vadd.f32 %v1236_v40, %v1011_v30  ;;  %1769 = vmatprep.mubr.f32.mxu1 %v4363_v63  ;;  %v733_v40 = vld [vmem:[#allocation2 + $0x1a1] sm:$0xff] }
 0x17a   : > { %v1238_v48 = vpop.f32.mrf.mxu1  ;;  %v1016_v41 = vpop.f32.mrf.mxu0  ;;  %1545 = vmatmul.mubr.f32.gmra.mxu0 %v4361_v56  ;;  %v732_v56 = vld [vmem:[#allocation2 + $0x199] sm:$0xff] }
 0x17b   : > { %1549 = vmatprep.mubr.f32.mxu0 %v5251_v15  ;;  %v2471_v4 = vld [vmem:[#allocation9 + $0x20] sm:$0xff] }
 0x17c   : > { %v1241_v58 = vpop.f32.mrf.mxu1  ;;  %v1018_v21 = vpop.f32.mrf.mxu0  ;;  %1770 = vmatmul.mubr.f32.gmra.mxu1 %v6638_v2  ;;  %v735_v2 = vld [vmem:[#allocation2 + $0x3a] sm:$0xff] }
 0x17d   : > { %v5372_v3 = vadd.f32 %v1241_v58, %v1016_v41  ;;  %1774 = vmatprep.mubr.f32.mxu1 %v4364_v28  ;;  %v734_v41 = vld [vmem:[#allocation2 + $0x32] sm:$0xff]  ;;  %2634 = vmatpush1.msra.mxu1 %v2471_v4 }
 0x17e   : > { %v1243_v46 = vpop.f32.mrf.mxu1  ;;  %v1021_v31 = vpop.f32.mrf.mxu0  ;;  %1550 = vmatmul.mubr.f32.gmra.mxu0 %v4362_v37  ;;  %2635 = vmatprep.subr.mxu1 %v5124_v16  ;;  %v737_v16 = vld [vmem:[#allocation2 + $0x52] sm:$0xff] }
 0x17f   : > { %1554 = vmatprep.mubr.f32.mxu0 %v5261_v33  ;;  %v745_v4 = vld [vmem:[#allocation2 + $0xb2] sm:$0xff] }
 0x180   : > { %v1246_v20 = vpop.f32.mrf.mxu1  ;;  %v1023_v15 = vpop.f32.mrf.mxu0  ;;  %1775 = vmatmul.mubr.f32.gmra.mxu1 %v5244_v60  ;;  %v4366_v60 = vld [vmem:[#allocation2 + $0x171] sm:$0xff] }
 0x181   : > { %v5377_v25 = vadd.f32 %v1246_v20, %v1021_v31  ;;  %1779 = vmatprep.mubr.f32.mxu1 %v4365_v59  ;;  %v736_v20 = vld [vmem:[#allocation2 + $0x4a] sm:$0xff] }
 0x182   : > { %v1248_v51 = vpop.f32.mrf.mxu1  ;;  %v1026_v42 = vpop.f32.mrf.mxu0  ;;  %1555 = vmatmul.mubr.f32.gmra.mxu0 %v4363_v63 }
 0x183   : > { %1559 = vmatprep.mubr.f32.mxu0 %v5271_v35 }
 0x184   : > { %v1251_v61 = vpop.f32.mrf.mxu1  ;;  %v1028_v33 = vpop.f32.mrf.mxu0  ;;  %1780 = vmatmul.mubr.f32.gmra.mxu1 %v6639_v1 }
 0x185   : > { %v5382_v55 = vadd.f32 %v1251_v61, %v1026_v42  ;;  %1784 = vmatprep.mubr.f32.mxu1 %v4366_v60  ;;  %v2469_v42 = vld [vmem:[#allocation9 + $0x10] sm:$0xff]  ;;  %v738_v33 = vld [vmem:[#allocation2 + $0x62] sm:$0xff] }
 0x186   : > { %v1253_v18 = vpop.f32.mrf.mxu1  ;;  %v1031_v52 = vpop.f32.mrf.mxu0  ;;  %1560 = vmatmul.mubr.f32.gmra.mxu0 %v4364_v28  ;;  %v2470_v28 = vld [vmem:[#allocation9 + $0x18] sm:$0xff] }
 0x187   : > { %1564 = vmatprep.mubr.f32.mxu0 %v5281_v49  ;;  %2636 = vmatpush1.msra.mxu1 %v2470_v28 }
 0x188   : > { %v1256_v6 = vpop.f32.mrf.mxu1  ;;  %v1033_v35 = vpop.f32.mrf.mxu0  ;;  %1785 = vmatmul.mubr.f32.gmra.mxu1 %v5265_v44  ;;  %2637 = vmatprep.subr.mxu1 %v5408_v32 }
 0x189   : > { %v5387_v0 = vadd.f32 %v1256_v6, %v1031_v52  ;;  %1789 = vmatprep.mubr.f32.mxu1 %v4367_v43  ;;  %2638 = vmatpush1.msra.mxu1 %v2469_v42  ;;  %v739_v52 = vld [vmem:[#allocation2 + $0x6a] sm:$0xff] }
 0x18a   : > { %v1258_v62 = vpop.f32.mrf.mxu1  ;;  %v1036_v57 = vpop.f32.mrf.mxu0  ;;  %1565 = vmatmul.mubr.f32.gmra.mxu0 %v4365_v59  ;;  %2639 = vmatprep.subr.mxu1 %v5408_v32 }
 0x18b   : > { %1569 = vmatprep.mubr.f32.mxu0 %v6640_v13  ;;  %2640 = vmatpush1.msra.mxu1 %v2468_v53 }
 0x18c   : > { %v1261_v12 = vpop.f32.mrf.mxu1  ;;  %v1038_v49 = vpop.f32.mrf.mxu0  ;;  %1790 = vmatmul.mubr.f32.gmra.mxu1 %v6641_v26  ;;  %2641 = vmatprep.subr.mxu1 %v5408_v32 }
 0x18d   : > { %v5394_v44 = vadd.f32 %v1261_v12, %v1036_v57  ;;  %1794 = vmatprep.mubr.f32.mxu1 %v4368_v11  ;;  %v2467_v12 = vld [vmem:[#allocation9] sm:$0xff] }
 0x18e   : > { %v1263_v45 = vpop.f32.mrf.mxu1  ;;  %v1041_v10 = vpop.f32.mrf.mxu0  ;;  %1570 = vmatmul.mubr.f32.gmra.mxu0 %v4366_v60  ;;  %2642 = vmatpush1.msra.mxu1 %v2467_v12  ;;  %v751_v12 = vld [vmem:[#allocation2 + $0xfa] sm:$0xff] }
 0x18f   : > { %1574 = vmatprep.mubr.f32.mxu0 %v5392_v17  ;;  %2643 = vmatprep.subr.mxu1 %v5408_v32 }
 0x190   : > { %v1266_v50 = vpop.f32.mrf.mxu1  ;;  %v1043_v29 = vpop.f32.mrf.mxu0  ;;  %1795 = vmatmul.mubr.f32.gmra.mxu1 %v6642_v19 }
 0x191   : > { %v5401_v37 = vadd.f32 %v1266_v50, %v1041_v10  ;;  %1799 = vmatprep.mubr.f32.mxu1 %v732_v56  ;;  %v2498_v50 = vld [vmem:[#allocation9 + $0xf8] sm:$0xff] }
 0x192   : > { %v1268_v30 = vpop.f32.mrf.mxu1  ;;  %v1046_v39 = vpop.f32.mrf.mxu0  ;;  %1575 = vmatmul.mubr.f32.gmra.mxu0 %v4367_v43  ;;  %v740_v43 = vld [vmem:[#allocation2 + $0x7a] sm:$0xff]  ;;  %2644 = vmatpush2.msra.mxu1 %v2498_v50  ;;  %v2509_v50 = vld [vmem:[#allocation9 + $0x150] sm:$0xff] }
 0x193   : > { %1579 = vmatprep.mubr.f32.mxu0 %v5399_v27  ;;  %2645 = vmatprep.subr.mxu1 %v5408_v32 }
 0x194   : > { %v1271_v63 = vpop.f32.mrf.mxu1  ;;  %v1048_v48 = vpop.f32.mrf.mxu0  ;;  %1800 = vmatmul.mubr.f32.gmra.mxu1 %v700_v24  ;;  %v744_v24 = vld [vmem:[#allocation2 + $0xaa] sm:$0xff] }
 0x195   : > { %v5405_v54 = vadd.f32 %v1271_v63, %v1046_v39  ;;  %1804 = vmatprep.mubr.f32.mxu1 %v733_v40  ;;  %v2497_v63 = vld [vmem:[#allocation9 + $0xf0] sm:$0xff] }
 0x196   : > { %v1273_v58 = vpop.f32.mrf.mxu1  ;;  %v1051_v21 = vpop.f32.mrf.mxu0  ;;  %1580 = vmatmul.mubr.f32.gmra.mxu0 %v4368_v11  ;;  %v742_v11 = vld [vmem:[#allocation2 + $0x92] sm:$0xff]  ;;  %2646 = vmatpush2.msra.mxu1 %v2497_v63 }
 0x197   : > { %4136 = vmatprep.mubr.f32.mxu0 %v734_v41  ;;  %v746_v58 = vld [vmem:[#allocation2 + $0xc2] sm:$0xff]  ;;  %2647 = vmatprep.subr.mxu1 %v5408_v32 }
 0x198   : > { %v1276_v46 = vpop.f32.mrf.mxu1  ;;  %v1053_v31 = vpop.f32.mrf.mxu0  ;;  %1805 = vmatmul.mubr.f32.gmra.mxu1 %v5408_v32 }
 0x199   : > { %v5411_v15 = vadd.f32 %v1276_v46, %v1051_v21  ;;  %v747_v46 = vld [vmem:[#allocation2 + $0xca] sm:$0xff] }
 0x19a   : > { %v1278_v59 = vpop.f32.mrf.mxu1  ;;  %v1056_v51 = vpop.f32.mrf.mxu0  ;;  %4137 = vmatmul.mubr.f32.vlgmr.msra.gmra.mxu0 %v735_v2  ;;  %v2496_v31 = vld [vmem:[#allocation9 + $0xe8] sm:$0xff] }
 0x19b   : > { %4139 = vmatprep.mubr.f32.mxu0 %v736_v20  ;;  %v2514_v20 = vld [vmem:[#allocation9 + $0x178] sm:$0xff]  ;;  %2648 = vmatpush2.msra.mxu1 %v2496_v31  ;;  %v2492_v31 = vld [vmem:[#allocation9 + $0xc8] sm:$0xff] }
 0x19c   : > { %v1281_v38 = vpop.f32.mrf.mxu1  ;;  %v1058_v61 = vpop.f32.mrf.mxu0  ;;  %2837 = vmatpush1.msra.mxu0 %v2514_v20  ;;  %2649 = vmatprep.subr.mxu1 %v5408_v32  ;;  %v2506_v20 = vld [vmem:[#allocation9 + $0x138] sm:$0xff] }
 0x19d   : > { %v5414_v1 = vadd.f32 %v1281_v38, %v1056_v51  ;;  %2838 = vmatprep.subr.mxu0 %v5408_v32  ;;  %v2513_v38 = vld [vmem:[#allocation9 + $0x170] sm:$0xff] }
 0x19e   : > { %v1283_v60 = vpop.f32.mrf.mxu1  ;;  %v1061_v18 = vpop.f32.mrf.mxu0  ;;  %4140 = vmatmul.mubr.f32.gmra.mxu0 %v737_v16  ;;  %v748_v16 = vld [vmem:[#allocation2 + $0xda] sm:$0xff] }
 0x19f   : > { %4142 = vmatprep.mubr.f32.mxu0 %v738_v33  ;;  %v749_v60 = vld [vmem:[#allocation2 + $0xe2] sm:$0xff]  ;;  %2839 = vmatpush1.msra.mxu0 %v2513_v38 }
 0x1a0   : > { %v1286_v6 = vpop.f32.mrf.mxu1  ;;  %v1063_v35 = vpop.f32.mrf.mxu0  ;;  %2840 = vmatprep.subr.mxu0 %v5408_v32 }
 0x1a1   : > { %v5417_v62 = vadd.f32 %v1286_v6, %v1061_v18  ;;  %v2495_v18 = vld [vmem:[#allocation9 + $0xe0] sm:$0xff]  ;;  %v750_v35 = vld [vmem:[#allocation2 + $0xf2] sm:$0xff] }
 0x1a2   : > { %v1288_v57 = vpop.f32.mrf.mxu1  ;;  %v1066_v13 = vpop.f32.mrf.mxu0  ;;  %4143 = vmatmul.mubr.f32.gmra.mxu0 %v739_v52  ;;  %v2512_v52 = vld [vmem:[#allocation9 + $0x168] sm:$0xff]  ;;  %2650 = vmatpush2.msra.mxu1 %v2495_v18 }
 0x1a3   : > { %4145 = vmatprep.mubr.f32.mxu0 %v740_v43  ;;  %2841 = vmatpush1.msra.mxu0 %v2512_v52  ;;  %v2511_v57 = vld [vmem:[#allocation9 + $0x160] sm:$0xff] }
 0x1a4   : > { %v1291_v49 = vpop.f32.mrf.mxu1  ;;  %v1068_v26 = vpop.f32.mrf.mxu0  ;;  %2651 = vmatprep.subr.mxu1 %v5408_v32  ;;  %2842 = vmatprep.subr.mxu0 %v5408_v32  ;;  %v757_v18 = vld [vmem:[#allocation2 + $0x142] sm:$0xff] }
 0x1a5   : > { %v5420_v45 = vadd.f32 %v1291_v49, %v1066_v13  ;;  %2843 = vmatpush1.msra.mxu0 %v2511_v57  ;;  %v2494_v49 = vld [vmem:[#allocation9 + $0xd8] sm:$0xff]  ;;  %v2491_v52 = vld [vmem:[#allocation9 + $0xc0] sm:$0xff] }
 0x1a6   : > { %v1293_v10 = vpop.f32.mrf.mxu1  ;;  %v1071_v56 = vpop.f32.mrf.mxu0  ;;  %4146 = vmatmul.mubr.f32.gmra.mxu0 %v741_v34  ;;  %v2510_v26 = vld [vmem:[#allocation9 + $0x158] sm:$0xff]  ;;  %2844 = vmatprep.subr.mxu0 %v5408_v32 }
 0x1a7   : > { %4148 = vmatprep.mubr.f32.mxu0 %v742_v11  ;;  %2652 = vmatpush2.msra.mxu1 %v2494_v49  ;;  %v758_v57 = vld [vmem:[#allocation2 + $0x152] sm:$0xff] }
 0x1a8   : > { %v1296_v29 = vpop.f32.mrf.mxu1  ;;  %v1073_v19 = vpop.f32.mrf.mxu0  ;;  %2845 = vmatpush1.msra.mxu0 %v2510_v26  ;;  %2653 = vmatprep.subr.mxu1 %v5408_v32  ;;  %v759_v26 = vld [vmem:[#allocation2 + $0x15a] sm:$0xff] }
 0x1a9   : > { %v5423_v30 = vadd.f32 %v1296_v29, %v1071_v56  ;;  %v752_v56 = vld [vmem:[#allocation2 + $0x10a] sm:$0xff]  ;;  %2846 = vmatprep.subr.mxu0 %v5408_v32 }
 0x1aa   : > { %v1298_v39 = vpop.f32.mrf.mxu1  ;;  %v1076_v40 = vpop.f32.mrf.mxu0  ;;  %4149 = vmatmul.mubr.f32.gmra.mxu0 %v743_v14 }
 0x1ab   : > { %4151 = vmatprep.mubr.f32.mxu0 %v744_v24  ;;  %v753_v24 = vld [vmem:[#allocation2 + $0x112] sm:$0xff]  ;;  %2847 = vmatpush1.msra.mxu0 %v2509_v50 }
 0x1ac   : > { %v1301_v48 = vpop.f32.mrf.mxu1  ;;  %v1078_v41 = vpop.f32.mrf.mxu0  ;;  %v2493_v39 = vld [vmem:[#allocation9 + $0xd0] sm:$0xff]  ;;  %2848 = vmatprep.subr.mxu0 %v5408_v32 }
 0x1ad   : > { %v5426_v21 = vadd.f32 %v1301_v48, %v1076_v40  ;;  %v2508_v40 = vld [vmem:[#allocation9 + $0x148] sm:$0xff]  ;;  %2654 = vmatpush2.msra.mxu1 %v2493_v39 }
 0x1ae   : > { %v1303_v2 = vpop.f32.mrf.mxu1  ;;  %v1081_v28 = vpop.f32.mrf.mxu0  ;;  %4152 = vmatmul.mubr.f32.gmra.mxu0 %v745_v4  ;;  %v754_v48 = vld [vmem:[#allocation2 + $0x122] sm:$0xff]  ;;  %2655 = vmatprep.subr.mxu1 %v5408_v32 }
 0x1af   : > { %4154 = vmatprep.mubr.f32.mxu0 %v746_v58  ;;  %2849 = vmatpush1.msra.mxu0 %v2508_v40  ;;  %v2507_v58 = vld [vmem:[#allocation9 + $0x140] sm:$0xff] }
 0x1b0   : > { %v1306_v59 = vpop.f32.mrf.mxu1  ;;  %v1083_v51 = vpop.f32.mrf.mxu0  ;;  %2850 = vmatprep.subr.mxu0 %v5408_v32  ;;  %2656 = vmatpush2.msra.mxu1 %v2492_v31 }
 0x1b1   : > { %v5429_v42 = vadd.f32 %v1306_v59, %v1081_v28  ;;  %2851 = vmatpush1.msra.mxu0 %v2507_v58  ;;  %2657 = vmatprep.subr.mxu1 %v5408_v32 }
 0x1b2   : > { %v1308_v61 = vpop.f32.mrf.mxu1  ;;  %v1086_v33 = vpop.f32.mrf.mxu0  ;;  %4155 = vmatmul.mubr.f32.gmra.mxu0 %v747_v46  ;;  %v755_v46 = vld [vmem:[#allocation2 + $0x12a] sm:$0xff]  ;;  %2852 = vmatprep.subr.mxu0 %v5408_v32 }
 0x1b3   : > { %4157 = vmatprep.mubr.f32.mxu0 %v748_v16  ;;  %v756_v16 = vld [vmem:[#allocation2 + $0x13a] sm:$0xff]  ;;  %2853 = vmatpush1.msra.mxu0 %v2506_v20  ;;  %v2505_v61 = vld [vmem:[#allocation9 + $0x130] sm:$0xff] }
 0x1b4   : > { %v1311_v53 = vpop.f32.mrf.mxu1  ;;  %v1088_v6 = vpop.f32.mrf.mxu0  ;;  %2854 = vmatprep.subr.mxu0 %v5408_v32  ;;  %2658 = vmatpush2.msra.mxu1 %v2491_v52 }
 0x1b5   : > { %v5434_v43 = vadd.f32 %v1311_v53, %v1086_v33  ;;  %2855 = vmatpush1.msra.mxu0 %v2505_v61  ;;  %v2504_v53 = vld [vmem:[#allocation9 + $0x128] sm:$0xff]  ;;  %2659 = vmatprep.subr.mxu1 %v5408_v32 }
 0x1b6   : > { %v1313_v13 = vpop.f32.mrf.mxu1  ;;  %v1091_v34 = vpop.f32.mrf.mxu0  ;;  %4158 = vmatmul.mubr.f32.gmra.mxu0 %v749_v60  ;;  %2856 = vmatprep.subr.mxu0 %v5408_v32 }
 0x1b7   : > { %4160 = vmatprep.mubr.f32.mxu0 %v750_v35  ;;  %2857 = vmatpush1.msra.mxu0 %v2504_v53 }
 0x1b8   : > { %v1316_v11 = vpop.f32.mrf.mxu1  ;;  %v1093_v10 = vpop.f32.mrf.mxu0  ;;  %2858 = vmatprep.subr.mxu0 %v5408_v32 }
 0x1b9   : > { %v5439_v14 = vadd.f32 %v1316_v11, %v1091_v34  ;;  %v2503_v34 = vld [vmem:[#allocation9 + $0x120] sm:$0xff]  ;;  %v2490_v11 = vld [vmem:[#allocation9 + $0xb8] sm:$0xff] }
 0x1ba   : > { %v1318_v29 = vpop.f32.mrf.mxu1  ;;  %v1096_v19 = vpop.f32.mrf.mxu0  ;;  %4161 = vmatmul.mubr.f32.gmra.mxu0 %v751_v12  ;;  %v2502_v10 = vld [vmem:[#allocation9 + $0x118] sm:$0xff]  ;;  %2660 = vmatpush2.msra.mxu1 %v2490_v11 }
 0x1bb   : > { %4163 = vmatprep.mubr.f32.mxu0 %v752_v56  ;;  %2859 = vmatpush1.msra.mxu0 %v2503_v34  ;;  %v760_v29 = vld [vmem:[#allocation2 + $0x16a] sm:$0xff]  ;;  %v2486_v11 = vld [vmem:[#allocation9 + $0x98] sm:$0xff] }
 0x1bc   : > { %v1321_v4 = vpop.f32.mrf.mxu1  ;;  %v1098_v63 = vpop.f32.mrf.mxu0  ;;  %2860 = vmatprep.subr.mxu0 %v5408_v32  ;;  %2661 = vmatprep.subr.mxu1 %v5408_v32 }
 0x1bd   : > { %v5444_v41 = vadd.f32 %v1321_v4, %v1096_v19  ;;  %2861 = vmatpush1.msra.mxu0 %v2502_v10  ;;  %v761_v4 = vld [vmem:[#allocation2 + $0x172] sm:$0xff] }
 0x1be   : > { %v1323_v2 = vpop.f32.mrf.mxu1  ;;  %v1101_v28 = vpop.f32.mrf.mxu0  ;;  %4164 = vmatmul.mubr.f32.gmra.mxu0 %v753_v24  ;;  %v2501_v24 = vld [vmem:[#allocation9 + $0x110] sm:$0xff]  ;;  %2862 = vmatprep.subr.mxu0 %v5408_v32  ;;  %v2526_v10 = vld [vmem:[#allocation9 + $0x1d8] sm:$0xff] }
 0x1bf   : > { %4166 = vmatprep.mubr.f32.mxu0 %v754_v48  ;;  %2863 = vmatpush1.msra.mxu0 %v2501_v24  ;;  %v2489_v63 = vld [vmem:[#allocation9 + $0xb0] sm:$0xff]  ;;  %v2500_v48 = vld [vmem:[#allocation9 + $0x108] sm:$0xff] }
 0x1c0   : > { %v1326_v59 = vpop.f32.mrf.mxu1  ;;  %v1103_v51 = vpop.f32.mrf.mxu0  ;;  %2864 = vmatprep.subr.mxu0 %v5408_v32  ;;  %2662 = vmatpush2.msra.mxu1 %v2489_v63  ;;  %v2525_v24 = vld [vmem:[#allocation9 + $0x1d0] sm:$0xff] }
 0x1c1   : > { %v5449_v38 = vadd.f32 %v1326_v59, %v1101_v28  ;;  %2865 = vmatpush1.msra.mxu0 %v2500_v48  ;;  %2663 = vmatprep.subr.mxu1 %v5408_v32  ;;  %v2488_v59 = vld [vmem:[#allocation9 + $0xa8] sm:$0xff]  ;;  %v2530_v51 = vld [vmem:[#allocation9 + $0x1f8] sm:$0xff] }
 0x1c2   : > { %v1328_v33 = vpop.f32.mrf.mxu1  ;;  %v1106_v60 = vpop.f32.mrf.mxu0  ;;  %4167 = vmatmul.mubr.f32.gmra.mxu0 %v755_v46  ;;  %v2499_v46 = vld [vmem:[#allocation9 + $0x100] sm:$0xff]  ;;  %2866 = vmatprep.subr.mxu0 %v5408_v32 }
 0x1c3   : > { %4169 = vmatprep.mubr.f32.mxu0 %v756_v16  ;;  %2867 = vmatpush1.msra.mxu0 %v2499_v46  ;;  %v764_v33 = vld [vmem:[#allocation2 + $0x19a] sm:$0xff] }
 0x1c4   : > { %v1331_v6 = vpop.f32.mrf.mxu1  ;;  %v1108_v35 = vpop.f32.mrf.mxu0  ;;  %2868 = vmatprep.subr.mxu0 %v5408_v32  ;;  %2664 = vmatpush2.msra.mxu1 %v2488_v59  ;;  %v2523_v59 = vld [vmem:[#allocation9 + $0x1c0] sm:$0xff] }
 0x1c5   : > { %v5454_v13 = vadd.f32 %v1331_v6, %v1106_v60  ;;  %2869 = vmatpush2.msra.mxu0 %v2530_v51  ;;  %2665 = vmatprep.subr.mxu1 %v5408_v32  ;;  %v2487_v6 = vld [vmem:[#allocation9 + $0xa0] sm:$0xff]  ;;  %v2528_v35 = vld [vmem:[#allocation9 + $0x1e8] sm:$0xff] }
 0x1c6   : > { %v1333_v12 = vpop.f32.mrf.mxu1  ;;  %v1111_v49 = vpop.f32.mrf.mxu0  ;;  %4170 = vmatmul.mubr.f32.gmra.mxu0 %v757_v18  ;;  %v2529_v18 = vld [vmem:[#allocation9 + $0x1f0] sm:$0xff]  ;;  %2870 = vmatprep.subr.mxu0 %v5408_v32  ;;  %v2484_v51 = vld [vmem:[#allocation9 + $0x88] sm:$0xff] }
 0x1c7   : > { %4172 = vmatprep.mubr.f32.mxu0 %v758_v57  ;;  %2871 = vmatpush2.msra.mxu0 %v2529_v18  ;;  %v2483_v18 = vld [vmem:[#allocation9 + $0x80] sm:$0xff] }
 0x1c8   : > { %v1336_v56 = vpop.f32.mrf.mxu1  ;;  %v1113_v50 = vpop.f32.mrf.mxu0  ;;  %2872 = vmatprep.subr.mxu0 %v5408_v32  ;;  %2666 = vmatpush2.msra.mxu1 %v2487_v6 }
 0x1c9   : > { %v5459_v19 = vadd.f32 %v1336_v56, %v1111_v49  ;;  %2873 = vmatpush2.msra.mxu0 %v2528_v35  ;;  %v2527_v49 = vld [vmem:[#allocation9 + $0x1e0] sm:$0xff]  ;;  %2667 = vmatprep.subr.mxu1 %v5408_v32 }
 0x1ca   : > { %v1338_v39 = vpop.f32.mrf.mxu1  ;;  %v1116_v40 = vpop.f32.mrf.mxu0  ;;  %4173 = vmatmul.mubr.f32.gmra.mxu0 %v759_v26  ;;  %2874 = vmatprep.subr.mxu0 %v5408_v32 }
 0x1cb   : > { %4175 = vmatprep.mubr.f32.mxu0 %v760_v29  ;;  %2875 = vmatpush2.msra.mxu0 %v2527_v49 }
 0x1cc   : > { %v1341_v58 = vpop.f32.mrf.mxu1  ;;  %v1118_v2 = vpop.f32.mrf.mxu0  ;;  %2876 = vmatprep.subr.mxu0 %v5408_v32  ;;  %2668 = vmatpush2.msra.mxu1 %v2486_v11 }
 0x1cd   : > { %v5464_v28 = vadd.f32 %v1341_v58, %v1116_v40  ;;  %2877 = vmatpush2.msra.mxu0 %v2526_v10  ;;  %2669 = vmatprep.subr.mxu1 %v5408_v32  ;;  %v2485_v58 = vld [vmem:[#allocation9 + $0x90] sm:$0xff]  ;;  %v2524_v2 = vld [vmem:[#allocation9 + $0x1c8] sm:$0xff] }
 0x1ce   : > { %v1343_v31 = vpop.f32.mrf.mxu1  ;;  %v1121_v20 = vpop.f32.mrf.mxu0  ;;  %4176 = vmatmul.mubr.f32.gmra.mxu0 %v761_v4  ;;  %2878 = vmatprep.subr.mxu0 %v5408_v32 }
 0x1cf   : > { %4178 = vmatprep.mubr.f32.mxu0 %v5392_v17  ;;  %v765_v17 = vld [vmem:[#allocation2 + $0x1a2] sm:$0xff]  ;;  %2879 = vmatpush2.msra.mxu0 %v2525_v24 }
 0x1d0   : > { %v1346_v16 = vpop.f32.mrf.mxu1  ;;  %v1123_v61 = vpop.f32.mrf.mxu0  ;;  %2880 = vmatprep.subr.mxu0 %v5408_v32  ;;  %2670 = vmatpush2.msra.mxu1 %v2485_v58  ;;  %v2517_v58 = vld [vmem:[#allocation9 + $0x190] sm:$0xff] }
 0x1d1   : > { %v5470_v60 = vadd.f32 %v1346_v16, %v1121_v20  ;;  %2881 = vmatpush2.msra.mxu0 %v2524_v2  ;;  %2671 = vmatprep.subr.mxu1 %v5408_v32 }
 0x1d2   : > { %v1348_v52 = vpop.f32.mrf.mxu1  ;;  %v1126_v53 = vpop.f32.mrf.mxu0  ;;  %4179 = vmatmul.mubr.f32.gmra.mxu0 %v5399_v27  ;;  %2882 = vmatprep.subr.mxu0 %v5408_v32 }
 0x1d3   : > { %4181 = vmatprep.mubr.f32.mxu0 %v764_v33  ;;  %2883 = vmatpush2.msra.mxu0 %v2523_v59  ;;  %v2522_v33 = vld [vmem:[#allocation9 + $0x1b8] sm:$0xff] }
 0x1d4   : > { %v1351_v57 = vpop.f32.mrf.mxu1  ;;  %v1128_v34 = vpop.f32.mrf.mxu0  ;;  %2672 = vmatpush2.msra.mxu1 %v2484_v51  ;;  %2884 = vmatprep.subr.mxu0 %v5408_v32  ;;  %v2210_v52 = vld [vmem:[#allocation3 + $0x1] sm:$0xff] }
 0x1d5   : > { %v5476_v12 = vadd.f32 %v1351_v57, %v1126_v53  ;;  %2673 = vmatprep.subr.mxu1 %v5408_v32  ;;  %2885 = vmatpush2.msra.mxu0 %v2522_v33  ;;  %v2546_v33 = vld [vmem:[#allocation9 + $0x278] sm:$0xff] }
 0x1d6   : > { %v1353_v26 = vpop.f32.mrf.mxu1  ;;  %v1131_v27 = vpop.f32.mrf.mxu0  ;;  %4182 = vmatmul.mubr.f32.gmra.mxu0 %v765_v17  ;;  %2674 = vmatpush2.msra.mxu1 %v2483_v18  ;;  %v2178_v17 = vld [vmem:[#allocation3] sm:$0xff] }
 0x1d7   : > { %2886 = vmatprep.subr.mxu0 %v5408_v32  ;;  %2675 = vmatprep.mubr.f32.mxu1 %v2210_v52  ;;  %v2520_v26 = vld [vmem:[#allocation9 + $0x1a8] sm:$0xff] }
 0x1d8   : > { %v1356_v56 = vpop.f32.mrf.mxu1  ;;  %v1133_v50 = vpop.f32.mrf.mxu0  ;;  %2676 = vmatmul.mubr.f32.vlgmr.msra.gmra.mxu1 %v2178_v17  ;;  %3061 = vmatprep.subr.mxu1 %v5408_v32 }
 0x1d9   : > { %v5481_v29 = vadd.f32 %v1356_v56, %v1131_v27  ;;  %v2211_v27 = vld [vmem:[#allocation3 + $0x9] sm:$0xff]  ;;  %3062 = vmatpush1.msra.mxu1 %v2546_v33  ;;  %v2541_v33 = vld [vmem:[#allocation9 + $0x250] sm:$0xff] }
 0x1da   : > { %v1358_v39 = vpop.f32.mrf.mxu1  ;;  %v1426_v40 = vpop.f32.mrf.mxu0  ;;  %2680 = vmatprep.mubr.f32.mxu1 %v2211_v27  ;;  %v2519_v50 = vld [vmem:[#allocation9 + $0x1a0] sm:$0xff]  ;;  %3063 = vmatprep.subr.mxu1 %v5408_v32 }
 0x1db   : > { %v1427_v4 = vadd.f32 %v1426_v40, %v5335_v8  ;;  %v2518_v40 = vld [vmem:[#allocation9 + $0x198] sm:$0xff] }
 0x1dc   : > { %v1428_v63 = vpop.f32.mrf.mxu0  ;;  %v1651_v48 = vpop.f32.mrf.mxu1  ;;  %2681 = vmatmul.mubr.f32.gmra.mxu1 %v5408_v32 }
 0x1dd   : > { %v5487_v46 = vadd.f32 %v1651_v48, %v1427_v4 }
 0x1de   : > { %v1431_v31 = vpop.f32.mrf.mxu0  ;;  %v1653_v20 = vpop.f32.mrf.mxu1 }
 0x1df   : > { %v1432_v8 = vadd.f32 %v1431_v31, %v5339_v36  ;;  %v2521_v36 = vld [vmem:[#allocation9 + $0x1b0] sm:$0xff]  ;;  %v2516_v20 = vld [vmem:[#allocation9 + $0x188] sm:$0xff] }
 0x1e0   : > { %v1433_v16 = vpop.f32.mrf.mxu0  ;;  %v1656_v61 = vpop.f32.mrf.mxu1  ;;  %2887 = vmatpush2.msra.mxu0 %v2521_v36  ;;  %v2545_v36 = vld [vmem:[#allocation9 + $0x270] sm:$0xff] }
 0x1e1   : > { %v5494_v53 = vadd.f32 %v1656_v61, %v1432_v8  ;;  %2888 = vmatprep.subr.mxu0 %v5408_v32  ;;  %v2515_v16 = vld [vmem:[#allocation9 + $0x180] sm:$0xff]  ;;  %3064 = vmatpush1.msra.mxu1 %v2545_v36  ;;  %v2540_v36 = vld [vmem:[#allocation9 + $0x248] sm:$0xff] }
 0x1e2   : > { %v1436_v6 = vpop.f32.mrf.mxu0  ;;  %v1658_v35 = vpop.f32.mrf.mxu1  ;;  %2889 = vmatpush2.msra.mxu0 %v2520_v26  ;;  %3065 = vmatprep.subr.mxu1 %v5408_v32 }
 0x1e3   : > { %v1437_v57 = vadd.f32 %v1436_v6, %v5343_v5  ;;  %2890 = vmatprep.subr.mxu0 %v5408_v32 }
 0x1e4   : > { %v1438_v34 = vpop.f32.mrf.mxu0  ;;  %v1661_v49 = vpop.f32.mrf.mxu1  ;;  %2891 = vmatpush2.msra.mxu0 %v2519_v50 }
 0x1e5   : > { %v5500_v11 = vadd.f32 %v1661_v49, %v1437_v57  ;;  %2892 = vmatprep.subr.mxu0 %v5408_v32 }
 0x1e6   : > { %v1441_v10 = vpop.f32.mrf.mxu0  ;;  %v1663_v56 = vpop.f32.mrf.mxu1  ;;  %2893 = vmatpush2.msra.mxu0 %v2518_v40  ;;  %v2543_v40 = vld [vmem:[#allocation9 + $0x260] sm:$0xff] }
 0x1e7   : > { %v1442_v5 = vadd.f32 %v1441_v10, %v5347_v9  ;;  %2894 = vmatprep.subr.mxu0 %v5408_v32  ;;  %v2544_v10 = vld [vmem:[#allocation9 + $0x268] sm:$0xff] }
 0x1e8   : > { %v1443_v24 = vpop.f32.mrf.mxu0  ;;  %v1666_v39 = vpop.f32.mrf.mxu1  ;;  %2895 = vmatpush2.msra.mxu0 %v2517_v58  ;;  %3066 = vmatpush1.msra.mxu1 %v2544_v10  ;;  %v2539_v10 = vld [vmem:[#allocation9 + $0x240] sm:$0xff] }
 0x1e9   : > { %v5506_v4 = vadd.f32 %v1666_v39, %v1442_v5  ;;  %2896 = vmatprep.subr.mxu0 %v5408_v32  ;;  %3067 = vmatprep.subr.mxu1 %v5408_v32 }
 0x1ea   : > { %v1446_v63 = vpop.f32.mrf.mxu0  ;;  %v1668_v48 = vpop.f32.mrf.mxu1  ;;  %2897 = vmatpush2.msra.mxu0 %v2516_v20  ;;  %3068 = vmatpush1.msra.mxu1 %v2543_v40  ;;  %v2538_v40 = vld [vmem:[#allocation9 + $0x238] sm:$0xff] }
 0x1eb   : > { %v1447_v2 = vadd.f32 %v1446_v63, %v5352_v7  ;;  %2898 = vmatprep.subr.mxu0 %v5408_v32  ;;  %3069 = vmatprep.subr.mxu1 %v5408_v32 }
 0x1ec   : > { %v1448_v9 = vpop.f32.mrf.mxu0  ;;  %v1671_v31 = vpop.f32.mrf.mxu1  ;;  %2899 = vmatpush2.msra.mxu0 %v2515_v16 }
 0x1ed   : > { %v5511_v59 = vadd.f32 %v1671_v31, %v1447_v2  ;;  %3286 = vmatprep.subr.mxu0 %v5408_v32  ;;  %v2542_v31 = vld [vmem:[#allocation9 + $0x258] sm:$0xff] }
 0x1ee   : > { %v1451_v51 = vpop.f32.mrf.mxu0  ;;  %v1673_v8 = vpop.f32.mrf.mxu1  ;;  %3070 = vmatpush1.msra.mxu1 %v2542_v31  ;;  %v2537_v31 = vld [vmem:[#allocation9 + $0x230] sm:$0xff] }
 0x1ef   : > { %v1452_v61 = vadd.f32 %v1451_v51, %v5357_v23  ;;  %3071 = vmatprep.subr.mxu1 %v5408_v32 }
 0x1f0   : > { %v1453_v18 = vpop.f32.mrf.mxu0  ;;  %v1676_v7 = vpop.f32.mrf.mxu1  ;;  %3072 = vmatpush1.msra.mxu1 %v2541_v33  ;;  %v2536_v33 = vld [vmem:[#allocation9 + $0x228] sm:$0xff] }
 0x1f1   : > { %v5516_v52 = vadd.f32 %v1676_v7, %v1452_v61  ;;  %3073 = vmatprep.subr.mxu1 %v5408_v32 }
 0x1f2   : > { %v1456_v17 = vpop.f32.mrf.mxu0  ;;  %v1678_v6 = vpop.f32.mrf.mxu1  ;;  %3074 = vmatpush1.msra.mxu1 %v2540_v36  ;;  %v2535_v36 = vld [vmem:[#allocation9 + $0x220] sm:$0xff] }
 0x1f3   : > { %v1457_v35 = vadd.f32 %v1456_v17, %v5362_v22  ;;  %3075 = vmatprep.subr.mxu1 %v5408_v32 }
 0x1f4   : > { %v1458_v57 = vpop.f32.mrf.mxu0  ;;  %v1681_v34 = vpop.f32.mrf.mxu1  ;;  %3076 = vmatpush1.msra.mxu1 %v2539_v10  ;;  %v2534_v10 = vld [vmem:[#allocation9 + $0x218] sm:$0xff] }
 0x1f5   : > { %v5520_v23 = vadd.f32 %v1681_v34, %v1457_v35  ;;  %3077 = vmatprep.subr.mxu1 %v5408_v32 }
 0x1f6   : > { %v1461_v49 = vpop.f32.mrf.mxu0  ;;  %v1683_v26 = vpop.f32.mrf.mxu1  ;;  %3078 = vmatpush1.msra.mxu1 %v2538_v40 }
 0x1f7   : > { %v1462_v27 = vadd.f32 %v1461_v49, %v5367_v47  ;;  %3079 = vmatprep.subr.mxu1 %v5408_v32 }
 0x1f8   : > { %v1463_v56 = vpop.f32.mrf.mxu0  ;;  %v1686_v50 = vpop.f32.mrf.mxu1  ;;  %3080 = vmatpush1.msra.mxu1 %v2537_v31 }
 0x1f9   : > { %v5524_v5 = vadd.f32 %v1686_v50, %v1462_v27  ;;  %3081 = vmatprep.subr.mxu1 %v5408_v32 }
 0x1fa   : > { %v1466_v22 = vpop.f32.mrf.mxu0  ;;  %v1688_v24 = vpop.f32.mrf.mxu1  ;;  %3082 = vmatpush1.msra.mxu1 %v2536_v33 }
 0x1fb   : > { %v1467_v39 = vadd.f32 %v1466_v22, %v5372_v3  ;;  %3083 = vmatprep.subr.mxu1 %v5408_v32 }
 0x1fc   : > { %v1468_v63 = vpop.f32.mrf.mxu0  ;;  %v1691_v48 = vpop.f32.mrf.mxu1  ;;  %3084 = vmatpush1.msra.mxu1 %v2535_v36 }
 0x1fd   : > { %v5528_v58 = vadd.f32 %v1691_v48, %v1467_v39  ;;  %3085 = vmatprep.subr.mxu1 %v5408_v32 }
 0x1fe   : > { %v1471_v47 = vpop.f32.mrf.mxu0  ;;  %v1693_v2 = vpop.f32.mrf.mxu1  ;;  %3086 = vmatpush1.msra.mxu1 %v2534_v10 }
 0x1ff   : > { %v1472_v9 = vadd.f32 %v1471_v47, %v5377_v25  ;;  %3087 = vmatprep.subr.mxu1 %v5408_v32 }
 0x200   : > { %v1473_v20 = vpop.f32.mrf.mxu0  ;;  %v1696_v51 = vpop.f32.mrf.mxu1 }
 0x201   : > { %v5532_v8 = vadd.f32 %v1696_v51, %v1472_v9 }
 0x202   : > { %v1476_v3 = vpop.f32.mrf.mxu0  ;;  %v1698_v16 = vpop.f32.mrf.mxu1 }
 0x203   : > { %v1477_v61 = vadd.f32 %v1476_v3, %v5382_v55 }
 0x204   : > { %v1478_v18 = vpop.f32.mrf.mxu0  ;;  %v1701_v7 = vpop.f32.mrf.mxu1 }
 0x205   : > { %v5536_v17 = vadd.f32 %v1701_v7, %v1477_v61 }
 0x206   : > { %v1481_v25 = vpop.f32.mrf.mxu0  ;;  %v1703_v6 = vpop.f32.mrf.mxu1 }
 0x207   : > { %v1482_v35 = vadd.f32 %v1481_v25, %v5387_v0 }
 0x208   : > { %v1483_v57 = vpop.f32.mrf.mxu0  ;;  %v1706_v34 = vpop.f32.mrf.mxu1 }
 0x209   : > { %v5540_v49 = vadd.f32 %v1706_v34, %v1482_v35 }
 0x20a   : > { %v1486_v55 = vpop.f32.mrf.mxu0  ;;  %v1708_v26 = vpop.f32.mrf.mxu1 }
 0x20b   : > { %v1487_v27 = vadd.f32 %v1486_v55, %v5394_v44 }
 0x20c   : > { %v1488_v56 = vpop.f32.mrf.mxu0  ;;  %v1711_v50 = vpop.f32.mrf.mxu1 }
 0x20d   : > { %v5544_v22 = vadd.f32 %v1711_v50, %v1487_v27 }
 0x20e   : > { %v1491_v0 = vpop.f32.mrf.mxu0  ;;  %v1713_v24 = vpop.f32.mrf.mxu1 }
 0x20f   : > { %v1492_v39 = vadd.f32 %v1491_v0, %v5401_v37  ;;  %v2532_v24 = vld [vmem:[#allocation9 + $0x208] sm:$0xff] }
 0x210   : > { %v1493_v63 = vpop.f32.mrf.mxu0  ;;  %v1716_v48 = vpop.f32.mrf.mxu1 }
 0x211   : > { %v5548_v47 = vadd.f32 %v1716_v48, %v1492_v39  ;;  %v2531_v48 = vld [vmem:[#allocation9 + $0x200] sm:$0xff] }
 0x212   : > { %v1496_v44 = vpop.f32.mrf.mxu0  ;;  %v1718_v2 = vpop.f32.mrf.mxu1 }
 0x213   : > { %v1497_v9 = vadd.f32 %v1496_v44, %v5405_v54 }
 0x214   : > { %v1498_v20 = vpop.f32.mrf.mxu0  ;;  %v1721_v51 = vpop.f32.mrf.mxu1 }
 0x215   : > { %v5552_v3 = vadd.f32 %v1721_v51, %v1497_v9  ;;  %v2562_v51 = vld [vmem:[#allocation9 + $0x2f8] sm:$0xff] }
 0x216   : > { %v1501_v37 = vpop.f32.mrf.mxu0  ;;  %v1723_v16 = vpop.f32.mrf.mxu1 }
 0x217   : > { %v1502_v61 = vadd.f32 %v1501_v37, %v5411_v15 }
 0x218   : > { %v1503_v18 = vpop.f32.mrf.mxu0  ;;  %v1726_v7 = vpop.f32.mrf.mxu1 }
 0x219   : > { %v5556_v25 = vadd.f32 %v1726_v7, %v1502_v61  ;;  %v2561_v7 = vld [vmem:[#allocation9 + $0x2f0] sm:$0xff] }
 0x21a   : > { %v1506_v54 = vpop.f32.mrf.mxu0  ;;  %v1728_v6 = vpop.f32.mrf.mxu1 }
 0x21b   : > { %v1507_v35 = vadd.f32 %v1506_v54, %v5414_v1  ;;  %v2533_v1 = vld [vmem:[#allocation9 + $0x210] sm:$0xff] }
 0x21c   : > { %v1508_v57 = vpop.f32.mrf.mxu0  ;;  %v1731_v34 = vpop.f32.mrf.mxu1  ;;  %3088 = vmatpush1.msra.mxu1 %v2533_v1 }
 0x21d   : > { %v5560_v55 = vadd.f32 %v1731_v34, %v1507_v35  ;;  %3089 = vmatprep.subr.mxu1 %v5408_v32  ;;  %v2560_v34 = vld [vmem:[#allocation9 + $0x2e8] sm:$0xff] }
 0x21e   : > { %v1511_v15 = vpop.f32.mrf.mxu0  ;;  %v1733_v26 = vpop.f32.mrf.mxu1  ;;  %3090 = vmatpush1.msra.mxu1 %v2532_v24 }
 0x21f   : > { %v1512_v27 = vadd.f32 %v1511_v15, %v5417_v62  ;;  %3091 = vmatprep.subr.mxu1 %v5408_v32 }
 0x220   : > { %v1513_v56 = vpop.f32.mrf.mxu0  ;;  %v1736_v50 = vpop.f32.mrf.mxu1  ;;  %3092 = vmatpush1.msra.mxu1 %v2531_v48  ;;  %v2558_v48 = vld [vmem:[#allocation9 + $0x2d8] sm:$0xff] }
 0x221   : > { %v5564_v0 = vadd.f32 %v1736_v50, %v1512_v27  ;;  %3093 = vmatprep.subr.mxu1 %v5408_v32  ;;  %v2559_v50 = vld [vmem:[#allocation9 + $0x2e0] sm:$0xff] }
 0x222   : > { %v1516_v39 = vpop.f32.mrf.mxu0  ;;  %v1738_v40 = vpop.f32.mrf.mxu1  ;;  %3094 = vmatpush2.msra.mxu1 %v2562_v51  ;;  %v2557_v51 = vld [vmem:[#allocation9 + $0x2d0] sm:$0xff] }
 0x223   : > { %v1517_v63 = vadd.f32 %v1516_v39, %v5420_v45  ;;  %3095 = vmatprep.subr.mxu1 %v5408_v32 }
 0x224   : > { %v1518_v44 = vpop.f32.mrf.mxu0  ;;  %v1741_v62 = vpop.f32.mrf.mxu1  ;;  %3096 = vmatpush2.msra.mxu1 %v2561_v7 }
 0x225   : > { %v5569_v2 = vadd.f32 %v1741_v62, %v1517_v63  ;;  %3097 = vmatprep.subr.mxu1 %v5408_v32 }
 0x226   : > { %v1521_v9 = vpop.f32.mrf.mxu0  ;;  %v1743_v31 = vpop.f32.mrf.mxu1  ;;  %3098 = vmatpush2.msra.mxu1 %v2560_v34  ;;  %v2555_v34 = vld [vmem:[#allocation9 + $0x2c0] sm:$0xff] }
 0x227   : > { %v1522_v20 = vadd.f32 %v1521_v9, %v5423_v30  ;;  %3099 = vmatprep.subr.mxu1 %v5408_v32 }
 0x228   : > { %v1523_v37 = vpop.f32.mrf.mxu0  ;;  %v1746_v45 = vpop.f32.mrf.mxu1  ;;  %3100 = vmatpush2.msra.mxu1 %v2559_v50  ;;  %v2554_v50 = vld [vmem:[#allocation9 + $0x2b8] sm:$0xff] }
 0x229   : > { %v5574_v16 = vadd.f32 %v1746_v45, %v1522_v20  ;;  %3101 = vmatprep.subr.mxu1 %v5408_v32 }
 0x22a   : > { %v1526_v61 = vpop.f32.mrf.mxu0  ;;  %v1748_v33 = vpop.f32.mrf.mxu1  ;;  %3102 = vmatpush2.msra.mxu1 %v2558_v48  ;;  %v2553_v48 = vld [vmem:[#allocation9 + $0x2b0] sm:$0xff] }
 0x22b   : > { %v1527_v18 = vadd.f32 %v1526_v61, %v5426_v21  ;;  %3103 = vmatprep.subr.mxu1 %v5408_v32  ;;  %v5596_v33 = vld [vmem:[#allocation2 + $0x8] sm:$0xff] }
 0x22c   : > { %v1528_v54 = vpop.f32.mrf.mxu0  ;;  %v1751_v6 = vpop.f32.mrf.mxu1  ;;  %3104 = vmatpush2.msra.mxu1 %v2557_v51  ;;  %v2552_v51 = vld [vmem:[#allocation9 + $0x2a8] sm:$0xff] }
 0x22d   : > { %v5578_v35 = vadd.f32 %v1751_v6, %v1527_v18  ;;  %3105 = vmatprep.subr.mxu1 %v5596_v33  ;;  %v2556_v54 = vld [vmem:[#allocation9 + $0x2c8] sm:$0xff] }
 0x22e   : > { %v1531_v30 = vpop.f32.mrf.mxu0  ;;  %v1753_v36 = vpop.f32.mrf.mxu1  ;;  %3106 = vmatpush2.msra.mxu1 %v2556_v54  ;;  %v2551_v54 = vld [vmem:[#allocation9 + $0x2a0] sm:$0xff] }
 0x22f   : > { %v1532_v57 = vadd.f32 %v1531_v30, %v5429_v42  ;;  %3107 = vmatprep.subr.mxu1 %v5596_v33 }
 0x230   : > { %v1533_v15 = vpop.f32.mrf.mxu0  ;;  %v1756_v26 = vpop.f32.mrf.mxu1  ;;  %3108 = vmatpush2.msra.mxu1 %v2555_v34 }
 0x231   : > { %v5582_v27 = vadd.f32 %v1756_v26, %v1532_v57  ;;  %3109 = vmatprep.subr.mxu1 %v5596_v33 }
 0x232   : > { %v1536_v21 = vpop.f32.mrf.mxu0  ;;  %v1758_v10 = vpop.f32.mrf.mxu1  ;;  %3110 = vmatpush2.msra.mxu1 %v2554_v50  ;;  %v5637_v50 = vld [vmem:[%s6601_s3] ss:$0 sm:$0xff] }
 0x233   : > { %v1537_v56 = vadd.f32 %v1536_v21, %v5434_v43  ;;  %3111 = vmatprep.subr.mxu1 %v5596_v33 }
 0x234   : > { %v1538_v1 = vpop.f32.mrf.mxu0  ;;  %v1761_v24 = vpop.f32.mrf.mxu1  ;;  %3112 = vmatpush2.msra.mxu1 %v2553_v48 }
 0x235   : > { %v5586_v39 = vadd.f32 %v1761_v24, %v1537_v56  ;;  %3113 = vmatprep.subr.mxu1 %v5596_v33 }
 0x236   : > { %v1541_v42 = vpop.f32.mrf.mxu0  ;;  %v1763_v40 = vpop.f32.mrf.mxu1  ;;  %3114 = vmatpush2.msra.mxu1 %v2552_v51 }
 0x237   : > { %v1542_v63 = vadd.f32 %v1541_v42, %v5439_v14  ;;  %3115 = vmatprep.subr.mxu1 %v5596_v33 }
 0x238   : > { %v1543_v44 = vpop.f32.mrf.mxu0  ;;  %v1766_v62 = vpop.f32.mrf.mxu1  ;;  %3116 = vmatpush2.msra.mxu1 %v2551_v54 }
 0x239   : > { %v5590_v9 = vadd.f32 %v1766_v62, %v1542_v63  ;;  %3117 = vmatprep.subr.mxu1 %v5596_v33 }
 0x23a   : > { %v1546_v43 = vpop.f32.mrf.mxu0  ;;  %v1768_v31 = vpop.f32.mrf.mxu1 }
 0x23b   : > { %v1547_v20 = vadd.f32 %v1546_v43, %v5444_v41 }
 0x23c   : > { %v1548_v37 = vpop.f32.mrf.mxu0  ;;  %v1771_v45 = vpop.f32.mrf.mxu1 }
 0x23d   : > { %v5594_v61 = vadd.f32 %v1771_v45, %v1547_v20 }
 0x23e   : > { %v1551_v14 = vpop.f32.mrf.mxu0  ;;  %v1773_v18 = vpop.f32.mrf.mxu1 }
 0x23f   : > { %v1552_v7 = vadd.f32 %v1551_v14, %v5449_v38 }
 0x240   : > { %v1553_v32 = vpop.f32.mrf.mxu0  ;;  %v1776_v6 = vpop.f32.mrf.mxu1 }
 0x241   : > { %v5600_v30 = vadd.f32 %v1776_v6, %v1552_v7 }
 0x242   : > { %v1556_v41 = vpop.f32.mrf.mxu0  ;;  %v1778_v36 = vpop.f32.mrf.mxu1 }
 0x243   : > { %v1557_v57 = vadd.f32 %v1556_v41, %v5454_v13 }
 0x244   : > { %v1558_v15 = vpop.f32.mrf.mxu0  ;;  %v1781_v26 = vpop.f32.mrf.mxu1 }
 0x245   : > { %v5604_v21 = vadd.f32 %v1781_v26, %v1557_v57  ;;  %v2550_v57 = vld [vmem:[#allocation9 + $0x298] sm:$0xff] }
 0x246   : > { %v1561_v38 = vpop.f32.mrf.mxu0  ;;  %v1783_v10 = vpop.f32.mrf.mxu1  ;;  %3118 = vmatpush2.msra.mxu1 %v2550_v57  ;;  %v5658_v57 = vld [vmem:[#allocation9 + $0x478] sm:$0xff] }
 0x247   : > { %v1562_v56 = vadd.f32 %v1561_v38, %v5459_v19  ;;  %3119 = vmatprep.subr.mxu1 %v5596_v33 }
 0x248   : > { %v1563_v1 = vpop.f32.mrf.mxu0  ;;  %v1786_v24 = vpop.f32.mrf.mxu1 }
 0x249   : > { %v5608_v42 = vadd.f32 %v1786_v24, %v1562_v56  ;;  %v2549_v56 = vld [vmem:[#allocation9 + $0x290] sm:$0xff] }
 0x24a   : > { %v1566_v13 = vpop.f32.mrf.mxu0  ;;  %v1788_v40 = vpop.f32.mrf.mxu1  ;;  %3120 = vmatpush2.msra.mxu1 %v2549_v56 }
 0x24b   : > { %v1567_v63 = vadd.f32 %v1566_v13, %v5464_v28  ;;  %3121 = vmatprep.subr.mxu1 %v5596_v33 }
 0x24c   : > { %v1568_v44 = vpop.f32.mrf.mxu0  ;;  %v1791_v62 = vpop.f32.mrf.mxu1 }
 0x24d   : > { %v5612_v43 = vadd.f32 %v1791_v62, %v1567_v63  ;;  %v2548_v44 = vld [vmem:[#allocation9 + $0x288] sm:$0xff] }
 0x24e   : > { %v1571_v19 = vpop.f32.mrf.mxu0  ;;  %v1793_v31 = vpop.f32.mrf.mxu1  ;;  %3122 = vmatpush2.msra.mxu1 %v2548_v44 }
 0x24f   : > { %v1572_v20 = vadd.f32 %v1571_v19, %v5470_v60  ;;  %3123 = vmatprep.subr.mxu1 %v5596_v33 }
 0x250   : > { %v1573_v37 = vpop.f32.mrf.mxu0  ;;  %v1796_v45 = vpop.f32.mrf.mxu1 }
 0x251   : > { %v5616_v14 = vadd.f32 %v1796_v45, %v1572_v20 }
 0x252   : > { %v1576_v28 = vpop.f32.mrf.mxu0  ;;  %v1798_v18 = vpop.f32.mrf.mxu1 }
 0x253   : > { %v1577_v7 = vadd.f32 %v1576_v28, %v5476_v12  ;;  %v5631_v12 = vld [vmem:[%s6600_s2] ss:$0 sm:$0xff] }
 0x254   : > { %v1578_v32 = vpop.f32.mrf.mxu0  ;;  %v1801_v6 = vpop.f32.mrf.mxu1  ;;  %v2547_v18 = vld [vmem:[#allocation9 + $0x280] sm:$0xff] }
 0x255   : > { %v5620_v41 = vadd.f32 %v1801_v6, %v1577_v7  ;;  %3124 = vmatpush2.msra.mxu1 %v2547_v18 }
 0x256   : > { %v5623_v60 = vpop.f32.mrf.mxu0  ;;  %v1803_v36 = vpop.f32.mrf.mxu1  ;;  %4184 = vmatprep.subr.mxu1 %v5658_v57 }
 0x258   : > { %v1583_v34 = vpop.f32.mrf.mxu0  ;;  %v5625_v15 = vpop.f32.mrf.mxu1 }
 0x25a   : > { %v4138_v26 = vpop.f32.mrf.mxu0  ;;  %v1808_v38 = vpop.f32.mrf.mxu1 }
 0x25b   : > { %v1882_v10 = vadd.f32 %v4138_v26, %v5494_v53 }
 0x25c   : > { %v1876_v1 = vpop.f32.mrf.mxu0 }
 0x25d   : > { %v2043_v24 = vmul.f32 %v5631_v12, %v1882_v10  ;;  %v1877_v13 = vadd.f32 %v1876_v1, %v5487_v46 }
 0x25e   : > { %v4141_v40 = vpop.f32.mrf.mxu0 }
 0x25f   : > { %v2082_v63 = vadd.f32 %v5637_v50, %v2043_v24  ;;  %v2042_v48 = vmul.f32 %v5631_v12, %v1877_v13  ;;  %v1892_v53 = vadd.f32 %v4141_v40, %v5506_v4 }
 0x260   : > { %v1886_v62 = vpop.f32.mrf.mxu0 }
 0x261   : > { %v2114_v19 = vmax.f32 %v2082_v63, 0.0  ;;  %v2081_v31 = vadd.f32 %v5637_v50, %v2042_v48  ;;  %v2045_v20 = vmul.f32 %v5631_v12, %v1892_v53  ;;  %v1887_v51 = vadd.f32 %v1886_v62, %v5500_v11  ;;  %v2242_v53 = vld [vmem:[#allocation3 + $0x2] sm:$0xff] }
 0x262   : > { %v4144_v46 = vpop.f32.mrf.mxu0 }
 0x263   : > { %2147 = vst [vmem:[#allocation3 + $0x21] sm:$0xff] %v2114_v19  ;;  %v2113_v37 = vmax.f32 %v2081_v31, 0.0  ;;  %v5650_v45 = vadd.f32 %v5637_v50, %v2045_v20  ;;  %v2044_v4 = vmul.f32 %v5631_v12, %v1887_v51  ;;  %v1902_v28 = vadd.f32 %v4144_v46, %v5516_v52  ;;  %v2578_v31 = vld [vmem:[#allocation9 + $0x378] sm:$0xff] }
 0x264   : > { %v1896_v7 = vpop.f32.mrf.mxu0 }
 0x265   : > { %2146 = vst [vmem:[#allocation3 + $0x19] sm:$0xff] %v2113_v37  ;;  %v2116_v54 = vmax.f32 %v5650_v45, 0.0  ;;  %v2083_v11 = vadd.f32 %v5637_v50, %v2044_v4  ;;  %v2047_v32 = vmul.f32 %v5631_v12, %v1902_v28  ;;  %v1897_v6 = vadd.f32 %v1896_v7, %v5511_v59  ;;  %2685 = vmatprep.mubr.f32.mxu1 %v2113_v37  ;;  %v2577_v4 = vld [vmem:[#allocation9 + $0x370] sm:$0xff] }
 0x266   : > { %v4147_v36 = vpop.f32.mrf.mxu0 }
 0x267   : > { %2149 = vst [vmem:[#allocation3 + $0x39] sm:$0xff] %v2116_v54  ;;  %v2115_v52 = vmax.f32 %v2083_v11, 0.0  ;;  %v5663_v34 = vadd.f32 %v5637_v50, %v2047_v32  ;;  %v2046_v26 = vmul.f32 %v5631_v12, %v1897_v6  ;;  %v1912_v38 = vadd.f32 %v4147_v36, %v5524_v5 }
 0x268   : > { %v1906_v10 = vpop.f32.mrf.mxu0 }
 0x269   : > { %2148 = vst [vmem:[#allocation3 + $0x31] sm:$0xff] %v2115_v52  ;;  %v2118_v59 = vmax.f32 %v5663_v34, 0.0  ;;  %v5670_v56 = vadd.f32 %v5637_v50, %v2046_v26  ;;  %v2049_v1 = vmul.f32 %v5631_v12, %v1912_v38  ;;  %v1907_v24 = vadd.f32 %v1906_v10, %v5520_v23 }
 0x26a   : > { %v4150_v13 = vpop.f32.mrf.mxu0 }
 0x26b   : > { %2151 = vst [vmem:[#allocation3 + $0x51] sm:$0xff] %v2118_v59  ;;  %v2117_v40 = vmax.f32 %v5670_v56, 0.0  ;;  %v5678_v5 = vadd.f32 %v5637_v50, %v2049_v1  ;;  %v2048_v63 = vmul.f32 %v5631_v12, %v1907_v24  ;;  %v1922_v48 = vadd.f32 %v4150_v13, %v5532_v8  ;;  %v2572_v56 = vld [vmem:[#allocation9 + $0x348] sm:$0xff] }
 0x26c   : > { %v1916_v44 = vpop.f32.mrf.mxu0  ;;  %v2274_v62 = vld [vmem:[#allocation3 + $0x18] sm:$0xff]  ;;  %v2275_v8 = vld [vmem:[#allocation3 + $0x20] sm:$0xff] }
 0x26d   : > { %2150 = vst [vmem:[#allocation3 + $0x49] sm:$0xff] %v2117_v40  ;;  %v2120_v23 = vmax.f32 %v5678_v5, 0.0  ;;  %v5686_v20 = vadd.f32 %v5637_v50, %v2048_v63  ;;  %v2051_v51 = vmul.f32 %v5631_v12, %v1922_v48  ;;  %v1917_v46 = vadd.f32 %v1916_v44, %v5528_v58  ;;  %2900 = vmatprep.mubr.f32.mxu0 %v2274_v62  ;;  %v2243_v58 = vld [vmem:[#allocation3 + $0xa] sm:$0xff] }
 0x26e   : > { %2686 = vmatmul.mubr.f32.gmra.mxu1 %v2274_v62  ;;  %v4153_v37 = vpop.f32.mrf.mxu0  ;;  %2901 = vmatmul.mubr.f32.vlgmr.msra.gmra.mxu0 %v2242_v53  ;;  %v2575_v48 = vld [vmem:[#allocation9 + $0x360] sm:$0xff] }
 0x26f   : > { %2690 = vmatprep.mubr.f32.mxu1 %v2114_v19  ;;  %2153 = vst [vmem:[#allocation3 + $0x69] sm:$0xff] %v2120_v23  ;;  %v2119_v28 = vmax.f32 %v5686_v20, 0.0  ;;  %v5694_v18 = vadd.f32 %v5637_v50, %v2051_v51  ;;  %v2050_v7 = vmul.f32 %v5631_v12, %v1917_v46  ;;  %v1932_v11 = vadd.f32 %v4153_v37, %v5540_v49  ;;  %v2576_v49 = vld [vmem:[#allocation9 + $0x368] sm:$0xff]  ;;  %v2574_v46 = vld [vmem:[#allocation9 + $0x358] sm:$0xff] }
 0x270   : > { %2905 = vmatprep.mubr.f32.mxu0 %v2275_v8  ;;  %3287 = vmatpush1.msra.mxu0 %v2578_v31  ;;  %v1926_v32 = vpop.f32.mrf.mxu0  ;;  %v2276_v10 = vld [vmem:[#allocation3 + $0x30] sm:$0xff]  ;;  %v2277_v51 = vld [vmem:[#allocation3 + $0x38] sm:$0xff] }
 0x271   : > { %3288 = vmatprep.subr.mxu0 %v5596_v33  ;;  %2152 = vst [vmem:[#allocation3 + $0x61] sm:$0xff] %v2119_v28  ;;  %v2122_v19 = vmax.f32 %v5694_v18, 0.0  ;;  %v5703_v6 = vadd.f32 %v5637_v50, %v2050_v7  ;;  %v2053_v36 = vmul.f32 %v5631_v12, %v1932_v11  ;;  %v1927_v26 = vadd.f32 %v1926_v32, %v5536_v17  ;;  %v5747_v32 = vld [vmem:[#allocation3 + $0x22] sm:$0xff] }
 0x272   : > { %2691 = vmatmul.mubr.f32.gmra.mxu1 %v2275_v8  ;;  %3289 = vmatpush1.msra.mxu0 %v2577_v4  ;;  %v4156_v38 = vpop.f32.mrf.mxu0  ;;  %v1582_v18 = vadd.f32 %v5623_v60, %v5481_v29  ;;  %v2564_v29 = vld [vmem:[#allocation9 + $0x308] sm:$0xff] }
 0x273   : > { %2906 = vmatmul.mubr.f32.gmra.mxu0 %v2243_v58  ;;  %2695 = vmatprep.mubr.f32.mxu1 %v2115_v52  ;;  %2155 = vst [vmem:[#allocation3 + $0x81] sm:$0xff] %v2122_v19  ;;  %v2121_v1 = vmax.f32 %v5703_v6, 0.0  ;;  %v5711_v24 = vadd.f32 %v5637_v50, %v2053_v36  ;;  %v2052_v13 = vmul.f32 %v5631_v12, %v1927_v26 }
 0x274   : > { %v1942_v63 = vadd.f32 %v4156_v38, %v5548_v47  ;;  %2910 = vmatprep.mubr.f32.mxu0 %v2276_v10  ;;  %3290 = vmatprep.subr.mxu0 %v5596_v33  ;;  %v1936_v17 = vpop.f32.mrf.mxu0  ;;  %v5724_v47 = vld [vmem:[#allocation3 + $0x1a] sm:$0xff]  ;;  %v2278_v26 = vld [vmem:[#allocation3 + $0x48] sm:$0xff] }
 0x275   : > { %3291 = vmatpush1.msra.mxu0 %v2576_v49  ;;  %2154 = vst [vmem:[#allocation3 + $0x79] sm:$0xff] %v2121_v1  ;;  %v2124_v52 = vmax.f32 %v5711_v24, 0.0  ;;  %v5720_v53 = vadd.f32 %v5637_v50, %v2052_v13  ;;  %v1937_v62 = vadd.f32 %v1936_v17, %v5544_v22 }
 0x276   : > { %v2055_v44 = vmul.f32 %v5631_v12, %v1942_v63  ;;  %2696 = vmatmul.mubr.f32.gmra.mxu1 %v2276_v10  ;;  %3292 = vmatprep.subr.mxu0 %v5596_v33  ;;  %v4159_v31 = vpop.f32.mrf.mxu0 }
 0x277   : > { %2911 = vmatmul.mubr.f32.gmra.mxu0 %v5724_v47  ;;  %2700 = vmatprep.mubr.f32.mxu1 %v2116_v54  ;;  %2157 = vst [vmem:[#allocation3 + $0x99] sm:$0xff] %v2124_v52  ;;  %v2123_v37 = vmax.f32 %v5720_v53, 0.0  ;;  %v2054_v8 = vmul.f32 %v5631_v12, %v1937_v62  ;;  %v1952_v4 = vadd.f32 %v4159_v31, %v5556_v25  ;;  %v2573_v25 = vld [vmem:[#allocation9 + $0x350] sm:$0xff]  ;;  %v5775_v62 = vld [vmem:[#allocation3 + $0x50] sm:$0xff] }
 0x278   : > { %v5734_v22 = vadd.f32 %v5637_v50, %v2055_v44  ;;  %2915 = vmatprep.mubr.f32.mxu0 %v2277_v51  ;;  %3293 = vmatpush1.msra.mxu0 %v2575_v48  ;;  %v1946_v7 = vpop.f32.mrf.mxu0  ;;  %v2571_v31 = vld [vmem:[#allocation9 + $0x340] sm:$0xff]  ;;  %v1807_v53 = vadd.f32 %v5625_v15, %v1582_v18 }
 0x279   : > { %3294 = vmatprep.subr.mxu0 %v5596_v33  ;;  %2156 = vst [vmem:[#allocation3 + $0x91] sm:$0xff] %v2123_v37  ;;  %v5743_v54 = vadd.f32 %v5637_v50, %v2054_v8  ;;  %v2057_v11 = vmul.f32 %v5631_v12, %v1952_v4  ;;  %v1947_v58 = vadd.f32 %v1946_v7, %v5552_v3 }
 0x27a   : > { %v2126_v45 = vmax.f32 %v5734_v22, 0.0  ;;  %2701 = vmatmul.mubr.f32.gmra.mxu1 %v2277_v51  ;;  %3295 = vmatpush1.msra.mxu0 %v2574_v46  ;;  %v4162_v36 = vpop.f32.mrf.mxu0 }
 0x27b   : > { %2916 = vmatmul.mubr.f32.gmra.mxu0 %v5747_v32  ;;  %2705 = vmatprep.mubr.f32.mxu1 %v2117_v40  ;;  %v2125_v49 = vmax.f32 %v5743_v54, 0.0  ;;  %v5756_v38 = vadd.f32 %v5637_v50, %v2057_v11  ;;  %v2056_v3 = vmul.f32 %v5631_v12, %v1947_v58  ;;  %v1962_v10 = vadd.f32 %v4162_v36, %v5564_v0  ;;  %v5769_v0 = vld [vmem:[#allocation3 + $0x32] sm:$0xff]  ;;  %v2570_v58 = vld [vmem:[#allocation9 + $0x338] sm:$0xff]  ;;  %v5801_v36 = vld [vmem:[#allocation3 + $0x60] sm:$0xff] }
 0x27c   : > { %2159 = vst [vmem:[#allocation3 + $0xb1] sm:$0xff] %v2126_v45  ;;  %2920 = vmatprep.mubr.f32.mxu0 %v2278_v26  ;;  %3296 = vmatprep.subr.mxu0 %v5596_v33  ;;  %v1956_v13 = vpop.f32.mrf.mxu0 }
 0x27d   : > { %3297 = vmatpush1.msra.mxu0 %v2573_v25  ;;  %2158 = vst [vmem:[#allocation3 + $0xa9] sm:$0xff] %v2125_v49  ;;  %v2128_v40 = vmax.f32 %v5756_v38, 0.0  ;;  %v5765_v63 = vadd.f32 %v5637_v50, %v2056_v3  ;;  %v2059_v17 = vmul.f32 %v5631_v12, %v1962_v10  ;;  %v1957_v48 = vadd.f32 %v1956_v13, %v5560_v55 }
 0x27e   : > { %2706 = vmatmul.mubr.f32.gmra.mxu1 %v2278_v26  ;;  %3298 = vmatprep.subr.mxu0 %v5596_v33  ;;  %v4165_v44 = vpop.f32.mrf.mxu0 }
 0x27f   : > { %2921 = vmatmul.mubr.f32.gmra.mxu0 %v5769_v0  ;;  %2710 = vmatprep.mubr.f32.mxu1 %v2118_v59  ;;  %2161 = vst [vmem:[#allocation3 + $0xc9] sm:$0xff] %v2128_v40  ;;  %v2127_v51 = vmax.f32 %v5765_v63, 0.0  ;;  %v5781_v55 = vadd.f32 %v5637_v50, %v2059_v17  ;;  %v2058_v46 = vmul.f32 %v5631_v12, %v1957_v48 }
 0x280   : > { %v1972_v8 = vadd.f32 %v4165_v44, %v5574_v16  ;;  %2925 = vmatprep.mubr.f32.mxu0 %v5775_v62  ;;  %3299 = vmatpush1.msra.mxu0 %v2572_v56  ;;  %v1966_v34 = vpop.f32.mrf.mxu0  ;;  %v5796_v16 = vld [vmem:[#allocation3 + $0x3a] sm:$0xff] }
 0x281   : > { %3300 = vmatprep.subr.mxu0 %v5596_v33  ;;  %2160 = vst [vmem:[#allocation3 + $0xc1] sm:$0xff] %v2127_v51  ;;  %v2130_v59 = vmax.f32 %v5781_v55, 0.0  ;;  %v5791_v4 = vadd.f32 %v5637_v50, %v2058_v46  ;;  %v1967_v11 = vadd.f32 %v1966_v34, %v5569_v2  ;;  %v2568_v46 = vld [vmem:[#allocation9 + $0x328] sm:$0xff] }
 0x282   : > { %v2061_v7 = vmul.f32 %v5631_v12, %v1972_v8  ;;  %2711 = vmatmul.mubr.f32.gmra.mxu1 %v5775_v62  ;;  %3301 = vmatpush1.msra.mxu0 %v2571_v31  ;;  %v4168_v25 = vpop.f32.mrf.mxu0  ;;  %v5828_v31 = vld [vmem:[#allocation3 + $0x68] sm:$0xff]  ;;  %v5937_v18 = vld [vmem:[#allocation3 + $0x98] sm:$0xff] }
 0x283   : > { %2926 = vmatmul.mubr.f32.gmra.mxu0 %v5796_v16  ;;  %2715 = vmatprep.mubr.f32.mxu1 %v2119_v28  ;;  %2163 = vst [vmem:[#allocation3 + $0xe1] sm:$0xff] %v2130_v59  ;;  %v2129_v26 = vmax.f32 %v5791_v4, 0.0  ;;  %v2060_v3 = vmul.f32 %v5631_v12, %v1967_v11  ;;  %v1982_v10 = vadd.f32 %v4168_v25, %v5582_v27  ;;  %v2569_v28 = vld [vmem:[#allocation9 + $0x330] sm:$0xff]  ;;  %v5822_v27 = vld [vmem:[#allocation3 + $0x4a] sm:$0xff] }
 0x284   : > { %v5807_v2 = vadd.f32 %v5637_v50, %v2061_v7  ;;  %2930 = vmatprep.mubr.f32.mxu0 %v5801_v36  ;;  %3302 = vmatprep.subr.mxu0 %v5596_v33  ;;  %v1976_v20 = vpop.f32.mrf.mxu0 }
 0x285   : > { %3303 = vmatpush1.msra.mxu0 %v2570_v58  ;;  %2162 = vst [vmem:[#allocation3 + $0xd9] sm:$0xff] %v2129_v26  ;;  %v5817_v56 = vadd.f32 %v5637_v50, %v2060_v3  ;;  %v2063_v17 = vmul.f32 %v5631_v12, %v1982_v10  ;;  %v1977_v48 = vadd.f32 %v1976_v20, %v5578_v35  ;;  %v2567_v3 = vld [vmem:[#allocation9 + $0x320] sm:$0xff]  ;;  %v5854_v20 = vld [vmem:[#allocation3 + $0x78] sm:$0xff] }
 0x286   : > { %v2132_v13 = vmax.f32 %v5807_v2, 0.0  ;;  %2716 = vmatmul.mubr.f32.gmra.mxu1 %v5801_v36  ;;  %3304 = vmatprep.subr.mxu0 %v5596_v33  ;;  %v4171_v44 = vpop.f32.mrf.mxu0 }
 0x287   : > { %2931 = vmatmul.mubr.f32.gmra.mxu0 %v5822_v27  ;;  %2720 = vmatprep.mubr.f32.mxu1 %v2120_v23  ;;  %v2131_v35 = vmax.f32 %v5817_v56, 0.0  ;;  %v5834_v8 = vadd.f32 %v5637_v50, %v2063_v17  ;;  %v2062_v34 = vmul.f32 %v5631_v12, %v1977_v48  ;;  %v1992_v7 = vadd.f32 %v4171_v44, %v5590_v9  ;;  %v5849_v9 = vld [vmem:[#allocation3 + $0x52] sm:$0xff] }
 0x288   : > { %2165 = vst [vmem:[#allocation3 + $0xf9] sm:$0xff] %v2132_v13  ;;  %2935 = vmatprep.mubr.f32.mxu0 %v5828_v31  ;;  %3305 = vmatpush1.msra.mxu0 %v2569_v28  ;;  %v1986_v5 = vpop.f32.mrf.mxu0  ;;  %v5991_v22 = vld [vmem:[#allocation3 + $0xc0] sm:$0xff]  ;;  %v6004_v63 = vld [vmem:[#allocation3 + $0xc8] sm:$0xff] }
 0x289   : > { %3306 = vmatprep.subr.mxu0 %v5596_v33  ;;  %2164 = vst [vmem:[#allocation3 + $0xf1] sm:$0xff] %v2131_v35  ;;  %v2134_v23 = vmax.f32 %v5834_v8, 0.0  ;;  %v5844_v11 = vadd.f32 %v5637_v50, %v2062_v34  ;;  %v2065_v58 = vmul.f32 %v5631_v12, %v1992_v7  ;;  %v1987_v25 = vadd.f32 %v1986_v5, %v5586_v39 }
 0x28a   : > { %2721 = vmatmul.mubr.f32.gmra.mxu1 %v5828_v31  ;;  %3307 = vmatpush1.msra.mxu0 %v2568_v46  ;;  %v4174_v10 = vpop.f32.mrf.mxu0 }
 0x28b   : > { %2936 = vmatmul.mubr.f32.gmra.mxu0 %v5849_v9  ;;  %2725 = vmatprep.mubr.f32.mxu1 %v2121_v1  ;;  %2167 = vst [vmem:[#allocation3 + $0x111] sm:$0xff] %v2134_v23  ;;  %v2133_v28 = vmax.f32 %v5844_v11, 0.0  ;;  %v5860_v39 = vadd.f32 %v5637_v50, %v2065_v58  ;;  %v2064_v17 = vmul.f32 %v5631_v12, %v1987_v25  ;;  %v2566_v1 = vld [vmem:[#allocation9 + $0x318] sm:$0xff]  ;;  %v5881_v58 = vld [vmem:[#allocation3 + $0x80] sm:$0xff] }
 0x28c   : > { %v2002_v48 = vadd.f32 %v4174_v10, %v5600_v30  ;;  %2940 = vmatprep.mubr.f32.mxu0 %v5854_v20  ;;  %3308 = vmatprep.subr.mxu0 %v5596_v33  ;;  %v1996_v6 = vpop.f32.mrf.mxu0  ;;  %v5875_v30 = vld [vmem:[#allocation3 + $0x62] sm:$0xff]  ;;  %v6016_v38 = vld [vmem:[#allocation3 + $0xd8] sm:$0xff] }
 0x28d   : > { %3309 = vmatpush1.msra.mxu0 %v2567_v3  ;;  %2166 = vst [vmem:[#allocation3 + $0x109] sm:$0xff] %v2133_v28  ;;  %v2136_v44 = vmax.f32 %v5860_v39, 0.0  ;;  %v5870_v46 = vadd.f32 %v5637_v50, %v2064_v17  ;;  %v1997_v7 = vadd.f32 %v1996_v6, %v5594_v61  ;;  %v2565_v25 = vld [vmem:[#allocation9 + $0x310] sm:$0xff] }
 0x28e   : > { %v2067_v34 = vmul.f32 %v5631_v12, %v2002_v48  ;;  %2726 = vmatmul.mubr.f32.gmra.mxu1 %v5854_v20  ;;  %3310 = vmatprep.subr.mxu0 %v5596_v33  ;;  %v4177_v5 = vpop.f32.mrf.mxu0  ;;  %v6027_v4 = vld [vmem:[#allocation3 + $0xe0] sm:$0xff] }
 0x28f   : > { %2941 = vmatmul.mubr.f32.gmra.mxu0 %v5875_v30  ;;  %2730 = vmatprep.mubr.f32.mxu1 %v2122_v19  ;;  %2169 = vst [vmem:[#allocation3 + $0x129] sm:$0xff] %v2136_v44  ;;  %v2135_v61 = vmax.f32 %v5870_v46, 0.0  ;;  %v2066_v10 = vmul.f32 %v5631_v12, %v1997_v7  ;;  %v2012_v17 = vadd.f32 %v4177_v5, %v5608_v42  ;;  %v5909_v7 = vld [vmem:[#allocation3 + $0x90] sm:$0xff] }
 0x290   : > { %v5887_v3 = vadd.f32 %v5637_v50, %v2067_v34  ;;  %2945 = vmatprep.mubr.f32.mxu0 %v5881_v58  ;;  %3311 = vmatpush1.msra.mxu0 %v2566_v1  ;;  %v2006_v19 = vpop.f32.mrf.mxu0  ;;  %v5904_v1 = vld [vmem:[#allocation3 + $0x6a] sm:$0xff]  ;;  %v6048_v56 = vld [vmem:[#allocation3 + $0xf8] sm:$0xff] }
 0x291   : > { %3312 = vmatprep.subr.mxu0 %v5596_v33  ;;  %2168 = vst [vmem:[#allocation3 + $0x121] sm:$0xff] %v2135_v61  ;;  %v5899_v6 = vadd.f32 %v5637_v50, %v2066_v10  ;;  %v2069_v34 = vmul.f32 %v5631_v12, %v2012_v17  ;;  %v2007_v42 = vadd.f32 %v2006_v19, %v5604_v21  ;;  %v2563_v17 = vld [vmem:[#allocation9 + $0x300] sm:$0xff] }
 0x292   : > { %v6617_v48 = vmax.f32 %v5887_v3, 0.0  ;;  %2731 = vmatmul.mubr.f32.gmra.mxu1 %v5881_v58  ;;  %3313 = vmatpush1.msra.mxu0 %v2565_v25  ;;  %v4180_v60 = vpop.f32.mrf.mxu0  ;;  %v6037_v55 = vld [vmem:[#allocation3 + $0xf0] sm:$0xff] }
 0x293   : > { %2946 = vmatmul.mubr.f32.gmra.mxu0 %v5904_v1  ;;  %2735 = vmatprep.mubr.f32.mxu1 %v2123_v37  ;;  %v2137_v5 = vmax.f32 %v5899_v6, 0.0  ;;  %v5915_v21 = vadd.f32 %v5637_v50, %v2069_v34  ;;  %v2068_v10 = vmul.f32 %v5631_v12, %v2007_v42  ;;  %v2022_v25 = vadd.f32 %v4180_v60, %v5616_v14  ;;  %v5931_v60 = vld [vmem:[#allocation3 + $0x7a] sm:$0xff]  ;;  %v6092_v46 = vld [vmem:[#allocation3 + $0x112] sm:$0xff] }
 0x294   : > { %2171 = vst [vmem:[#allocation3 + $0x141] sm:$0xff] %v6617_v48  ;;  %2950 = vmatprep.mubr.f32.mxu0 %v5909_v7  ;;  %3314 = vmatprep.subr.mxu0 %v5596_v33  ;;  %v2016_v37 = vpop.f32.mrf.mxu0  ;;  %v6058_v2 = vld [vmem:[#allocation3 + $0x108] sm:$0xff]  ;;  %v6069_v11 = vld [vmem:[#allocation3 + $0x110] sm:$0xff] }
 0x295   : > { %3315 = vmatpush1.msra.mxu0 %v2564_v29  ;;  %2170 = vst [vmem:[#allocation3 + $0x139] sm:$0xff] %v2137_v5  ;;  %v6618_v19 = vmax.f32 %v5915_v21, 0.0  ;;  %v5926_v34 = vadd.f32 %v5637_v50, %v2068_v10  ;;  %v2071_v42 = vmul.f32 %v5631_v12, %v2022_v25  ;;  %v2017_v14 = vadd.f32 %v2016_v37, %v5612_v43  ;;  %v2594_v29 = vld [vmem:[#allocation9 + $0x3f8] sm:$0xff] }
 0x296   : > { %2736 = vmatmul.mubr.f32.gmra.mxu1 %v5909_v7  ;;  %3316 = vmatprep.subr.mxu0 %v5596_v33  ;;  %v4183_v15 = vpop.f32.mrf.mxu0  ;;  %v6110_v6 = vld [vmem:[#allocation3 + $0x12a] sm:$0xff] }
 0x297   : > { %2951 = vmatmul.mubr.f32.gmra.mxu0 %v5931_v60  ;;  %2740 = vmatprep.mubr.f32.mxu1 %v2124_v52  ;;  %2173 = vst [vmem:[#allocation3 + $0x159] sm:$0xff] %v6618_v19  ;;  %v2139_v43 = vmax.f32 %v5926_v34, 0.0  ;;  %v5943_v10 = vadd.f32 %v5637_v50, %v2071_v42  ;;  %v2070_v25 = vmul.f32 %v5631_v12, %v2017_v14  ;;  %v5962_v14 = vld [vmem:[#allocation3 + $0xa8] sm:$0xff] }
 0x298   : > { %v2032_v37 = vadd.f32 %v4183_v15, %v1807_v53  ;;  %2955 = vmatprep.mubr.f32.mxu0 %v5937_v18  ;;  %3317 = vmatpush1.msra.mxu0 %v2563_v17  ;;  %v2026_v48 = vpop.f32.mrf.mxu0  ;;  %v5957_v53 = vld [vmem:[#allocation3 + $0x82] sm:$0xff] }
 0x299   : > { %3318 = vmatprep.subr.mxu0 %v5596_v33  ;;  %2172 = vst [vmem:[#allocation3 + $0x151] sm:$0xff] %v2139_v43  ;;  %v2142_v24 = vmax.f32 %v5943_v10, 0.0  ;;  %v5952_v52 = vadd.f32 %v5637_v50, %v2070_v25  ;;  %v2027_v19 = vadd.f32 %v2026_v48, %v5620_v41  ;;  %v2593_v17 = vld [vmem:[#allocation9 + $0x3f0] sm:$0xff]  ;;  %v5975_v25 = vld [vmem:[#allocation3 + $0x92] sm:$0xff] }
 0x29a   : > { %v2073_v42 = vmul.f32 %v5631_v12, %v2032_v37  ;;  %2741 = vmatmul.mubr.f32.gmra.mxu1 %v5937_v18  ;;  %3319 = vmatpush2.msra.mxu0 %v2594_v29  ;;  %v2592_v29 = vld [vmem:[#allocation9 + $0x3e8] sm:$0xff]  ;;  %v6079_v8 = vld [vmem:[#allocation3 + $0x120] sm:$0xff] }
 0x29b   : > { %2956 = vmatmul.mubr.f32.gmra.mxu0 %v5957_v53  ;;  %2745 = vmatprep.mubr.f32.mxu1 %v2125_v49  ;;  %2175 = vst [vmem:[#allocation3 + $0x171] sm:$0xff] %v2142_v24  ;;  %v2141_v15 = vmax.f32 %v5952_v52, 0.0  ;;  %v2072_v48 = vmul.f32 %v5631_v12, %v2027_v19  ;;  %v5981_v12 = vld [vmem:[#allocation3 + $0xb0] sm:$0xff]  ;;  %v6101_v39 = vld [vmem:[#allocation3 + $0x122] sm:$0xff] }
 0x29c   : > { %v2112_v41 = vadd.f32 %v5637_v50, %v2073_v42  ;;  %2960 = vmatprep.mubr.f32.mxu0 %v5962_v14  ;;  %3320 = vmatprep.subr.mxu0 %v5596_v33  ;;  %v2591_v19 = vld [vmem:[#allocation9 + $0x3e0] sm:$0xff]  ;;  %v2590_v42 = vld [vmem:[#allocation9 + $0x3d8] sm:$0xff]  ;;  %v2609_v10 = vld [vmem:[#allocation9 + $0x470] sm:$0xff] }
 0x29d   : > { %3321 = vmatpush2.msra.mxu0 %v2593_v17  ;;  %2174 = vst [vmem:[#allocation3 + $0x169] sm:$0xff] %v2141_v15  ;;  %v2111_v49 = vadd.f32 %v5637_v50, %v2072_v48  ;;  %v5986_v50 = vld [vmem:[#allocation3 + $0x9a] sm:$0xff]  ;;  %v6128_v34 = vld [vmem:[#allocation3 + $0x142] sm:$0xff] }
 0x29e   : > { %v2144_v54 = vmax.f32 %v2112_v41, 0.0  ;;  %2746 = vmatmul.mubr.f32.gmra.mxu1 %v5962_v14  ;;  %3322 = vmatprep.subr.mxu0 %v5596_v33  ;;  %v2589_v17 = vld [vmem:[#allocation9 + $0x3d0] sm:$0xff]  ;;  %v5998_v41 = vld [vmem:[#allocation3 + $0xaa] sm:$0xff] }
 0x29f   : > { %2961 = vmatmul.mubr.f32.gmra.mxu0 %v5975_v25  ;;  %2750 = vmatprep.mubr.f32.mxu1 %v2126_v45  ;;  %v2143_v37 = vmax.f32 %v2111_v49, 0.0  ;;  %v5995_v45 = vpop.f32.mrf.mxu1  ;;  %v2587_v49 = vld [vmem:[#allocation9 + $0x3c0] sm:$0xff]  ;;  %v6146_v52 = vld [vmem:[#allocation3 + $0x15a] sm:$0xff] }
 0x2a0   : > { %2177 = vst [vmem:[#allocation3 + $0x189] sm:$0xff] %v2144_v54  ;;  %2965 = vmatprep.mubr.f32.mxu0 %v5981_v12  ;;  %3323 = vmatpush2.msra.mxu0 %v2592_v29  ;;  %v6011_v54 = vld [vmem:[#allocation3 + $0xb2] sm:$0xff] }
 0x2a1   : > { %3324 = vmatprep.subr.mxu0 %v5596_v33  ;;  %2176 = vst [vmem:[#allocation3 + $0x181] sm:$0xff] %v2143_v37  ;;  %v2679_v48 = vpop.f32.mrf.mxu1  ;;  %v6021_v37 = vld [vmem:[#allocation3 + $0xc2] sm:$0xff] }
 0x2a2   : > { %2751 = vmatmul.mubr.f32.gmra.mxu1 %v5981_v12  ;;  %3325 = vmatpush2.msra.mxu0 %v2591_v19  ;;  %v6042_v48 = vld [vmem:[#allocation3 + $0xda] sm:$0xff] }
 0x2a3   : > { %2966 = vmatmul.mubr.f32.gmra.mxu0 %v5986_v50  ;;  %2755 = vmatprep.mubr.f32.mxu1 %v2127_v51  ;;  %v2588_v51 = vld [vmem:[#allocation9 + $0x3c8] sm:$0xff]  ;;  %v6007_v29 = vpop.f32.mrf.mxu1 }
 0x2a4   : > { %2970 = vmatprep.mubr.f32.mxu0 %v5991_v22  ;;  %3326 = vmatprep.subr.mxu0 %v5596_v33  ;;  %6643 = vst [vmem:[#allocation14_spill] sm:$0xff] %v6007_v29  ;;  %v2606_v29 = vld [vmem:[#allocation9 + $0x458] sm:$0xff] }
 0x2a5   : > { %3327 = vmatpush2.msra.mxu0 %v2590_v42  ;;  %v2684_v19 = vpop.f32.mrf.mxu1  ;;  %v6032_v42 = vld [vmem:[#allocation3 + $0xca] sm:$0xff] }
 0x2a6   : > { %2756 = vmatmul.mubr.f32.gmra.mxu1 %v5991_v22  ;;  %3328 = vmatprep.subr.mxu0 %v5596_v33  ;;  %v6063_v19 = vld [vmem:[#allocation3 + $0xf2] sm:$0xff] }
 0x2a7   : > { %2971 = vmatmul.mubr.f32.gmra.mxu0 %v5998_v41  ;;  %2760 = vmatprep.mubr.f32.mxu1 %v2128_v40  ;;  %v2586_v40 = vld [vmem:[#allocation9 + $0x3b8] sm:$0xff] }
 0x2a8   : > { %2975 = vmatprep.mubr.f32.mxu0 %v6004_v63  ;;  %3329 = vmatpush2.msra.mxu0 %v2589_v17  ;;  %v2584_v17 = vld [vmem:[#allocation9 + $0x3a8] sm:$0xff] }
 0x2a9   : > { %3330 = vmatprep.subr.mxu0 %v5596_v33 }
 0x2aa   : > { %2761 = vmatmul.mubr.f32.gmra.mxu1 %v6004_v63  ;;  %3331 = vmatpush2.msra.mxu0 %v2588_v51  ;;  %v6053_v51 = vld [vmem:[#allocation3 + $0xe2] sm:$0xff] }
 0x2ab   : > { %2976 = vmatmul.mubr.f32.gmra.mxu0 %v6011_v54  ;;  %2765 = vmatprep.mubr.f32.mxu1 %v2129_v26  ;;  %v2585_v26 = vld [vmem:[#allocation9 + $0x3b0] sm:$0xff] }
 0x2ac   : > { %2980 = vmatprep.mubr.f32.mxu0 %v6016_v38  ;;  %3332 = vmatprep.subr.mxu0 %v5596_v33 }
 0x2ad   : > { %3333 = vmatpush2.msra.mxu0 %v2587_v49  ;;  %v2581_v49 = vld [vmem:[#allocation9 + $0x390] sm:$0xff] }
 0x2ae   : > { %2766 = vmatmul.mubr.f32.gmra.mxu1 %v6016_v38  ;;  %3334 = vmatprep.subr.mxu0 %v5596_v33 }
 0x2af   : > { %2981 = vmatmul.mubr.f32.gmra.mxu0 %v6021_v37  ;;  %2770 = vmatprep.mubr.f32.mxu1 %v2130_v59  ;;  %v2583_v59 = vld [vmem:[#allocation9 + $0x3a0] sm:$0xff] }
 0x2b0   : > { %2985 = vmatprep.mubr.f32.mxu0 %v6027_v4  ;;  %3335 = vmatpush2.msra.mxu0 %v2586_v40  ;;  %v6074_v40 = vld [vmem:[#allocation3 + $0xfa] sm:$0xff] }
 0x2b1   : > { %3336 = vmatprep.subr.mxu0 %v5596_v33 }
 0x2b2   : > { %2771 = vmatmul.mubr.f32.gmra.mxu1 %v6027_v4  ;;  %3337 = vmatpush2.msra.mxu0 %v2585_v26  ;;  %v6106_v26 = vld [vmem:[#allocation3 + $0x140] sm:$0xff] }
 0x2b3   : > { %2986 = vmatmul.mubr.f32.gmra.mxu0 %v6032_v42  ;;  %2775 = vmatprep.mubr.f32.mxu1 %v2131_v35  ;;  %v2582_v35 = vld [vmem:[#allocation9 + $0x398] sm:$0xff] }
 0x2b4   : > { %2990 = vmatprep.mubr.f32.mxu0 %v6037_v55  ;;  %3338 = vmatprep.subr.mxu0 %v5596_v33 }
 0x2b5   : > { %3339 = vmatpush2.msra.mxu0 %v2584_v17  ;;  %v6645_v17 = vmax.f32 %v5915_v21, 0.0  ;;  %v6137_v21 = vld [vmem:[#allocation3 + $0x152] sm:$0xff] }
 0x2b6   : > { %2776 = vmatmul.mubr.f32.gmra.mxu1 %v6037_v55  ;;  %3340 = vmatprep.subr.mxu0 %v5596_v33 }
 0x2b7   : > { %2991 = vmatmul.mubr.f32.gmra.mxu0 %v6042_v48  ;;  %2780 = vmatprep.mubr.f32.mxu1 %v2132_v13  ;;  %v2580_v13 = vld [vmem:[#allocation9 + $0x388] sm:$0xff] }
 0x2b8   : > { %2995 = vmatprep.mubr.f32.mxu0 %v6048_v56  ;;  %3341 = vmatpush2.msra.mxu0 %v2583_v59  ;;  %v6124_v59 = vld [vmem:[#allocation3 + $0x158] sm:$0xff] }
 0x2b9   : > { %3342 = vmatprep.subr.mxu0 %v5596_v33 }
 0x2ba   : > { %2781 = vmatmul.mubr.f32.gmra.mxu1 %v6048_v56  ;;  %3343 = vmatpush2.msra.mxu0 %v2582_v35  ;;  %v6142_v35 = vld [vmem:[#allocation3 + $0x170] sm:$0xff] }
 0x2bb   : > { %2996 = vmatmul.mubr.f32.gmra.mxu0 %v6053_v51  ;;  %2785 = vmatprep.mubr.f32.mxu1 %v2133_v28  ;;  %v2579_v28 = vld [vmem:[#allocation9 + $0x380] sm:$0xff] }
 0x2bc   : > { %3000 = vmatprep.mubr.f32.mxu0 %v6058_v2  ;;  %3344 = vmatprep.subr.mxu0 %v5596_v33 }
 0x2bd   : > { %3345 = vmatpush2.msra.mxu0 %v2581_v49  ;;  %v2306_v49 = vld [vmem:[#allocation3 + $0x19] sm:$0xff] }
 0x2be   : > { %2786 = vmatmul.mubr.f32.gmra.mxu1 %v6058_v2  ;;  %3346 = vmatprep.subr.mxu0 %v5596_v33 }
 0x2bf   : > { %3001 = vmatmul.mubr.f32.gmra.mxu0 %v6063_v19  ;;  %2790 = vmatprep.mubr.f32.mxu1 %v2134_v23  ;;  %v6083_v23 = vld [vmem:[#allocation3 + $0x10a] sm:$0xff] }
 0x2c0   : > { %3005 = vmatprep.mubr.f32.mxu0 %v6069_v11  ;;  %3347 = vmatpush2.msra.mxu0 %v2580_v13  ;;  %v6153_v13 = vld [vmem:[#allocation3 + $0x16a] sm:$0xff] }
 0x2c1   : > { %3348 = vmatprep.subr.mxu0 %v5596_v33  ;;  %v6088_v33 = vld [vmem:[#allocation3 + $0x128] sm:$0xff] }
 0x2c2   : > { %2791 = vmatmul.mubr.f32.gmra.mxu1 %v6069_v11  ;;  %3349 = vmatpush2.msra.mxu0 %v2579_v28  ;;  %v2307_v28 = vld [vmem:[#allocation3 + $0x21] sm:$0xff] }
 0x2c3   : > { %3006 = vmatmul.mubr.f32.gmra.mxu0 %v6074_v40  ;;  %2795 = vmatprep.mubr.f32.mxu1 %v2135_v61  ;;  %v6097_v61 = vld [vmem:[#allocation3 + $0x138] sm:$0xff] }
 0x2c4   : > { %3010 = vmatprep.mubr.f32.mxu0 %v6079_v8 }
 0x2c6   : > { %2796 = vmatmul.mubr.f32.gmra.mxu1 %v6079_v8 }
 0x2c7   : > { %3011 = vmatmul.mubr.f32.gmra.mxu0 %v6083_v23  ;;  %2800 = vmatprep.mubr.f32.mxu1 %v2136_v44  ;;  %v6644_v44 = vmax.f32 %v5887_v3, 0.0  ;;  %v6119_v3 = vld [vmem:[#allocation3 + $0x13a] sm:$0xff] }
 0x2c8   : > { %3015 = vmatprep.mubr.f32.mxu0 %v6088_v33 }
 0x2ca   : > { %2801 = vmatmul.mubr.f32.gmra.mxu1 %v6088_v33 }
 0x2cb   : > { %3016 = vmatmul.mubr.f32.gmra.mxu0 %v6092_v46  ;;  %2805 = vmatprep.mubr.f32.mxu1 %v2137_v5  ;;  %v6115_v5 = vld [vmem:[#allocation3 + $0x150] sm:$0xff] }
 0x2cc   : > { %3020 = vmatprep.mubr.f32.mxu0 %v6097_v61 }
 0x2ce   : > { %2806 = vmatmul.mubr.f32.gmra.mxu1 %v6097_v61 }
 0x2cf   : > { %3021 = vmatmul.mubr.f32.gmra.mxu0 %v6101_v39  ;;  %2810 = vmatprep.mubr.f32.mxu1 %v6644_v44  ;;  %v2608_v44 = vld [vmem:[#allocation9 + $0x468] sm:$0xff] }
 0x2d0   : > { %3025 = vmatprep.mubr.f32.mxu0 %v6106_v26 }
 0x2d2   : > { %2811 = vmatmul.mubr.f32.gmra.mxu1 %v6106_v26 }
 0x2d3   : > { %3026 = vmatmul.mubr.f32.gmra.mxu0 %v6110_v6  ;;  %2815 = vmatprep.mubr.f32.mxu1 %v2139_v43  ;;  %v6133_v43 = vld [vmem:[#allocation3 + $0x168] sm:$0xff] }
 0x2d4   : > { %3030 = vmatprep.mubr.f32.mxu0 %v6115_v5 }
 0x2d6   : > { %2816 = vmatmul.mubr.f32.gmra.mxu1 %v6115_v5 }
 0x2d7   : > { %3031 = vmatmul.mubr.f32.gmra.mxu0 %v6119_v3  ;;  %2820 = vmatprep.mubr.f32.mxu1 %v6645_v17  ;;  %v2403_v17 = vld [vmem:[#allocation3 + $0x31] sm:$0xff] }
 0x2d8   : > { %3035 = vmatprep.mubr.f32.mxu0 %v6124_v59 }
 0x2da   : > { %2821 = vmatmul.mubr.f32.gmra.mxu1 %v6124_v59 }
 0x2db   : > { %3036 = vmatmul.mubr.f32.gmra.mxu0 %v6128_v34  ;;  %2825 = vmatprep.mubr.f32.mxu1 %v2141_v15  ;;  %v6149_v15 = vld [vmem:[#allocation3 + $0x180] sm:$0xff] }
 0x2dc   : > { %3040 = vmatprep.mubr.f32.mxu0 %v6133_v43 }
 0x2de   : > { %2826 = vmatmul.mubr.f32.gmra.mxu1 %v6133_v43 }
 0x2df   : > { %3041 = vmatmul.mubr.f32.gmra.mxu0 %v6137_v21  ;;  %2830 = vmatprep.mubr.f32.mxu1 %v2142_v24  ;;  %v6156_v24 = vld [vmem:[#allocation3 + $0x188] sm:$0xff] }
 0x2e0   : > { %3045 = vmatprep.mubr.f32.mxu0 %v6142_v35 }
 0x2e2   : > { %2831 = vmatmul.mubr.f32.gmra.mxu1 %v6142_v35 }
 0x2e3   : > { %3046 = vmatmul.mubr.f32.gmra.mxu0 %v6146_v52  ;;  %3125 = vmatprep.mubr.f32.mxu1 %v5724_v47  ;;  %v6161_v47 = vld [vmem:[#allocation3 + $0x172] sm:$0xff] }
 0x2e4   : > { %3050 = vmatprep.mubr.f32.mxu0 %v6149_v15 }
 0x2e6   : > { %3126 = vmatmul.mubr.f32.vlgmr.msra.gmra.mxu1 %v2306_v49  ;;  %v2607_v49 = vld [vmem:[#allocation9 + $0x460] sm:$0xff] }
 0x2e7   : > { %3051 = vmatmul.mubr.f32.gmra.mxu0 %v6153_v13  ;;  %3130 = vmatprep.mubr.f32.mxu1 %v5747_v32  ;;  %v2371_v32 = vld [vmem:[#allocation3 + $0x30] sm:$0xff] }
 0x2e8   : > { %3055 = vmatprep.mubr.f32.mxu0 %v6156_v24  ;;  %4185 = vmatpush3.msra.mxu1 %v5658_v57  ;;  %v2404_v57 = vld [vmem:[#allocation3 + $0x39] sm:$0xff] }
 0x2e9   : > { %4186 = vmatprep.subr.mxu1 %v2609_v10 }
 0x2ea   : > { %3131 = vmatmul.mubr.f32.gmra.mxu1 %v2307_v28  ;;  %v2372_v28 = vld [vmem:[#allocation3 + $0x38] sm:$0xff] }
 0x2eb   : > { %3056 = vmatmul.mubr.f32.gmra.mxu0 %v6161_v47  ;;  %3135 = vmatprep.mubr.f32.mxu1 %v5769_v0  ;;  %v2405_v0 = vld [vmem:[#allocation3 + $0x49] sm:$0xff] }
 0x2ec   : > { %3350 = vmatprep.mubr.f32.mxu0 %v2403_v17  ;;  %4187 = vmatpush3.msra.mxu1 %v2609_v10  ;;  %v2373_v10 = vld [vmem:[#allocation3 + $0x48] sm:$0xff] }
 0x2ed   : > { %4188 = vmatprep.subr.mxu1 %v2608_v44 }
 0x2ee   : > { %3136 = vmatmul.mubr.f32.gmra.mxu1 %v2403_v17  ;;  %v2605_v17 = vld [vmem:[#allocation9 + $0x450] sm:$0xff] }
 0x2ef   : > { %3351 = vmatmul.mubr.f32.vlgmr.msra.gmra.mxu0 %v2371_v32  ;;  %3140 = vmatprep.mubr.f32.mxu1 %v5796_v16  ;;  %v2406_v16 = vld [vmem:[#allocation3 + $0x51] sm:$0xff] }
 0x2f0   : > { %3355 = vmatprep.mubr.f32.mxu0 %v2404_v57  ;;  %4189 = vmatpush3.msra.mxu1 %v2608_v44  ;;  %v2604_v44 = vld [vmem:[#allocation9 + $0x448] sm:$0xff]  ;;  %v2603_v32 = vld [vmem:[#allocation9 + $0x440] sm:$0xff] }
 0x2f1   : > { %4190 = vmatprep.subr.mxu1 %v2607_v49 }
 0x2f2   : > { %3141 = vmatmul.mubr.f32.gmra.mxu1 %v2404_v57 }
 0x2f3   : > { %3356 = vmatmul.mubr.f32.gmra.mxu0 %v2372_v28  ;;  %3145 = vmatprep.mubr.f32.mxu1 %v5822_v27  ;;  %v2407_v27 = vld [vmem:[#allocation3 + $0x61] sm:$0xff] }
 0x2f4   : > { %3360 = vmatprep.mubr.f32.mxu0 %v2405_v0  ;;  %4191 = vmatpush3.msra.mxu1 %v2607_v49 }
 0x2f5   : > { %4192 = vmatprep.subr.mxu1 %v2606_v29 }
 0x2f6   : > { %3146 = vmatmul.mubr.f32.gmra.mxu1 %v2405_v0 }
 0x2f7   : > { %3361 = vmatmul.mubr.f32.gmra.mxu0 %v2373_v10  ;;  %3150 = vmatprep.mubr.f32.mxu1 %v5849_v9  ;;  %v2408_v9 = vld [vmem:[#allocation3 + $0x69] sm:$0xff] }
 0x2f8   : > { %3365 = vmatprep.mubr.f32.mxu0 %v2406_v16  ;;  %4193 = vmatpush3.msra.mxu1 %v2606_v29  ;;  %v2602_v29 = vld [vmem:[#allocation9 + $0x438] sm:$0xff] }
 0x2f9   : > { %4194 = vmatprep.subr.mxu1 %v2605_v17 }
 0x2fa   : > { %3151 = vmatmul.mubr.f32.gmra.mxu1 %v2406_v16  ;;  %v2423_v16 = vld [vmem:[#allocation3 + $0x121] sm:$0xff] }
 0x2fb   : > { %3366 = vmatmul.mubr.f32.gmra.mxu0 %v5775_v62  ;;  %3155 = vmatprep.mubr.f32.mxu1 %v5875_v30  ;;  %v2409_v62 = vld [vmem:[#allocation3 + $0x79] sm:$0xff] }
 0x2fc   : > { %3370 = vmatprep.mubr.f32.mxu0 %v2407_v27  ;;  %4195 = vmatpush3.msra.mxu1 %v2605_v17  ;;  %v2601_v30 = vld [vmem:[#allocation9 + $0x430] sm:$0xff] }
 0x2fd   : > { %4196 = vmatprep.subr.mxu1 %v2604_v44 }
 0x2fe   : > { %3156 = vmatmul.mubr.f32.gmra.mxu1 %v2407_v27 }
 0x2ff   : > { %3371 = vmatmul.mubr.f32.gmra.mxu0 %v5801_v36  ;;  %3160 = vmatprep.mubr.f32.mxu1 %v5904_v1  ;;  %v2410_v36 = vld [vmem:[#allocation3 + $0x81] sm:$0xff]  ;;  %v2600_v1 = vld [vmem:[#allocation9 + $0x428] sm:$0xff] }
 0x300   : > { %3375 = vmatprep.mubr.f32.mxu0 %v2408_v9  ;;  %4197 = vmatpush3.msra.mxu1 %v2604_v44 }
 0x301   : > { %4198 = vmatprep.subr.mxu1 %v2603_v32 }
 0x302   : > { %3161 = vmatmul.mubr.f32.gmra.mxu1 %v2408_v9  ;;  %v2424_v9 = vld [vmem:[#allocation3 + $0x129] sm:$0xff] }
 0x303   : > { %3376 = vmatmul.mubr.f32.gmra.mxu0 %v5828_v31  ;;  %3165 = vmatprep.mubr.f32.mxu1 %v5931_v60  ;;  %v2411_v31 = vld [vmem:[#allocation3 + $0x91] sm:$0xff] }
 0x304   : > { %3380 = vmatprep.mubr.f32.mxu0 %v2409_v62  ;;  %4199 = vmatpush3.msra.mxu1 %v2603_v32  ;;  %v2599_v60 = vld [vmem:[#allocation9 + $0x420] sm:$0xff] }
 0x305   : > { %4200 = vmatprep.subr.mxu1 %v2602_v29 }
 0x306   : > { %3166 = vmatmul.mubr.f32.gmra.mxu1 %v2409_v62 }
 0x307   : > { %3381 = vmatmul.mubr.f32.gmra.mxu0 %v5854_v20  ;;  %3170 = vmatprep.mubr.f32.mxu1 %v5957_v53  ;;  %v2412_v20 = vld [vmem:[#allocation3 + $0x99] sm:$0xff]  ;;  %v2598_v53 = vld [vmem:[#allocation9 + $0x418] sm:$0xff] }
 0x308   : > { %3385 = vmatprep.mubr.f32.mxu0 %v2410_v36  ;;  %4201 = vmatpush3.msra.mxu1 %v2602_v29 }
 0x309   : > { %4202 = vmatprep.subr.mxu1 %v2601_v30 }
 0x30a   : > { %3171 = vmatmul.mubr.f32.gmra.mxu1 %v2410_v36  ;;  %v2425_v36 = vld [vmem:[#allocation3 + $0x139] sm:$0xff] }
 0x30b   : > { %3386 = vmatmul.mubr.f32.gmra.mxu0 %v5881_v58  ;;  %3175 = vmatprep.mubr.f32.mxu1 %v5975_v25  ;;  %v2413_v58 = vld [vmem:[#allocation3 + $0xa9] sm:$0xff]  ;;  %v2597_v25 = vld [vmem:[#allocation9 + $0x410] sm:$0xff] }
 0x30c   : > { %3390 = vmatprep.mubr.f32.mxu0 %v2411_v31  ;;  %4203 = vmatpush3.msra.mxu1 %v2601_v30 }
 0x30d   : > { %4204 = vmatprep.subr.mxu1 %v2600_v1 }
 0x30e   : > { %3176 = vmatmul.mubr.f32.gmra.mxu1 %v2411_v31 }
 0x30f   : > { %3391 = vmatmul.mubr.f32.gmra.mxu0 %v5909_v7  ;;  %3180 = vmatprep.mubr.f32.mxu1 %v5986_v50  ;;  %v2414_v7 = vld [vmem:[#allocation3 + $0xb1] sm:$0xff] }
 0x310   : > { %3395 = vmatprep.mubr.f32.mxu0 %v2412_v20  ;;  %4205 = vmatpush3.msra.mxu1 %v2600_v1  ;;  %v2596_v50 = vld [vmem:[#allocation9 + $0x408] sm:$0xff] }
 0x311   : > { %4206 = vmatprep.subr.mxu1 %v2599_v60 }
 0x312   : > { %3181 = vmatmul.mubr.f32.gmra.mxu1 %v2412_v20  ;;  %v2426_v20 = vld [vmem:[#allocation3 + $0x141] sm:$0xff] }
 0x313   : > { %3396 = vmatmul.mubr.f32.gmra.mxu0 %v5937_v18  ;;  %3185 = vmatprep.mubr.f32.mxu1 %v5998_v41  ;;  %v2415_v18 = vld [vmem:[#allocation3 + $0xc1] sm:$0xff]  ;;  %v2595_v41 = vld [vmem:[#allocation9 + $0x400] sm:$0xff] }
 0x314   : > { %3400 = vmatprep.mubr.f32.mxu0 %v2413_v58  ;;  %4207 = vmatpush3.msra.mxu1 %v2599_v60 }
 0x315   : > { %4208 = vmatprep.subr.mxu1 %v2598_v53 }
 0x316   : > { %3186 = vmatmul.mubr.f32.gmra.mxu1 %v2413_v58 }
 0x317   : > { %3401 = vmatmul.mubr.f32.gmra.mxu0 %v5962_v14  ;;  %3190 = vmatprep.mubr.f32.mxu1 %v6011_v54  ;;  %v2416_v14 = vld [vmem:[#allocation3 + $0xc9] sm:$0xff]  ;;  %v2419_v54 = vld [vmem:[#allocation3 + $0xf1] sm:$0xff] }
 0x318   : > { %3405 = vmatprep.mubr.f32.mxu0 %v2414_v7  ;;  %4209 = vmatpush3.msra.mxu1 %v2598_v53 }
 0x319   : > { %4210 = vmatprep.subr.mxu1 %v2597_v25 }
 0x31a   : > { %3191 = vmatmul.mubr.f32.gmra.mxu1 %v2414_v7  ;;  %v2427_v7 = vld [vmem:[#allocation3 + $0x151] sm:$0xff] }
 0x31b   : > { %3406 = vmatmul.mubr.f32.gmra.mxu0 %v5981_v12  ;;  %3195 = vmatprep.mubr.f32.mxu1 %v6021_v37  ;;  %v2417_v12 = vld [vmem:[#allocation3 + $0xd9] sm:$0xff] }
 0x31c   : > { %3410 = vmatprep.mubr.f32.mxu0 %v2415_v18  ;;  %4211 = vmatpush3.msra.mxu1 %v2597_v25 }
 0x31d   : > { %4212 = vmatprep.subr.mxu1 %v2596_v50 }
 0x31e   : > { %3196 = vmatmul.mubr.f32.gmra.mxu1 %v2415_v18 }
 0x31f   : > { %3411 = vmatmul.mubr.f32.gmra.mxu0 %v5991_v22  ;;  %3200 = vmatprep.mubr.f32.mxu1 %v6032_v42  ;;  %v2418_v22 = vld [vmem:[#allocation3 + $0xe1] sm:$0xff] }
 0x320   : > { %3415 = vmatprep.mubr.f32.mxu0 %v2416_v14  ;;  %4213 = vmatpush3.msra.mxu1 %v2596_v50 }
 0x321   : > { %4214 = vmatprep.subr.mxu1 %v2595_v41 }
 0x322   : > { %3201 = vmatmul.mubr.f32.gmra.mxu1 %v2416_v14  ;;  %v2428_v14 = vld [vmem:[#allocation3 + $0x159] sm:$0xff] }
 0x323   : > { %3416 = vmatmul.mubr.f32.gmra.mxu0 %v6004_v63  ;;  %3205 = vmatprep.mubr.f32.mxu1 %v6042_v48 }
 0x324   : > { %3420 = vmatprep.mubr.f32.mxu0 %v2417_v12  ;;  %4215 = vmatpush3.msra.mxu1 %v2595_v41 }
 0x326   : > { %3206 = vmatmul.mubr.f32.gmra.mxu1 %v2417_v12 }
 0x327   : > { %3421 = vmatmul.mubr.f32.gmra.mxu0 %v6016_v38  ;;  %3210 = vmatprep.mubr.f32.mxu1 %v6053_v51  ;;  %v2420_v38 = vld [vmem:[#allocation3 + $0xf9] sm:$0xff] }
 0x328   : > { %3425 = vmatprep.mubr.f32.mxu0 %v2418_v22 }
 0x32a   : > { %3211 = vmatmul.mubr.f32.gmra.mxu1 %v2418_v22 }
 0x32b   : > { %3426 = vmatmul.mubr.f32.gmra.mxu0 %v6027_v4  ;;  %3215 = vmatprep.mubr.f32.mxu1 %v6063_v19  ;;  %v2421_v4 = vld [vmem:[#allocation3 + $0x109] sm:$0xff] }
 0x32c   : > { %3430 = vmatprep.mubr.f32.mxu0 %v2419_v54 }
 0x32e   : > { %v2687_v63 = vpop.f32.mrf.mxu1  ;;  %3216 = vmatmul.mubr.f32.gmra.mxu1 %v2419_v54  ;;  %v6194_v37 = vpop.f32.mrf.mxu0 }
 0x32f   : > { %3431 = vmatmul.mubr.f32.gmra.mxu0 %v6037_v55  ;;  %3220 = vmatprep.mubr.f32.mxu1 %v6074_v40  ;;  %v2422_v40 = vld [vmem:[#allocation3 + $0x111] sm:$0xff] }
 0x330   : > { %3435 = vmatprep.mubr.f32.mxu0 %v2420_v38  ;;  %v2689_v42 = vpop.f32.mrf.mxu1  ;;  %v2904_v48 = vpop.f32.mrf.mxu0 }
 0x332   : > { %v2692_v51 = vpop.f32.mrf.mxu1  ;;  %3221 = vmatmul.mubr.f32.gmra.mxu1 %v2420_v38 }
 0x333   : > { %v6198_v49 = vpop.f32.mrf.mxu0  ;;  %3436 = vmatmul.mubr.f32.gmra.mxu0 %v6048_v56  ;;  %3225 = vmatprep.mubr.f32.mxu1 %v6083_v23 }
 0x334   : > { %3440 = vmatprep.mubr.f32.mxu0 %v2421_v4  ;;  %v2694_v19 = vpop.f32.mrf.mxu1 }
 0x335   : > { %v2909_v57 = vpop.f32.mrf.mxu0 }
 0x336   : > { %v2697_v28 = vpop.f32.mrf.mxu1  ;;  %3226 = vmatmul.mubr.f32.gmra.mxu1 %v2421_v4 }
 0x337   : > { %v2912_v55 = vpop.f32.mrf.mxu0  ;;  %3441 = vmatmul.mubr.f32.gmra.mxu0 %v6058_v2  ;;  %3230 = vmatprep.mubr.f32.mxu1 %v6092_v46 }
 0x338   : > { %v6204_v0 = vadd.f32 %v2912_v55, %v2687_v63  ;;  %3445 = vmatprep.mubr.f32.mxu0 %v2422_v40  ;;  %v2699_v10 = vpop.f32.mrf.mxu1  ;;  %v2429_v63 = vld [vmem:[#allocation3 + $0x169] sm:$0xff] }
 0x339   : > { %v2914_v17 = vpop.f32.mrf.mxu0 }
 0x33a   : > { %v2702_v56 = vpop.f32.mrf.mxu1  ;;  %3231 = vmatmul.mubr.f32.gmra.mxu1 %v2422_v40  ;;  %v2431_v40 = vld [vmem:[#allocation3 + $0x181] sm:$0xff] }
 0x33b   : > { %v2917_v23 = vpop.f32.mrf.mxu0  ;;  %3446 = vmatmul.mubr.f32.gmra.mxu0 %v6069_v11  ;;  %3235 = vmatprep.mubr.f32.mxu1 %v6101_v39 }
 0x33c   : > { %v6208_v44 = vadd.f32 %v2917_v23, %v2692_v51  ;;  %3450 = vmatprep.mubr.f32.mxu0 %v2423_v16  ;;  %v2704_v2 = vpop.f32.mrf.mxu1  ;;  %v2430_v51 = vld [vmem:[#allocation3 + $0x171] sm:$0xff] }
 0x33d   : > { %v2919_v27 = vpop.f32.mrf.mxu0  ;;  %v6244_v23 = vld [vmem:[#allocation3 + $0x18a] sm:$0xff] }
 0x33e   : > { %v2707_v46 = vpop.f32.mrf.mxu1  ;;  %3236 = vmatmul.mubr.f32.gmra.mxu1 %v2423_v16  ;;  %v2432_v2 = vld [vmem:[#allocation3 + $0x189] sm:$0xff] }
 0x33f   : > { %v2922_v32 = vpop.f32.mrf.mxu0  ;;  %3451 = vmatmul.mubr.f32.gmra.mxu0 %v6079_v8  ;;  %3240 = vmatprep.mubr.f32.mxu1 %v6110_v6 }
 0x340   : > { %v6212_v29 = vadd.f32 %v2922_v32, %v2697_v28  ;;  %3455 = vmatprep.mubr.f32.mxu0 %v2424_v9  ;;  %v2709_v11 = vpop.f32.mrf.mxu1  ;;  %v6238_v28 = vld [vmem:[#allocation3 + $0x182] sm:$0xff]  ;;  %v2433_v32 = vld [vmem:[#allocation3 + $0x199] sm:$0xff] }
 0x341   : > { %v2924_v62 = vpop.f32.mrf.mxu0  ;;  %v2435_v11 = vld [vmem:[#allocation3 + $0x32] sm:$0xff] }
 0x342   : > { %v2712_v39 = vpop.f32.mrf.mxu1  ;;  %3241 = vmatmul.mubr.f32.gmra.mxu1 %v2424_v9 }
 0x343   : > { %v2927_v30 = vpop.f32.mrf.mxu0  ;;  %3456 = vmatmul.mubr.f32.gmra.mxu0 %v6088_v33  ;;  %3245 = vmatprep.mubr.f32.mxu1 %v6119_v3 }
 0x344   : > { %v6216_v1 = vadd.f32 %v2927_v30, %v2702_v56  ;;  %3460 = vmatprep.mubr.f32.mxu0 %v2425_v36  ;;  %v2714_v8 = vpop.f32.mrf.mxu1 }
 0x345   : > { %v2929_v31 = vpop.f32.mrf.mxu0  ;;  %v2436_v8 = vld [vmem:[#allocation3 + $0x3a] sm:$0xff] }
 0x346   : > { %v2717_v6 = vpop.f32.mrf.mxu1  ;;  %3246 = vmatmul.mubr.f32.gmra.mxu1 %v2425_v36  ;;  %v2434_v31 = vld [vmem:[#allocation3 + $0x1a1] sm:$0xff] }
 0x347   : > { %v2932_v60 = vpop.f32.mrf.mxu0  ;;  %3461 = vmatmul.mubr.f32.gmra.mxu0 %v6097_v61  ;;  %3250 = vmatprep.mubr.f32.mxu1 %v6128_v34 }
 0x348   : > { %v6220_v53 = vadd.f32 %v2932_v60, %v2707_v46  ;;  %3465 = vmatprep.mubr.f32.mxu0 %v2426_v20  ;;  %v2719_v33 = vpop.f32.mrf.mxu1  ;;  %v2437_v60 = vld [vmem:[#allocation3 + $0x4a] sm:$0xff] }
 0x349   : > { %v2934_v58 = vpop.f32.mrf.mxu0 }
 0x34a   : > { %v2722_v3 = vpop.f32.mrf.mxu1  ;;  %3251 = vmatmul.mubr.f32.gmra.mxu1 %v2426_v20 }
 0x34b   : > { %v2937_v25 = vpop.f32.mrf.mxu0  ;;  %3466 = vmatmul.mubr.f32.gmra.mxu0 %v6106_v26  ;;  %3255 = vmatprep.mubr.f32.mxu1 %v6137_v21 }
 0x34c   : > { %v6224_v50 = vadd.f32 %v2937_v25, %v2712_v39  ;;  %3470 = vmatprep.mubr.f32.mxu0 %v2427_v7  ;;  %v2724_v61 = vpop.f32.mrf.mxu1 }
 0x34d   : > { %v2939_v18 = vpop.f32.mrf.mxu0 }
 0x34e   : > { %v2727_v34 = vpop.f32.mrf.mxu1  ;;  %3256 = vmatmul.mubr.f32.gmra.mxu1 %v2427_v7  ;;  %v2439_v7 = vld [vmem:[#allocation3 + $0x62] sm:$0xff]  ;;  %v4371_v18 = vld [vmem:[#allocation2 + $0x8] sm:$0xff] }
 0x34f   : > { %v2942_v41 = vpop.f32.mrf.mxu0  ;;  %3471 = vmatmul.mubr.f32.gmra.mxu0 %v6115_v5  ;;  %3260 = vmatprep.mubr.f32.mxu1 %v6146_v52 }
 0x350   : > { %v6228_v12 = vadd.f32 %v2942_v41, %v2717_v6  ;;  %3475 = vmatprep.mubr.f32.mxu0 %v2428_v14  ;;  %v2729_v26 = vpop.f32.mrf.mxu1 }
 0x351   : > { %v2944_v22 = vpop.f32.mrf.mxu0  ;;  %v2440_v26 = vld [vmem:[#allocation3 + $0x6a] sm:$0xff] }
 0x352   : > { %v2732_v21 = vpop.f32.mrf.mxu1  ;;  %3261 = vmatmul.mubr.f32.gmra.mxu1 %v2428_v14 }
 0x353   : > { %v2947_v54 = vpop.f32.mrf.mxu0  ;;  %3476 = vmatmul.mubr.f32.gmra.mxu0 %v6124_v59  ;;  %3265 = vmatprep.mubr.f32.mxu1 %v6153_v13 }
 0x354   : > { %v6232_v38 = vadd.f32 %v2947_v54, %v2722_v3  ;;  %3480 = vmatprep.mubr.f32.mxu0 %v2429_v63  ;;  %v2734_v5 = vpop.f32.mrf.mxu1  ;;  %v2438_v3 = vld [vmem:[#allocation3 + $0x52] sm:$0xff] }
 0x355   : > { %v2949_v42 = vpop.f32.mrf.mxu0 }
 0x356   : > { %v2737_v52 = vpop.f32.mrf.mxu1  ;;  %3266 = vmatmul.mubr.f32.gmra.mxu1 %v2429_v63 }
 0x357   : > { %v2952_v48 = vpop.f32.mrf.mxu0  ;;  %3481 = vmatmul.mubr.f32.gmra.mxu0 %v6133_v43  ;;  %3270 = vmatprep.mubr.f32.mxu1 %v6161_v47 }
 0x358   : > { %v6236_v4 = vadd.f32 %v2952_v48, %v2727_v34  ;;  %3485 = vmatprep.mubr.f32.mxu0 %v2430_v51  ;;  %v2739_v59 = vpop.f32.mrf.mxu1 }
 0x359   : > { %v2954_v19 = vpop.f32.mrf.mxu0 }
 0x35a   : > { %v2742_v57 = vpop.f32.mrf.mxu1  ;;  %3271 = vmatmul.mubr.f32.gmra.mxu1 %v2430_v51  ;;  %v2443_v51 = vld [vmem:[#allocation3 + $0x92] sm:$0xff] }
 0x35b   : > { %v2957_v55 = vpop.f32.mrf.mxu0  ;;  %3486 = vmatmul.mubr.f32.gmra.mxu0 %v6142_v35  ;;  %3275 = vmatprep.mubr.f32.mxu1 %v6238_v28 }
 0x35c   : > { %v6242_v10 = vadd.f32 %v2957_v55, %v2732_v21  ;;  %3490 = vmatprep.mubr.f32.mxu0 %v2431_v40  ;;  %v2744_v43 = vpop.f32.mrf.mxu1  ;;  %v2441_v21 = vld [vmem:[#allocation3 + $0x7a] sm:$0xff] }
 0x35d   : > { %v2959_v17 = vpop.f32.mrf.mxu0 }
 0x35e   : > { %v2747_v56 = vpop.f32.mrf.mxu1  ;;  %3276 = vmatmul.mubr.f32.gmra.mxu1 %v2431_v40  ;;  %v2444_v40 = vld [vmem:[#allocation3 + $0x9a] sm:$0xff]  ;;  %v2445_v17 = vld [vmem:[#allocation3 + $0xaa] sm:$0xff] }
 0x35f   : > { %v2962_v16 = vpop.f32.mrf.mxu0  ;;  %3491 = vmatmul.mubr.f32.gmra.mxu0 %v6149_v15  ;;  %3280 = vmatprep.mubr.f32.mxu1 %v6244_v23  ;;  %v2401_v15 = vld [vmem:[#allocation3 + $0x198] sm:$0xff] }
 0x360   : > { %v6248_v27 = vadd.f32 %v2962_v16, %v2737_v52  ;;  %3495 = vmatprep.mubr.f32.mxu0 %v2432_v2  ;;  %v2749_v35 = vpop.f32.mrf.mxu1  ;;  %v2442_v52 = vld [vmem:[#allocation3 + $0x82] sm:$0xff] }
 0x361   : > { %v2964_v46 = vpop.f32.mrf.mxu0 }
 0x362   : > { %v2752_v9 = vpop.f32.mrf.mxu1  ;;  %3281 = vmatmul.mubr.f32.gmra.mxu1 %v2432_v2  ;;  %v2446_v46 = vld [vmem:[#allocation3 + $0xb2] sm:$0xff] }
 0x363   : > { %v2967_v62 = vpop.f32.mrf.mxu0  ;;  %3496 = vmatmul.mubr.f32.gmra.mxu0 %v6156_v24  ;;  %4216 = vmatprep.mubr.f32.mxu1 %v2435_v11 }
 0x364   : > { %v6251_v39 = vadd.f32 %v2967_v62, %v2742_v57  ;;  %v2754_v30 = vpop.f32.mrf.mxu1  ;;  %3500 = vmatprep.mubr.f32.mxu0 %v2433_v32 }
 0x365   : > { %v2969_v36 = vpop.f32.mrf.mxu0 }
 0x366   : > { %v2757_v6 = vpop.f32.mrf.mxu1  ;;  %4217 = vmatmul.mubr.f32.vlgmr.msra.gmra.mxu1 %v2436_v8  ;;  %v2448_v36 = vld [vmem:[#allocation3 + $0xca] sm:$0xff] }
 0x367   : > { %v2972_v20 = vpop.f32.mrf.mxu0  ;;  %3501 = vmatmul.mubr.f32.gmra.mxu0 %v2401_v15  ;;  %4219 = vmatprep.mubr.f32.mxu1 %v2437_v60 }
 0x368   : > { %v6253_v33 = vadd.f32 %v2972_v20, %v2747_v56  ;;  %v2759_v58 = vpop.f32.mrf.mxu1  ;;  %3505 = vmatprep.mubr.f32.mxu0 %v2434_v31  ;;  %v2449_v31 = vld [vmem:[#allocation3 + $0xda] sm:$0xff] }
 0x369   : > { %v2974_v24 = vpop.f32.mrf.mxu0 }
 0x36a   : > { %v2762_v25 = vpop.f32.mrf.mxu1  ;;  %4220 = vmatmul.mubr.f32.gmra.mxu1 %v2438_v3  ;;  %v2450_v24 = vld [vmem:[#allocation3 + $0xe2] sm:$0xff] }
 0x36b   : > { %v2977_v61 = vpop.f32.mrf.mxu0  ;;  %3506 = vmatmul.mubr.f32.gmra.mxu0 %v4371_v18  ;;  %4222 = vmatprep.mubr.f32.mxu1 %v2439_v7 }
 0x36c   : > { %v6255_v34 = vadd.f32 %v2977_v61, %v2752_v9  ;;  %v2764_v41 = vpop.f32.mrf.mxu1  ;;  %v2447_v9 = vld [vmem:[#allocation3 + $0xc2] sm:$0xff] }
 0x36d   : > { %v2979_v14 = vpop.f32.mrf.mxu0 }
 0x36e   : > { %v2767_v22 = vpop.f32.mrf.mxu1  ;;  %4223 = vmatmul.mubr.f32.gmra.mxu1 %v2440_v26  ;;  %v2452_v14 = vld [vmem:[#allocation3 + $0xfa] sm:$0xff] }
 0x36f   : > { %v2982_v54 = vpop.f32.mrf.mxu0  ;;  %4225 = vmatprep.mubr.f32.mxu1 %v2441_v21 }
 0x370   : > { %v6257_v63 = vadd.f32 %v2982_v54, %v2757_v6  ;;  %v2769_v5 = vpop.f32.mrf.mxu1 }
 0x371   : > { %v2984_v42 = vpop.f32.mrf.mxu0 }
 0x372   : > { %v2772_v48 = vpop.f32.mrf.mxu1  ;;  %4226 = vmatmul.mubr.f32.gmra.mxu1 %v2442_v52  ;;  %v2454_v52 = vld [vmem:[#allocation3 + $0x112] sm:$0xff] }
 0x373   : > { %v2987_v59 = vpop.f32.mrf.mxu0  ;;  %4228 = vmatprep.mubr.f32.mxu1 %v2443_v51  ;;  %v2455_v51 = vld [vmem:[#allocation3 + $0x122] sm:$0xff] }
 0x374   : > { %v6259_v19 = vadd.f32 %v2987_v59, %v2762_v25  ;;  %v2774_v57 = vpop.f32.mrf.mxu1  ;;  %v2451_v25 = vld [vmem:[#allocation3 + $0xf2] sm:$0xff] }
 0x375   : > { %v2989_v55 = vpop.f32.mrf.mxu0 }
 0x376   : > { %v2777_v43 = vpop.f32.mrf.mxu1  ;;  %4229 = vmatmul.mubr.f32.gmra.mxu1 %v2444_v40 }
 0x377   : > { %v2992_v56 = vpop.f32.mrf.mxu0  ;;  %4231 = vmatprep.mubr.f32.mxu1 %v2445_v17 }
 0x378   : > { %v6261_v16 = vadd.f32 %v2992_v56, %v2767_v22  ;;  %v2779_v2 = vpop.f32.mrf.mxu1  ;;  %v2453_v22 = vld [vmem:[#allocation3 + $0x10a] sm:$0xff]  ;;  %v2457_v56 = vld [vmem:[#allocation3 + $0x13a] sm:$0xff] }
 0x379   : > { %v2994_v35 = vpop.f32.mrf.mxu0 }
 0x37a   : > { %v2782_v32 = vpop.f32.mrf.mxu1  ;;  %4232 = vmatmul.mubr.f32.gmra.mxu1 %v2446_v46 }
 0x37b   : > { %v2997_v11 = vpop.f32.mrf.mxu0  ;;  %4234 = vmatprep.mubr.f32.mxu1 %v2447_v9  ;;  %v2458_v9 = vld [vmem:[#allocation3 + $0x142] sm:$0xff] }
 0x37c   : > { %v6263_v62 = vadd.f32 %v2997_v11, %v2772_v48  ;;  %v2784_v30 = vpop.f32.mrf.mxu1 }
 0x37d   : > { %v2999_v15 = vpop.f32.mrf.mxu0  ;;  %v2459_v30 = vld [vmem:[#allocation3 + $0x152] sm:$0xff] }
 0x37e   : > { %v2787_v8 = vpop.f32.mrf.mxu1  ;;  %4235 = vmatmul.mubr.f32.gmra.mxu1 %v2448_v36 }
 0x37f   : > { %v3002_v6 = vpop.f32.mrf.mxu0  ;;  %4237 = vmatprep.mubr.f32.mxu1 %v2449_v31 }
 0x380   : > { %v6265_v60 = vadd.f32 %v3002_v6, %v2777_v43  ;;  %v2789_v20 = vpop.f32.mrf.mxu1  ;;  %v2456_v43 = vld [vmem:[#allocation3 + $0x12a] sm:$0xff]  ;;  %v2460_v6 = vld [vmem:[#allocation3 + $0x15a] sm:$0xff] }
 0x381   : > { %v3004_v58 = vpop.f32.mrf.mxu0 }
 0x382   : > { %v2792_v3 = vpop.f32.mrf.mxu1  ;;  %4238 = vmatmul.mubr.f32.gmra.mxu1 %v2450_v24 }
 0x383   : > { %v3007_v7 = vpop.f32.mrf.mxu0  ;;  %4240 = vmatprep.mubr.f32.mxu1 %v2451_v25 }
 0x384   : > { %v6267_v61 = vadd.f32 %v3007_v7, %v2782_v32  ;;  %v2794_v18 = vpop.f32.mrf.mxu1 }
 0x385   : > { %v3009_v41 = vpop.f32.mrf.mxu0 }
 0x386   : > { %v2797_v26 = vpop.f32.mrf.mxu1  ;;  %4241 = vmatmul.mubr.f32.gmra.mxu1 %v2452_v14 }
 0x387   : > { %v3012_v21 = vpop.f32.mrf.mxu0  ;;  %4243 = vmatprep.mubr.f32.mxu1 %v2453_v22 }
 0x388   : > { %v6269_v54 = vadd.f32 %v3012_v21, %v2787_v8  ;;  %v2799_v5 = vpop.f32.mrf.mxu1 }
 0x389   : > { %v3014_v42 = vpop.f32.mrf.mxu0 }
 0x38a   : > { %v2802_v48 = vpop.f32.mrf.mxu1  ;;  %4244 = vmatmul.mubr.f32.gmra.mxu1 %v2454_v52 }
 0x38b   : > { %v3017_v59 = vpop.f32.mrf.mxu0  ;;  %4246 = vmatprep.mubr.f32.mxu1 %v2455_v51 }
 0x38c   : > { %v6271_v57 = vadd.f32 %v3017_v59, %v2792_v3  ;;  %v2804_v55 = vpop.f32.mrf.mxu1 }
 0x38d   : > { %v3019_v40 = vpop.f32.mrf.mxu0  ;;  %v2903_v55 = vadd.f32 %v6194_v37, %v5995_v45 }
 0x38e   : > { %v2807_v17 = vpop.f32.mrf.mxu1  ;;  %4247 = vmatmul.mubr.f32.gmra.mxu1 %v2456_v43 }
 0x38f   : > { %v3022_v2 = vpop.f32.mrf.mxu0  ;;  %4249 = vmatprep.mubr.f32.mxu1 %v2457_v56 }
 0x390   : > { %v6273_v35 = vadd.f32 %v3022_v2, %v2797_v26  ;;  %v2809_v46 = vpop.f32.mrf.mxu1  ;;  %v2465_v26 = vld [vmem:[#allocation3 + $0x19a] sm:$0xff] }
 0x391   : > { %v3024_v32 = vpop.f32.mrf.mxu0  ;;  %v6646_v46 = vld [vmem:[#allocation14_spill] sm:$0xff] }
 0x392   : > { %v2812_v11 = vpop.f32.mrf.mxu1  ;;  %4250 = vmatmul.mubr.f32.gmra.mxu1 %v2458_v9  ;;  %v2908_v32 = vadd.f32 %v6198_v49, %v6646_v46 }
 0x393   : > { %v3027_v15 = vpop.f32.mrf.mxu0  ;;  %4252 = vmatprep.mubr.f32.mxu1 %v2459_v30 }
 0x394   : > { %v6275_v36 = vadd.f32 %v3027_v15, %v2802_v48  ;;  %v2814_v8 = vpop.f32.mrf.mxu1 }
 0x395   : > { %v3029_v31 = vpop.f32.mrf.mxu0 }
 0x396   : > { %v2817_v20 = vpop.f32.mrf.mxu1  ;;  %4253 = vmatmul.mubr.f32.gmra.mxu1 %v2460_v6 }
 0x397   : > { %v3032_v58 = vpop.f32.mrf.mxu0  ;;  %4255 = vmatprep.mubr.f32.mxu1 %v6153_v13  ;;  %v2466_v13 = vld [vmem:[#allocation3 + $0x1a2] sm:$0xff] }
 0x398   : > { %v6278_v24 = vadd.f32 %v3032_v58, %v2807_v17  ;;  %v2819_v3 = vpop.f32.mrf.mxu1 }
 0x399   : > { %v3034_v25 = vpop.f32.mrf.mxu0 }
 0x39a   : > { %v2822_v7 = vpop.f32.mrf.mxu1  ;;  %4256 = vmatmul.mubr.f32.gmra.mxu1 %v6161_v47 }
 0x39b   : > { %v3037_v18 = vpop.f32.mrf.mxu0  ;;  %4258 = vmatprep.mubr.f32.mxu1 %v6238_v28 }
 0x39c   : > { %v6282_v41 = vadd.f32 %v3037_v18, %v2812_v11  ;;  %v2824_v14 = vpop.f32.mrf.mxu1 }
 0x39d   : > { %v3039_v22 = vpop.f32.mrf.mxu0 }
 0x39e   : > { %v2827_v21 = vpop.f32.mrf.mxu1  ;;  %4259 = vmatmul.mubr.f32.gmra.mxu1 %v6244_v23 }
 0x39f   : > { %v3042_v5 = vpop.f32.mrf.mxu0  ;;  %4261 = vmatprep.mubr.f32.mxu1 %v2465_v26 }
 0x3a0   : > { %v6285_v42 = vadd.f32 %v3042_v5, %v2817_v20  ;;  %v2829_v52 = vpop.f32.mrf.mxu1 }
 0x3a1   : > { %v3044_v48 = vpop.f32.mrf.mxu0 }
 0x3a2   : > { %v2832_v51 = vpop.f32.mrf.mxu1  ;;  %4262 = vmatmul.mubr.f32.gmra.mxu1 %v2466_v13 }
 0x3a3   : > { %v3047_v47 = vpop.f32.mrf.mxu0 }
 0x3a4   : > { %v6287_v59 = vadd.f32 %v3047_v47, %v2822_v7  ;;  %v2834_v28 = vpop.f32.mrf.mxu1 }
 0x3a5   : > { %v3049_v40 = vpop.f32.mrf.mxu0 }
 0x3a6   : > { %v3127_v43 = vpop.f32.mrf.mxu1 }
 0x3a7   : > { %v3052_v17 = vpop.f32.mrf.mxu0  ;;  %v3128_v23 = vadd.f32 %v3127_v43, %v2903_v55 }
 0x3a8   : > { %v6291_v56 = vadd.f32 %v3052_v17, %v2827_v21  ;;  %v3129_v2 = vpop.f32.mrf.mxu1 }
 0x3a9   : > { %v3054_v9 = vpop.f32.mrf.mxu0 }
 0x3aa   : > { %v3132_v11 = vpop.f32.mrf.mxu1 }
 0x3ab   : > { %v3057_v30 = vpop.f32.mrf.mxu0  ;;  %v3133_v15 = vadd.f32 %v3132_v11, %v2908_v32 }
 0x3ac   : > { %v6295_v8 = vadd.f32 %v3057_v30, %v2832_v51  ;;  %v3134_v31 = vpop.f32.mrf.mxu1 }
 0x3ad   : > { %v3059_v6 = vpop.f32.mrf.mxu0 }
 0x3ae   : > { %v3137_v20 = vpop.f32.mrf.mxu1 }
 0x3af   : > { %v3138_v45 = vadd.f32 %v3137_v20, %v6204_v0  ;;  %v3352_v37 = vpop.f32.mrf.mxu0 }
 0x3b0   : > { %v6298_v58 = vadd.f32 %v3352_v37, %v3128_v23  ;;  %v3139_v3 = vpop.f32.mrf.mxu1 }
 0x3b1   : > { %v3354_v25 = vpop.f32.mrf.mxu0 }
 0x3b2   : > { %v3142_v7 = vpop.f32.mrf.mxu1 }
 0x3b3   : > { %v3143_v18 = vadd.f32 %v3142_v7, %v6208_v44  ;;  %v3357_v49 = vpop.f32.mrf.mxu0 }
 0x3b4   : > { %v6301_v14 = vadd.f32 %v3357_v49, %v3133_v15  ;;  %v3144_v26 = vpop.f32.mrf.mxu1 }
 0x3b5   : > { %v3359_v22 = vpop.f32.mrf.mxu0 }
 0x3b6   : > { %v3147_v21 = vpop.f32.mrf.mxu1 }
 0x3b7   : > { %v3148_v5 = vadd.f32 %v3147_v21, %v6212_v29  ;;  %v3362_v13 = vpop.f32.mrf.mxu0 }
 0x3b8   : > { %v6304_v52 = vadd.f32 %v3362_v13, %v3138_v45  ;;  %v3149_v0 = vpop.f32.mrf.mxu1 }
 0x3b9   : > { %v3364_v48 = vpop.f32.mrf.mxu0 }
 0x3ba   : > { %v3152_v51 = vpop.f32.mrf.mxu1 }
 0x3bb   : > { %v3153_v47 = vadd.f32 %v3152_v51, %v6216_v1  ;;  %v3367_v28 = vpop.f32.mrf.mxu0 }
 0x3bc   : > { %v6307_v55 = vadd.f32 %v3367_v28, %v3143_v18  ;;  %v3154_v44 = vpop.f32.mrf.mxu1 }
 0x3bd   : > { %v3369_v40 = vpop.f32.mrf.mxu0 }
 0x3be   : > { %v3157_v43 = vpop.f32.mrf.mxu1 }
 0x3bf   : > { %v3158_v17 = vadd.f32 %v3157_v43, %v6220_v53  ;;  %v3372_v23 = vpop.f32.mrf.mxu0 }
 0x3c0   : > { %v6310_v2 = vadd.f32 %v3372_v23, %v3148_v5  ;;  %v3159_v29 = vpop.f32.mrf.mxu1 }
 0x3c1   : > { %v3374_v46 = vpop.f32.mrf.mxu0 }
 0x3c2   : > { %v3162_v32 = vpop.f32.mrf.mxu1 }
 0x3c3   : > { %v3163_v9 = vadd.f32 %v3162_v32, %v6224_v50  ;;  %v3377_v11 = vpop.f32.mrf.mxu0 }
 0x3c4   : > { %v6313_v30 = vadd.f32 %v3377_v11, %v3153_v47  ;;  %v3164_v1 = vpop.f32.mrf.mxu1 }
 0x3c5   : > { %v3379_v15 = vpop.f32.mrf.mxu0 }
 0x3c6   : > { %v3167_v31 = vpop.f32.mrf.mxu1 }
 0x3c7   : > { %v3168_v6 = vadd.f32 %v3167_v31, %v6228_v12  ;;  %v3382_v20 = vpop.f32.mrf.mxu0 }
 0x3c8   : > { %v6316_v45 = vadd.f32 %v3382_v20, %v3158_v17  ;;  %v3169_v53 = vpop.f32.mrf.mxu1 }
 0x3c9   : > { %v3384_v37 = vpop.f32.mrf.mxu0 }
 0x3ca   : > { %v3172_v3 = vpop.f32.mrf.mxu1 }
 0x3cb   : > { %v3173_v25 = vadd.f32 %v3172_v3, %v6232_v38  ;;  %v3387_v7 = vpop.f32.mrf.mxu0 }
 0x3cc   : > { %v6319_v18 = vadd.f32 %v3387_v7, %v3163_v9  ;;  %v3174_v50 = vpop.f32.mrf.mxu1 }
 0x3cd   : > { %v3389_v49 = vpop.f32.mrf.mxu0 }
 0x3ce   : > { %v3177_v26 = vpop.f32.mrf.mxu1 }
 0x3cf   : > { %v3178_v22 = vadd.f32 %v3177_v26, %v6236_v4  ;;  %v3392_v21 = vpop.f32.mrf.mxu0 }
 0x3d0   : > { %v6322_v5 = vadd.f32 %v3392_v21, %v3168_v6  ;;  %v3179_v12 = vpop.f32.mrf.mxu1 }
 0x3d1   : > { %v3394_v13 = vpop.f32.mrf.mxu0 }
 0x3d2   : > { %v3182_v0 = vpop.f32.mrf.mxu1 }
 0x3d3   : > { %v3183_v48 = vadd.f32 %v3182_v0, %v6242_v10  ;;  %v3397_v51 = vpop.f32.mrf.mxu0 }
 0x3d4   : > { %v6325_v47 = vadd.f32 %v3397_v51, %v3173_v25  ;;  %v3184_v38 = vpop.f32.mrf.mxu1 }
 0x3d5   : > { %v3399_v28 = vpop.f32.mrf.mxu0 }
 0x3d6   : > { %v3187_v44 = vpop.f32.mrf.mxu1 }
 0x3d7   : > { %v3188_v40 = vadd.f32 %v3187_v44, %v6248_v27  ;;  %v3402_v43 = vpop.f32.mrf.mxu0 }
 0x3d8   : > { %v6328_v17 = vadd.f32 %v3402_v43, %v3178_v22  ;;  %v3189_v4 = vpop.f32.mrf.mxu1 }
 0x3d9   : > { %v3404_v23 = vpop.f32.mrf.mxu0 }
 0x3da   : > { %v3192_v29 = vpop.f32.mrf.mxu1 }
 0x3db   : > { %v3193_v46 = vadd.f32 %v3192_v29, %v6251_v39  ;;  %v3407_v32 = vpop.f32.mrf.mxu0 }
 0x3dc   : > { %v6331_v9 = vadd.f32 %v3407_v32, %v3183_v48  ;;  %v3194_v10 = vpop.f32.mrf.mxu1 }
 0x3dd   : > { %v3409_v11 = vpop.f32.mrf.mxu0 }
 0x3de   : > { %v3197_v1 = vpop.f32.mrf.mxu1 }
 0x3df   : > { %v3198_v15 = vadd.f32 %v3197_v1, %v6253_v33  ;;  %v3412_v31 = vpop.f32.mrf.mxu0 }
 0x3e0   : > { %v6334_v6 = vadd.f32 %v3412_v31, %v3188_v40  ;;  %v3199_v27 = vpop.f32.mrf.mxu1 }
 0x3e1   : > { %v3414_v20 = vpop.f32.mrf.mxu0 }
 0x3e2   : > { %v3202_v53 = vpop.f32.mrf.mxu1 }
 0x3e3   : > { %v3203_v37 = vadd.f32 %v3202_v53, %v6255_v34  ;;  %v3417_v3 = vpop.f32.mrf.mxu0 }
 0x3e4   : > { %v6337_v25 = vadd.f32 %v3417_v3, %v3193_v46  ;;  %v3204_v39 = vpop.f32.mrf.mxu1 }
 0x3e5   : > { %v3419_v7 = vpop.f32.mrf.mxu0 }
 0x3e6   : > { %v3207_v50 = vpop.f32.mrf.mxu1 }
 0x3e7   : > { %v3208_v49 = vadd.f32 %v3207_v50, %v6257_v63  ;;  %v3422_v26 = vpop.f32.mrf.mxu0 }
 0x3e8   : > { %v6340_v22 = vadd.f32 %v3422_v26, %v3198_v15  ;;  %v3209_v33 = vpop.f32.mrf.mxu1 }
 0x3e9   : > { %v3424_v21 = vpop.f32.mrf.mxu0 }
 0x3ea   : > { %v3212_v12 = vpop.f32.mrf.mxu1 }
 0x3eb   : > { %v3213_v13 = vadd.f32 %v3212_v12, %v6259_v19  ;;  %v3427_v0 = vpop.f32.mrf.mxu0 }
 0x3ec   : > { %v6343_v48 = vadd.f32 %v3427_v0, %v3203_v37  ;;  %v3214_v34 = vpop.f32.mrf.mxu1 }
 0x3ed   : > { %v3429_v51 = vpop.f32.mrf.mxu0 }
 0x3ee   : > { %v3217_v38 = vpop.f32.mrf.mxu1 }
 0x3ef   : > { %v3218_v28 = vadd.f32 %v3217_v38, %v6261_v16  ;;  %v3432_v44 = vpop.f32.mrf.mxu0 }
 0x3f0   : > { %v6346_v40 = vadd.f32 %v3432_v44, %v3208_v49  ;;  %v3219_v63 = vpop.f32.mrf.mxu1 }
 0x3f1   : > { %v3434_v43 = vpop.f32.mrf.mxu0 }
 0x3f2   : > { %v3222_v4 = vpop.f32.mrf.mxu1 }
 0x3f3   : > { %v3223_v23 = vadd.f32 %v3222_v4, %v6263_v62  ;;  %v3437_v29 = vpop.f32.mrf.mxu0 }
 0x3f4   : > { %v6349_v46 = vadd.f32 %v3437_v29, %v3213_v13  ;;  %v3224_v19 = vpop.f32.mrf.mxu1 }
 0x3f5   : > { %v3439_v32 = vpop.f32.mrf.mxu0 }
 0x3f6   : > { %v3227_v10 = vpop.f32.mrf.mxu1 }
 0x3f7   : > { %v3228_v11 = vadd.f32 %v3227_v10, %v6265_v60  ;;  %v3442_v1 = vpop.f32.mrf.mxu0 }
 0x3f8   : > { %v6352_v15 = vadd.f32 %v3442_v1, %v3218_v28  ;;  %v3229_v16 = vpop.f32.mrf.mxu1 }
 0x3f9   : > { %v3444_v31 = vpop.f32.mrf.mxu0 }
 0x3fa   : > { %v3232_v27 = vpop.f32.mrf.mxu1 }
 0x3fb   : > { %v3233_v20 = vadd.f32 %v3232_v27, %v6267_v61  ;;  %v3447_v53 = vpop.f32.mrf.mxu0 }
 0x3fc   : > { %v6355_v37 = vadd.f32 %v3447_v53, %v3223_v23  ;;  %v3234_v62 = vpop.f32.mrf.mxu1 }
 0x3fd   : > { %v3449_v3 = vpop.f32.mrf.mxu0 }
 0x3fe   : > { %v3237_v39 = vpop.f32.mrf.mxu1 }
 0x3ff   : > { %v3238_v7 = vadd.f32 %v3237_v39, %v6269_v54  ;;  %v3452_v50 = vpop.f32.mrf.mxu0 }
 0x400   : > { %v6358_v49 = vadd.f32 %v3452_v50, %v3228_v11  ;;  %v3239_v60 = vpop.f32.mrf.mxu1 }
 0x401   : > { %v3454_v26 = vpop.f32.mrf.mxu0 }
 0x402   : > { %v3242_v33 = vpop.f32.mrf.mxu1 }
 0x403   : > { %v3243_v21 = vadd.f32 %v3242_v33, %v6271_v57  ;;  %v3457_v12 = vpop.f32.mrf.mxu0 }
 0x404   : > { %v6361_v13 = vadd.f32 %v3457_v12, %v3233_v20  ;;  %v3244_v61 = vpop.f32.mrf.mxu1 }
 0x405   : > { %v3459_v0 = vpop.f32.mrf.mxu0 }
 0x406   : > { %v3247_v34 = vpop.f32.mrf.mxu1 }
 0x407   : > { %v3248_v51 = vadd.f32 %v3247_v34, %v6273_v35  ;;  %v3462_v38 = vpop.f32.mrf.mxu0 }
 0x408   : > { %v6364_v28 = vadd.f32 %v3462_v38, %v3238_v7  ;;  %v3249_v54 = vpop.f32.mrf.mxu1 }
 0x409   : > { %v3464_v44 = vpop.f32.mrf.mxu0 }
 0x40a   : > { %v3252_v63 = vpop.f32.mrf.mxu1 }
 0x40b   : > { %v3253_v43 = vadd.f32 %v3252_v63, %v6275_v36  ;;  %v3467_v4 = vpop.f32.mrf.mxu0  ;;  %v6399_v63 = vld [vmem:[%s6603_s5] ss:$0 sm:$0xff] }
 0x40c   : > { %v6367_v23 = vadd.f32 %v3467_v4, %v3243_v21  ;;  %v3254_v57 = vpop.f32.mrf.mxu1  ;;  %v6407_v4 = vld [vmem:[%s6604_s6] ss:$0 sm:$0xff] }
 0x40d   : > { %v3469_v29 = vpop.f32.mrf.mxu0 }
 0x40e   : > { %v3257_v19 = vpop.f32.mrf.mxu1 }
 0x40f   : > { %v3258_v32 = vadd.f32 %v3257_v19, %v6278_v24  ;;  %v3472_v10 = vpop.f32.mrf.mxu0 }
 0x410   : > { %v6370_v11 = vadd.f32 %v3472_v10, %v3248_v51  ;;  %v3259_v35 = vpop.f32.mrf.mxu1 }
 0x411   : > { %v3474_v1 = vpop.f32.mrf.mxu0 }
 0x412   : > { %v3262_v16 = vpop.f32.mrf.mxu1 }
 0x413   : > { %v6373_v31 = vadd.f32 %v3262_v16, %v6282_v41  ;;  %v3477_v27 = vpop.f32.mrf.mxu0 }
 0x414   : > { %v6375_v20 = vadd.f32 %v3477_v27, %v3253_v43  ;;  %v3264_v36 = vpop.f32.mrf.mxu1 }
 0x415   : > { %v3479_v53 = vpop.f32.mrf.mxu0 }
 0x416   : > { %v3267_v62 = vpop.f32.mrf.mxu1 }
 0x417   : > { %v6378_v3 = vadd.f32 %v3267_v62, %v6285_v42  ;;  %v3482_v39 = vpop.f32.mrf.mxu0 }
 0x418   : > { %v6380_v24 = vadd.f32 %v3482_v39, %v3258_v32  ;;  %v3269_v7 = vpop.f32.mrf.mxu1 }
 0x419   : > { %v3484_v50 = vpop.f32.mrf.mxu0 }
 0x41a   : > { %v3272_v60 = vpop.f32.mrf.mxu1 }
 0x41b   : > { %v6383_v26 = vadd.f32 %v3272_v60, %v6287_v59  ;;  %v6385_v41 = vpop.f32.mrf.mxu0 }
 0x41c   : > { %v3274_v33 = vpop.f32.mrf.mxu1 }
 0x41d   : > { %v3489_v21 = vpop.f32.mrf.mxu0 }
 0x41e   : > { %v3277_v12 = vpop.f32.mrf.mxu1 }
 0x41f   : > { %v6388_v61 = vadd.f32 %v3277_v12, %v6291_v56  ;;  %v6390_v0 = vpop.f32.mrf.mxu0 }
 0x420   : > { %v3279_v42 = vpop.f32.mrf.mxu1 }
 0x421   : > { %v3494_v34 = vpop.f32.mrf.mxu0 }
 0x422   : > { %v6392_v51 = vpop.f32.mrf.mxu1 }
 0x423   : > { %v6394_v38 = vpop.f32.mrf.mxu0 }
 0x424   : > { %v3284_v54 = vpop.f32.mrf.mxu1 }
 0x425   : > { %v3499_v44 = vpop.f32.mrf.mxu0 }
 0x426   : > { %v4218_v59 = vpop.f32.mrf.mxu1 }
 0x427   : > { %v6401_v43 = vpop.f32.mrf.mxu0  ;;  %v3583_v56 = vadd.f32 %v4218_v59, %v6301_v14 }
 0x428   : > { %v3577_v57 = vpop.f32.mrf.mxu1 }
 0x429   : > { %v3744_v29 = vmul.f32 %v6399_v63, %v3583_v56  ;;  %v3504_v19 = vpop.f32.mrf.mxu0  ;;  %v3578_v32 = vadd.f32 %v3577_v57, %v6298_v58 }
 0x42a   : > { %v4221_v10 = vpop.f32.mrf.mxu1 }
 0x42b   : > { %v3783_v35 = vadd.f32 %v6407_v4, %v3744_v29  ;;  %v3743_v1 = vmul.f32 %v6399_v63, %v3578_v32  ;;  %v6413_v16 = vpop.f32.mrf.mxu0  ;;  %v3593_v14 = vadd.f32 %v4221_v10, %v6307_v55 }
 0x42c   : > { %v3587_v27 = vpop.f32.mrf.mxu1 }
 0x42d   : > { %v3815_v36 = vmax.f32 %v3783_v35, 0.0  ;;  %v3782_v53 = vadd.f32 %v6407_v4, %v3743_v1  ;;  %v3746_v62 = vmul.f32 %v6399_v63, %v3593_v14  ;;  %v3588_v39 = vadd.f32 %v3587_v27, %v6304_v52  ;;  %v3509_v7 = vpop.f32.mrf.mxu0 }
 0x42e   : > { %v4224_v50 = vpop.f32.mrf.mxu1 }
 0x42f   : > { %3847 = vst [vmem:[%s6421_s14 + $0x8] sm:$0xff] %v3815_v36  ;;  %v3814_v58 = vmax.f32 %v3782_v53, 0.0  ;;  %v3785_v55 = vadd.f32 %v6407_v4, %v3746_v62  ;;  %v3745_v60 = vmul.f32 %v6399_v63, %v3588_v39  ;;  %v3603_v33 = vadd.f32 %v4224_v50, %v6313_v30 }
 0x430   : > { %v3597_v21 = vpop.f32.mrf.mxu1 }
 0x431   : > { %3846 = vst [vmem:[%s6421_s14] sm:$0xff] %v3814_v58  ;;  %v3817_v52 = vmax.f32 %v3785_v55, 0.0  ;;  %v3784_v12 = vadd.f32 %v6407_v4, %v3745_v60  ;;  %v3748_v42 = vmul.f32 %v6399_v63, %v3603_v33  ;;  %v3598_v34 = vadd.f32 %v3597_v21, %v6310_v2 }
 0x432   : > { %v4227_v54 = vpop.f32.mrf.mxu1 }
 0x433   : > { %3849 = vst [vmem:[%s6421_s14 + $0x18] sm:$0xff] %v3817_v52  ;;  %v3816_v44 = vmax.f32 %v3784_v12, 0.0  ;;  %v3787_v59 = vadd.f32 %v6407_v4, %v3748_v42  ;;  %v3747_v56 = vmul.f32 %v6399_v63, %v3598_v34  ;;  %v3613_v30 = vadd.f32 %v4227_v54, %v6319_v18 }
 0x434   : > { %v3607_v57 = vpop.f32.mrf.mxu1 }
 0x435   : > { %3848 = vst [vmem:[%s6421_s14 + $0x10] sm:$0xff] %v3816_v44  ;;  %v3819_v29 = vmax.f32 %v3787_v59, 0.0  ;;  %v3786_v19 = vadd.f32 %v6407_v4, %v3747_v56  ;;  %v3750_v32 = vmul.f32 %v6399_v63, %v3613_v30  ;;  %v3608_v2 = vadd.f32 %v3607_v57, %v6316_v45 }
 0x436   : > { %v4230_v10 = vpop.f32.mrf.mxu1 }
 0x437   : > { %3851 = vst [vmem:[%s6421_s14 + $0x28] sm:$0xff] %v3819_v29  ;;  %v3818_v35 = vmax.f32 %v3786_v19, 0.0  ;;  %v3789_v1 = vadd.f32 %v6407_v4, %v3750_v32  ;;  %v3749_v14 = vmul.f32 %v6399_v63, %v3608_v2  ;;  %v3623_v18 = vadd.f32 %v4230_v10, %v6325_v47 }
 0x438   : > { %v3617_v27 = vpop.f32.mrf.mxu1 }
 0x439   : > { %3850 = vst [vmem:[%s6421_s14 + $0x20] sm:$0xff] %v3818_v35  ;;  %v3821_v36 = vmax.f32 %v3789_v1, 0.0  ;;  %v3788_v53 = vadd.f32 %v6407_v4, %v3749_v14  ;;  %v3752_v62 = vmul.f32 %v6399_v63, %v3623_v18  ;;  %v3618_v45 = vadd.f32 %v3617_v27, %v6322_v5 }
 0x43a   : > { %v4233_v39 = vpop.f32.mrf.mxu1 }
 0x43b   : > { %3853 = vst [vmem:[%s6421_s14 + $0x38] sm:$0xff] %v3821_v36  ;;  %v3820_v7 = vmax.f32 %v3788_v53, 0.0  ;;  %v3791_v50 = vadd.f32 %v6407_v4, %v3752_v62  ;;  %v3751_v58 = vmul.f32 %v6399_v63, %v3618_v45  ;;  %v3633_v47 = vadd.f32 %v4233_v39, %v6331_v9 }
 0x43c   : > { %v3627_v55 = vpop.f32.mrf.mxu1 }
 0x43d   : > { %3852 = vst [vmem:[%s6421_s14 + $0x30] sm:$0xff] %v3820_v7  ;;  %v3823_v60 = vmax.f32 %v3791_v50, 0.0  ;;  %v3790_v33 = vadd.f32 %v6407_v4, %v3751_v58  ;;  %v3754_v21 = vmul.f32 %v6399_v63, %v3633_v47  ;;  %v3628_v5 = vadd.f32 %v3627_v55, %v6328_v17 }
 0x43e   : > { %v4236_v52 = vpop.f32.mrf.mxu1 }
 0x43f   : > { %3855 = vst [vmem:[%s6421_s14 + $0x48] sm:$0xff] %v3823_v60  ;;  %v3822_v12 = vmax.f32 %v3790_v33, 0.0  ;;  %v3793_v42 = vadd.f32 %v6407_v4, %v3754_v21  ;;  %v3753_v34 = vmul.f32 %v6399_v63, %v3628_v5  ;;  %v3643_v9 = vadd.f32 %v4236_v52, %v6337_v25 }
 0x440   : > { %v3637_v54 = vpop.f32.mrf.mxu1 }
 0x441   : > { %3854 = vst [vmem:[%s6421_s14 + $0x40] sm:$0xff] %v3822_v12  ;;  %v3825_v44 = vmax.f32 %v3793_v42, 0.0  ;;  %v3792_v59 = vadd.f32 %v6407_v4, %v3753_v34  ;;  %v3756_v56 = vmul.f32 %v6399_v63, %v3643_v9  ;;  %v3638_v17 = vadd.f32 %v3637_v54, %v6334_v6 }
 0x442   : > { %v4239_v30 = vpop.f32.mrf.mxu1 }
 0x443   : > { %3857 = vst [vmem:[%s6421_s14 + $0x58] sm:$0xff] %v3825_v44  ;;  %v3824_v57 = vmax.f32 %v3792_v59, 0.0  ;;  %v3795_v29 = vadd.f32 %v6407_v4, %v3756_v56  ;;  %v3755_v19 = vmul.f32 %v6399_v63, %v3638_v17  ;;  %v3653_v25 = vadd.f32 %v4239_v30, %v6343_v48 }
 0x444   : > { %v3647_v32 = vpop.f32.mrf.mxu1 }
 0x445   : > { %3856 = vst [vmem:[%s6421_s14 + $0x50] sm:$0xff] %v3824_v57  ;;  %v3827_v2 = vmax.f32 %v3795_v29, 0.0  ;;  %v3794_v10 = vadd.f32 %v6407_v4, %v3755_v19  ;;  %v3758_v35 = vmul.f32 %v6399_v63, %v3653_v25  ;;  %v3648_v6 = vadd.f32 %v3647_v32, %v6340_v22 }
 0x446   : > { %v4242_v1 = vpop.f32.mrf.mxu1 }
 0x447   : > { %3859 = vst [vmem:[%s6421_s14 + $0x68] sm:$0xff] %v3827_v2  ;;  %v3826_v14 = vmax.f32 %v3794_v10, 0.0  ;;  %v3797_v18 = vadd.f32 %v6407_v4, %v3758_v35  ;;  %v3757_v27 = vmul.f32 %v6399_v63, %v3648_v6  ;;  %v3663_v48 = vadd.f32 %v4242_v1, %v6349_v46 }
 0x448   : > { %v3657_v36 = vpop.f32.mrf.mxu1 }
 0x449   : > { %3858 = vst [vmem:[%s6421_s14 + $0x60] sm:$0xff] %v3826_v14  ;;  %v3829_v53 = vmax.f32 %v3797_v18, 0.0  ;;  %v3796_v62 = vadd.f32 %v6407_v4, %v3757_v27  ;;  %v3760_v45 = vmul.f32 %v6399_v63, %v3663_v48  ;;  %v3658_v22 = vadd.f32 %v3657_v36, %v6346_v40 }
 0x44a   : > { %v4245_v39 = vpop.f32.mrf.mxu1 }
 0x44b   : > { %3861 = vst [vmem:[%s6421_s14 + $0x78] sm:$0xff] %v3829_v53  ;;  %v3828_v7 = vmax.f32 %v3796_v62, 0.0  ;;  %v3799_v50 = vadd.f32 %v6407_v4, %v3760_v45  ;;  %v3759_v58 = vmul.f32 %v6399_v63, %v3658_v22  ;;  %v3673_v46 = vadd.f32 %v4245_v39, %v6355_v37 }
 0x44c   : > { %v3667_v47 = vpop.f32.mrf.mxu1  ;;  %v3493_v39 = vadd.f32 %v6390_v0, %v6378_v3 }
 0x44d   : > { %3860 = vst [vmem:[%s6421_s14 + $0x70] sm:$0xff] %v3828_v7  ;;  %v3831_v55 = vmax.f32 %v3799_v50, 0.0  ;;  %v3798_v60 = vadd.f32 %v6407_v4, %v3759_v58  ;;  %v3762_v33 = vmul.f32 %v6399_v63, %v3673_v46  ;;  %v3668_v40 = vadd.f32 %v3667_v47, %v6352_v15 }
 0x44e   : > { %v4248_v21 = vpop.f32.mrf.mxu1  ;;  %v3283_v7 = vadd.f32 %v6392_v51, %v6295_v8  ;;  %v3503_v51 = vadd.f32 %v6401_v43, %v6388_v61 }
 0x44f   : > { %3863 = vst [vmem:[%s6421_s14 + $0x88] sm:$0xff] %v3831_v55  ;;  %v3830_v5 = vmax.f32 %v3798_v60, 0.0  ;;  %v3801_v52 = vadd.f32 %v6407_v4, %v3762_v33  ;;  %v3761_v12 = vmul.f32 %v6399_v63, %v3668_v40  ;;  %v3683_v37 = vadd.f32 %v4248_v21, %v6361_v13 }
 0x450   : > { %v3677_v42 = vpop.f32.mrf.mxu1  ;;  %v3508_v47 = vadd.f32 %v6413_v16, %v3283_v7 }
 0x451   : > { %3862 = vst [vmem:[%s6421_s14 + $0x80] sm:$0xff] %v3830_v5  ;;  %v3833_v34 = vmax.f32 %v3801_v52, 0.0  ;;  %v3800_v9 = vadd.f32 %v6407_v4, %v3761_v12  ;;  %v3764_v54 = vmul.f32 %v6399_v63, %v3683_v37  ;;  %v3678_v15 = vadd.f32 %v3677_v42, %v6358_v49 }
 0x452   : > { %v4251_v44 = vpop.f32.mrf.mxu1 }
 0x453   : > { %3865 = vst [vmem:[%s6421_s14 + $0x98] sm:$0xff] %v3833_v34  ;;  %v3832_v59 = vmax.f32 %v3800_v9, 0.0  ;;  %v3803_v56 = vadd.f32 %v6407_v4, %v3764_v54  ;;  %v3763_v17 = vmul.f32 %v6399_v63, %v3678_v15  ;;  %v3693_v13 = vadd.f32 %v4251_v44, %v6367_v23 }
 0x454   : > { %v3687_v30 = vpop.f32.mrf.mxu1  ;;  %v3488_v23 = vadd.f32 %v6385_v41, %v6373_v31  ;;  %v3498_v31 = vadd.f32 %v6394_v38, %v6383_v26 }
 0x455   : > { %3864 = vst [vmem:[%s6421_s14 + $0x90] sm:$0xff] %v3832_v59  ;;  %v3835_v57 = vmax.f32 %v3803_v56, 0.0  ;;  %v3802_v29 = vadd.f32 %v6407_v4, %v3763_v17  ;;  %v3766_v19 = vmul.f32 %v6399_v63, %v3693_v13  ;;  %v3688_v49 = vadd.f32 %v3687_v30, %v6364_v28 }
 0x456   : > { %v4254_v25 = vpop.f32.mrf.mxu1 }
 0x457   : > { %3867 = vst [vmem:[%s6421_s14 + $0xa8] sm:$0xff] %v3835_v57  ;;  %v3834_v32 = vmax.f32 %v3802_v29, 0.0  ;;  %v3805_v2 = vadd.f32 %v6407_v4, %v3766_v19  ;;  %v3765_v10 = vmul.f32 %v6399_v63, %v3688_v49  ;;  %v3703_v35 = vadd.f32 %v4254_v25, %v6375_v20 }
 0x458   : > { %v3697_v6 = vpop.f32.mrf.mxu1 }
 0x459   : > { %3866 = vst [vmem:[%s6421_s14 + $0xa0] sm:$0xff] %v3834_v32  ;;  %v3837_v1 = vmax.f32 %v3805_v2, 0.0  ;;  %v3804_v14 = vadd.f32 %v6407_v4, %v3765_v10  ;;  %v3768_v28 = vmul.f32 %v6399_v63, %v3703_v35  ;;  %v3698_v18 = vadd.f32 %v3697_v6, %v6370_v11 }
 0x45a   : > { %v4257_v27 = vpop.f32.mrf.mxu1 }
 0x45b   : > { %3869 = vst [vmem:[%s6421_s14 + $0xb8] sm:$0xff] %v3837_v1  ;;  %v3836_v48 = vmax.f32 %v3804_v14, 0.0  ;;  %v3807_v36 = vadd.f32 %v6407_v4, %v3768_v28  ;;  %v3767_v20 = vmul.f32 %v6399_v63, %v3698_v18  ;;  %v3713_v53 = vadd.f32 %v4257_v27, %v3488_v23 }
 0x45c   : > { %v3707_v41 = vpop.f32.mrf.mxu1 }
 0x45d   : > { %3868 = vst [vmem:[%s6421_s14 + $0xb0] sm:$0xff] %v3836_v48  ;;  %v3839_v62 = vmax.f32 %v3807_v36, 0.0  ;;  %v3806_v45 = vadd.f32 %v6407_v4, %v3767_v20  ;;  %v3770_v11 = vmul.f32 %v6399_v63, %v3713_v53  ;;  %v3708_v22 = vadd.f32 %v3707_v41, %v6380_v24 }
 0x45e   : > { %v4260_v50 = vpop.f32.mrf.mxu1 }
 0x45f   : > { %3871 = vst [vmem:[%s6421_s14 + $0xc8] sm:$0xff] %v3839_v62  ;;  %v3838_v26 = vmax.f32 %v3806_v45, 0.0  ;;  %v3809_v38 = vadd.f32 %v6407_v4, %v3770_v11  ;;  %v3769_v58 = vmul.f32 %v6399_v63, %v3708_v22  ;;  %v3723_v46 = vadd.f32 %v4260_v50, %v3498_v31 }
 0x460   : > { %v3717_v55 = vpop.f32.mrf.mxu1 }
 0x461   : > { %3870 = vst [vmem:[%s6421_s14 + $0xc0] sm:$0xff] %v3838_v26  ;;  %v3841_v24 = vmax.f32 %v3809_v38, 0.0  ;;  %v3808_v3 = vadd.f32 %v6407_v4, %v3769_v58  ;;  %v3772_v8 = vmul.f32 %v6399_v63, %v3723_v46  ;;  %v3718_v0 = vadd.f32 %v3717_v55, %v3493_v39 }
 0x462   : > { %v4263_v60 = vpop.f32.mrf.mxu1 }
 0x463   : > { %3873 = vst [vmem:[%s6421_s14 + $0xd8] sm:$0xff] %v3841_v24  ;;  %v3840_v33 = vmax.f32 %v3808_v3, 0.0  ;;  %v3811_v16 = vadd.f32 %v6407_v4, %v3772_v8  ;;  %v3771_v40 = vmul.f32 %v6399_v63, %v3718_v0  ;;  %v3733_v21 = vadd.f32 %v4263_v60, %v3508_v47 }
 0x464   : > { %v3727_v5 = vpop.f32.mrf.mxu1 }
 0x465   : > { %3872 = vst [vmem:[%s6421_s14 + $0xd0] sm:$0xff] %v3840_v33  ;;  %v3843_v52 = vmax.f32 %v3811_v16, 0.0  ;;  %v3810_v12 = vadd.f32 %v6407_v4, %v3771_v40  ;;  %v3774_v61 = vmul.f32 %v6399_v63, %v3733_v21  ;;  %v3728_v43 = vadd.f32 %v3727_v5, %v3503_v51 }
 0x467   : > { %3875 = vst [vmem:[%s6421_s14 + $0xe8] sm:$0xff] %v3843_v52  ;;  %v3842_v37 = vmax.f32 %v3810_v12, 0.0  ;;  %v3813_v42 = vadd.f32 %v6407_v4, %v3774_v61  ;;  %v3773_v34 = vmul.f32 %v6399_v63, %v3728_v43 }
 0x469   : > { %3874 = vst [vmem:[%s6421_s14 + $0xe0] sm:$0xff] %v3842_v37  ;;  %v3845_v9 = vmax.f32 %v3813_v42, 0.0  ;;  %v3812_v54 = vadd.f32 %v6407_v4, %v3773_v34 }
 0x46b   : > { %3877 = vst [vmem:[%s6421_s14 + $0xf8] sm:$0xff] %v3845_v9  ;;  %v3844_v15 = vmax.f32 %v3812_v54, 0.0 }
 0x46d   : > { %3876 = vst [vmem:[%s6421_s14 + $0xf0] sm:$0xff] %v3844_v15 }
 0x46e   : > { %4465 = shalt.err (!%p4462_p3)
}
 0x46f   : > { %s4466_s29 = scalar_lea.hbm %s6551_s10, 4096  ;;  %s4470_s13 = scalar_lea.hbm %s6605_s7, 8192 }
 0x470   : > { %p4467_p11 = scmp.ne.s32.totalorder %s6551_s10, %s4466_s29  ;;  %p4471_p4 = scmp.lt.s32.totalorder %s6551_s10, %s6605_s7 }
 0x471   : > { %p4472_p6 = scmp.lt.s32.totalorder %s4470_s13, %s4466_s29 }
 0x472   : > { %p4468_p9 = pnand %p4467_p11, %p6647_p2 }
 0x473   : > { %p4473_p8 = por %p4472_p6, %p4471_p4 }
 0x474   : > { %p4469_p1 = pneg %p4468_p9 }
 0x476   : > { %p4474_p5 = pnand %p4473_p8, %p4469_p1 }
 0x478   : > { %4477 = shalt.err (!%p4474_p5)
}
 0x479   : > { %s4529_s1 = smov 128   ;;  %s4530_s15 = smov 8  }
 0x47a   : > { %4274 = dma.vmem_to_hbm [thread:$0]  (%p6647_p2), %s6553_s18, 4096, %s6551_s10, %s3879_s30, %s4529_s1, %s4529_s1, %s4530_s15  }
 0x47b PF: > { %s3907_s28 = sand.u32 1, %s4508_s24   ;;  %p6648_p7 = scmp.ne.s32.totalorder %s6621_s8, 0 }
 0x47c   : > { %p6649_p12 = scmp.ge.s32.totalorder %s4520_s27, 2  ;;  %s3908_s9 = scalar_lea.sflag [#allocation6], %s3907_s28 }
 0x47e   : > { %p4288_p13 = pnand %p6649_p12, %p6648_p7 }
 0x480   : > { %p4289_p0 = pneg %p4288_p13 }
 0x482   : > { %4503 = dma.done.wait (%p4289_p0), %s3908_s9, 4096  }
 0x483   : > { %4505 = vsyncadd (%p4289_p0), %s3908_s9, 4294963200  ;;  %p21_p10 = scmp.ge.s32.totalorder %s4649_s23, 4   ;;  %s6650_s24 = smov %s4512_s25 }
 0x484   : > { %s6651_s25 = smov %s4516_s26  ;;  %s6652_s26 = smov %s4665_s12 }
 0x485   : > { %s6653_s27 = smov %s4649_s23  ;;  %23 = sbr.rel (!%p21_p10) target bundleno = 8 (0x8), region = 107 }
 0x48a   :  { %3913 = vsyncpa [#allocation5], 1 }
 0x48b   :  { %3915 = vsyncpa [#allocation5 + $0x1], 1 }
 0x48c   :  { %3916 = vsyncpa [#allocation8], 1 }
 0x48d   :  { %3917 = vsyncpa [#allocation6], 1 }
 0x48e   :  { %3919 = vsyncpa [#allocation6 + $0x1], 1 }

</bundles_post_ra>
